<compile_context>
chip_gen: v7x
topology: tpu7x:2x2x1
jax: 0.10.0
libtpu: 0.0.40
codegen_flags: <defaults>
</compile_context>

<pallas_src>
import functools

import jax
import jax.numpy as jnp
from jax.experimental import pallas as pl
from jax.experimental.pallas import tpu as pltpu


# ----------------------------- Pallas kernel -------------------------------

def _bottleneck_kernel(h, w, x_ref, w1_ref, sh1_ref, w2_ref, sh2_ref,
                       w3_ref, sh3_ref, o_ref, pad_ref):
    # x_ref:   (1, H*W, Cin)      bf16  (one image per grid step; also residual)
    # w1_ref:  (Cin, P)           bf16  (BN1 scale folded into columns)
    # w2_ref:  (9*P, P)           bf16  (tap-major rows: (kh*3+kw)*P + cin)
    # w3_ref:  (P, Cout)          bf16
    # sh*_ref: (1, C)             f32   (folded BatchNorm shift)
    # o_ref:   (1, H*W, Cout)     bf16
    # pad_ref: (H+2, W+2, P)      bf16  VMEM scratch (zero-padded out1)
    _, hw, cin = x_ref.shape
    planes = w1_ref.shape[1]
    pdt = pad_ref.dtype

    x2d = x_ref[0]                                            # (H*W, Cin) bf16

    # ---- conv1 (1x1, BN1 scale pre-folded) + shift + relu ----
    y1 = jnp.dot(x2d, w1_ref[...], preferred_element_type=jnp.float32)
    y1 = jnp.maximum(y1 + sh1_ref[...], 0.0)                  # (H*W, P) f32

    # ---- conv2 (3x3, stride 1, pad 1, BN2 scale pre-folded) + shift + relu ----
    # Zero only the 1-pixel border every step (interior is fully overwritten);
    # do NOT gate on program_id==0: scratch is per-core under "parallel".
    zrow = jnp.zeros((1, w + 2, planes), pdt)
    zcol = jnp.zeros((h + 2, 1, planes), pdt)
    pad_ref[0:1, :, :] = zrow
    pad_ref[h + 1:h + 2, :, :] = zrow
    pad_ref[:, 0:1, :] = zcol
    pad_ref[:, w + 1:w + 2, :] = zcol
    pad_ref[1:h + 1, 1:w + 1, :] = y1.astype(pdt).reshape(h, w, planes)

    # Nine accumulating MXU dots straight off static window slices of the bf16
    # pad buffer (no explicit im2col patch matrix / extra store+reload pass).
    acc = jnp.zeros((hw, planes), jnp.float32)
    for t in range(9):                                        # static unroll
        kh, kw = t // 3, t % 3
        tap = pad_ref[kh:kh + h, kw:kw + w, :].reshape(hw, planes)
        acc = acc + jnp.dot(tap, w2_ref[t * planes:(t + 1) * planes, :],
                            preferred_element_type=jnp.float32)
    y2 = jnp.maximum(acc + sh2_ref[...], 0.0)                 # (H*W, P) f32

    # ---- conv3 (1x1, BN3 scale pre-folded) + shift + residual + relu ----
    y3 = jnp.dot(y2.astype(jnp.bfloat16), w3_ref[...],
                 preferred_element_type=jnp.float32)
    y3 = y3 + sh3_ref[...] + x2d.astype(jnp.float32)          # f32 residual add
    o_ref[0] = jnp.maximum(y3, 0.0).astype(o_ref.dtype)


# ------------------------ One-time weight-side prep ------------------------

def nm_prune(w, n=2, m=4):
    """N:M structured magnitude pruning along the flattened input dims (SparseConv,
    inference semantics: static weight mask)."""
    cout = w.shape[0]
    flat = w.reshape(cout, -1)
    g = flat.reshape(cout, flat.shape[1] // m, m)
    order = jnp.argsort(jnp.abs(g), axis=-1)          # ascending
    rank = jnp.argsort(order, axis=-1)
    mask = (rank >= (m - n)).astype(w.dtype)          # keep n largest of m
    return (g * mask).reshape(w.shape)


def prepare_params(params, eps=1e-5):
    """Fold BN scale into weight columns (f32), reshape conv weights to matmul
    layout, cast to bf16, keep only the BN shift in f32.  Done ONCE."""
    planes, cin = params["w1"].shape[:2]
    cout = params["w3"].shape[0]

    def bn_fold(g, b, m, v):
        sc = g / jnp.sqrt(v + eps)
        sh = b - m * sc
        return sc.astype(jnp.float32), sh[None, :].astype(jnp.float32)

    sc1, sh1 = bn_fold(params["g1"], params["b1"], params["m1"], params["v1"])
    sc2, sh2 = bn_fold(params["g2"], params["b2"], params["m2"], params["v2"])
    sc3, sh3 = bn_fold(params["g3"], params["b3"], params["m3"], params["v3"])

    w1 = params["w1"].reshape(planes, cin).T                       # (Cin, P)
    # (Cout, Cin, 3, 3) -> (kh, kw, Cin, Cout) -> (9*Cin, Cout), tap-major rows.
    w2 = jnp.transpose(params["w2"], (2, 3, 1, 0)).reshape(9 * planes, planes)
    w3 = params["w3"].reshape(cout, planes).T                      # (P, Cout)

    w1 = (w1 * sc1[None, :]).astype(jnp.bfloat16)
    w2 = (w2 * sc2[None, :]).astype(jnp.bfloat16)
    w3 = (w3 * sc3[None, :]).astype(jnp.bfloat16)
    return dict(w1=w1, sh1=sh1, w2=w2, sh2=sh2, w3=w3, sh3=sh3)


# ------------------------------ Forward pass --------------------------------

def bottleneck_forward(x_nhwc, prepped, stride=1):
    """NHWC in / NHWC out (bf16).  One fused Pallas kernel, grid over batch."""
    if stride != 1:
        raise NotImplementedError("stride>1 / downsample branch not modeled")
    n, h, w, cin = x_nhwc.shape
    planes = prepped["w1"].shape[1]
    cout = prepped["w3"].shape[1]
    assert cin == cout, "residual add requires inplanes == planes * expansion"

    # Free metadata reshape: present activations as (N, H*W, C) slabs so the
    # kernel never reshapes x / out and the store has channels in lanes.
    x = x_nhwc.astype(jnp.bfloat16).reshape(n, h * w, cin)

    kernel = functools.partial(_bottleneck_kernel, h, w)

    def full(a):
        nd = a.ndim
        return pl.BlockSpec(a.shape, lambda b, _nd=nd: (0,) * _nd)

    out = pl.pallas_call(
        kernel,
        grid=(n,),
        in_specs=[
            pl.BlockSpec((1, h * w, cin), lambda b: (b, 0, 0)),
            full(prepped["w1"]), full(prepped["sh1"]),
            full(prepped["w2"]), full(prepped["sh2"]),
            full(prepped["w3"]), full(prepped["sh3"]),
        ],
        out_specs=pl.BlockSpec((1, h * w, cout), lambda b: (b, 0, 0)),
        out_shape=jax.ShapeDtypeStruct((n, h * w, cout), jnp.bfloat16),
        scratch_shapes=[
            pltpu.VMEM((h + 2, w + 2, planes), jnp.bfloat16),   # padded out1
        ],
        compiler_params=pltpu.CompilerParams(
            dimension_semantics=("parallel",),
            vmem_limit_bytes=32 * 1024 * 1024),
    )(x, prepped["w1"], prepped["sh1"], prepped["w2"], prepped["sh2"],
      prepped["w3"], prepped["sh3"])

    return out.reshape(n, h, w, cout)


# --------------------------- Pure-JAX reference -----------------------------

def bottleneck_reference(x_nhwc, params, eps=1e-5):
    """Independent reference: lax.conv + unfolded BatchNorm (bf16 matmuls with
    f32 accumulation, f32 BN/residual epilogue, bf16 output)."""
    x = x_nhwc.astype(jnp.bfloat16)

    def conv(inp, w_oihw):
        k = w_oihw.shape[2]
        pad = (k - 1) // 2
        wt = jnp.transpose(w_oihw, (2, 3, 1, 0)).astype(jnp.bfloat16)  # HWIO
        return jax.lax.conv_general_dilated(
            inp.astype(jnp.bfloat16), wt, (1, 1), [(pad, pad), (pad, pad)],
            dimension_numbers=("NHWC", "HWIO", "NHWC"),
            preferred_element_type=jnp.float32)

    def bn(y, g, b, m, v):
        return (y - m) * (g / jnp.sqrt(v + eps)) + b

    out = jax.nn.relu(bn(conv(x, params["w1"]),
                         params["g1"], params["b1"], params["m1"], params["v1"]))
    out = jax.nn.relu(bn(conv(out, params["w2"]),
                         params["g2"], params["b2"], params["m2"], params["v2"]))
    out = bn(conv(out, params["w3"]),
             params["g3"], params["b3"], params["m3"], params["v3"])
    out = out + x.astype(jnp.float32)
    return jax.nn.relu(out).astype(jnp.bfloat16)


# --------------------------------- Main -------------------------------------

if __name__ == "__main__":
    key = jax.random.PRNGKey(0)
    B, inplanes, H, W = 2, 16, 16, 16
    planes = 4                      # expansion 4 -> output channels = 16 = inplanes
    N_sp, M_sp = 2, 4               # N:M sparsity pattern of SparseConv

    ks = jax.random.split(key, 16)
    params = {
        # SparseConv weights (PyTorch OIHW layout), 2:4 pruned once (static at
        # inference; dense zeros -> no MXU savings expected on TPU).
        "w1": nm_prune(0.2 * jax.random.normal(ks[0], (planes, inplanes, 1, 1),
                                               jnp.float32), N_sp, M_sp),
        "w2": nm_prune(0.2 * jax.random.normal(ks[1], (planes, planes, 3, 3),
                                               jnp.float32), N_sp, M_sp),
        "w3": nm_prune(0.2 * jax.random.normal(ks[2], (planes * 4, planes, 1, 1),
                                               jnp.float32), N_sp, M_sp),
        # BatchNorm (inference) params: gamma, beta, running_mean, running_var.
        "g1": 1.0 + 0.1 * jax.random.normal(ks[3], (planes,), jnp.float32),
        "b1": 0.1 * jax.random.normal(ks[4], (planes,), jnp.float32),
        "m1": 0.1 * jax.random.normal(ks[5], (planes,), jnp.float32),
        "v1": 1.0 + 0.1 * jax.random.uniform(ks[6], (planes,), jnp.float32),
        "g2": 1.0 + 0.1 * jax.random.normal(ks[7], (planes,), jnp.float32),
        "b2": 0.1 * jax.random.normal(ks[8], (planes,), jnp.float32),
        "m2": 0.1 * jax.random.normal(ks[9], (planes,), jnp.float32),
        "v2": 1.0 + 0.1 * jax.random.uniform(ks[10], (planes,), jnp.float32),
        "g3": 1.0 + 0.1 * jax.random.normal(ks[11], (planes * 4,), jnp.float32),
        "b3": 0.1 * jax.random.normal(ks[12], (planes * 4,), jnp.float32),
        "m3": 0.1 * jax.random.normal(ks[13], (planes * 4,), jnp.float32),
        "v3": 1.0 + 0.1 * jax.random.uniform(ks[14], (planes * 4,), jnp.float32),
    }

    # Module-consistent NCHW input; layout conversion happens ONCE at the API
    # boundary (a real pipeline would stay NHWC end to end).
    x_nchw = jax.random.normal(ks[15], (B, inplanes, H, W), jnp.float32)
    x_nhwc = jnp.transpose(x_nchw, (0, 2, 3, 1))

    prepped = prepare_params(params)                 # one-time weight prep
    fwd = jax.jit(bottleneck_forward)

    out = jax.block_until_ready(fwd(x_nhwc, prepped))
    ref = jax.block_until_ready(jax.jit(bottleneck_reference)(x_nhwc, params))

    assert out.shape == (B, H, W, planes * 4), out.shape
    out_f = out.astype(jnp.float32)
    ref_f = ref.astype(jnp.float32)
    max_err = float(jnp.max(jnp.abs(out_f - ref_f)))
    assert jnp.allclose(out_f, ref_f, atol=4e-2, rtol=4e-2), max_err

    print("KERNEL_OK")
</pallas_src>

<mosaic_0001>
module attributes {stable_mosaic.version = 11 : i64} {
  func.func @_bottleneck_kernel(%arg0: i32, %arg1: memref<1x256x16xbf16, #tpu.memory_space<vmem>>, %arg2: memref<16x4xbf16, #tpu.memory_space<vmem>>, %arg3: memref<1x4xf32, #tpu.memory_space<vmem>>, %arg4: memref<36x4xbf16, #tpu.memory_space<vmem>>, %arg5: memref<1x4xf32, #tpu.memory_space<vmem>>, %arg6: memref<4x16xbf16, #tpu.memory_space<vmem>>, %arg7: memref<1x16xf32, #tpu.memory_space<vmem>>, %arg8: memref<1x256x16xbf16, #tpu.memory_space<vmem>>, %arg9: memref<18x18x4xbf16, #tpu.memory_space<vmem>>) attributes {dimension_semantics = [#tpu.dimension_semantics<parallel>], iteration_bounds = array<i64: 2>, scalar_prefetch = 0 : i64, scratch_operands = 1 : i64, tpu.core_type = #tpu.core_type<tc>, window_params = [{transform_indices = @transform_0, window_bounds = array<i64: 1, 256, 16>}, {pipeline_mode = #tpu.pipeline_mode<synchronous>, transform_indices = @transform_1, window_bounds = array<i64: 16, 4>}, {pipeline_mode = #tpu.pipeline_mode<synchronous>, transform_indices = @transform_2, window_bounds = array<i64: 1, 4>}, {pipeline_mode = #tpu.pipeline_mode<synchronous>, transform_indices = @transform_3, window_bounds = array<i64: 36, 4>}, {pipeline_mode = #tpu.pipeline_mode<synchronous>, transform_indices = @transform_4, window_bounds = array<i64: 1, 4>}, {pipeline_mode = #tpu.pipeline_mode<synchronous>, transform_indices = @transform_5, window_bounds = array<i64: 4, 16>}, {pipeline_mode = #tpu.pipeline_mode<synchronous>, transform_indices = @transform_6, window_bounds = array<i64: 1, 16>}, {transform_indices = @transform_7, window_bounds = array<i64: 1, 256, 16>}]} {
    %c0 = arith.constant 0 : index
    %c0_0 = arith.constant 0 : index
    %c0_1 = arith.constant 0 : index
    %0 = vector.load %arg1[%c0, %c0_0, %c0_1] : memref<1x256x16xbf16, #tpu.memory_space<vmem>>, vector<1x256x16xbf16>
    %1 = vector.shape_cast %0 : vector<1x256x16xbf16> to vector<256x16xbf16>
    %c0_2 = arith.constant 0 : index
    %c0_3 = arith.constant 0 : index
    %2 = vector.load %arg2[%c0_2, %c0_3] : memref<16x4xbf16, #tpu.memory_space<vmem>>, vector<16x4xbf16>
    %cst = arith.constant dense<0.000000e+00> : vector<256x4xf32>
    %3 = tpu.matmul %1, %2, %cst {dimension_numbers = #tpu.dot_dimension_numbers<[1], [0], [0], [1], [0, 0, 1, 1], [], []>} : vector<256x16xbf16>, vector<16x4xbf16>, vector<256x4xf32> -> vector<256x4xf32>
    %c0_4 = arith.constant 0 : index
    %c0_5 = arith.constant 0 : index
    %4 = vector.load %arg3[%c0_4, %c0_5] : memref<1x4xf32, #tpu.memory_space<vmem>>, vector<1x4xf32>
    %5 = vector.broadcast %4 : vector<1x4xf32> to vector<256x4xf32>
    %6 = arith.addf %3, %5 : vector<256x4xf32>
    %cst_6 = arith.constant 0.000000e+00 : f32
    %7 = vector.broadcast %cst_6 : f32 to vector<256x4xf32>
    %8 = arith.maximumf %6, %7 : vector<256x4xf32>
    %cst_7 = arith.constant 0.000000e+00 : bf16
    %9 = vector.broadcast %cst_7 : bf16 to vector<1x18x4xbf16>
    %cst_8 = arith.constant 0.000000e+00 : bf16
    %10 = vector.broadcast %cst_8 : bf16 to vector<18x1x4xbf16>
    %c0_9 = arith.constant 0 : index
    %c0_10 = arith.constant 0 : index
    %c0_11 = arith.constant 0 : index
    %11 = vector.load %arg9[%c0_9, %c0_10, %c0_11] : memref<18x18x4xbf16, #tpu.memory_space<vmem>>, vector<1x18x4xbf16>
    tpu.vector_store %arg9[%c0_9, %c0_10, %c0_11], %9 {strides = array<i32>} : memref<18x18x4xbf16, #tpu.memory_space<vmem>>, vector<1x18x4xbf16>,
    %c17 = arith.constant 17 : index
    %c0_12 = arith.constant 0 : index
    %c0_13 = arith.constant 0 : index
    %12 = vector.load %arg9[%c17, %c0_12, %c0_13] : memref<18x18x4xbf16, #tpu.memory_space<vmem>>, vector<1x18x4xbf16>
    tpu.vector_store %arg9[%c17, %c0_12, %c0_13], %9 {strides = array<i32>} : memref<18x18x4xbf16, #tpu.memory_space<vmem>>, vector<1x18x4xbf16>,
    %c0_14 = arith.constant 0 : index
    %c0_15 = arith.constant 0 : index
    %c0_16 = arith.constant 0 : index
    %13 = vector.load %arg9[%c0_14, %c0_15, %c0_16] : memref<18x18x4xbf16, #tpu.memory_space<vmem>>, vector<18x1x4xbf16>
    tpu.vector_store %arg9[%c0_14, %c0_15, %c0_16], %10 {strides = array<i32>} : memref<18x18x4xbf16, #tpu.memory_space<vmem>>, vector<18x1x4xbf16>,
    %c0_17 = arith.constant 0 : index
    %c17_18 = arith.constant 17 : index
    %c0_19 = arith.constant 0 : index
    %14 = vector.load %arg9[%c0_17, %c17_18, %c0_19] : memref<18x18x4xbf16, #tpu.memory_space<vmem>>, vector<18x1x4xbf16>
    tpu.vector_store %arg9[%c0_17, %c17_18, %c0_19], %10 {strides = array<i32>} : memref<18x18x4xbf16, #tpu.memory_space<vmem>>, vector<18x1x4xbf16>,
    %15 = arith.truncf %8 : vector<256x4xf32> to vector<256x4xbf16>
    %16 = vector.shape_cast %15 : vector<256x4xbf16> to vector<16x16x4xbf16>
    %c1 = arith.constant 1 : index
    %c1_20 = arith.constant 1 : index
    %c0_21 = arith.constant 0 : index
    %17 = vector.load %arg9[%c1, %c1_20, %c0_21] : memref<18x18x4xbf16, #tpu.memory_space<vmem>>, vector<16x16x4xbf16>
    tpu.vector_store %arg9[%c1, %c1_20, %c0_21], %16 {strides = array<i32>} : memref<18x18x4xbf16, #tpu.memory_space<vmem>>, vector<16x16x4xbf16>,
    %cst_22 = arith.constant 0.000000e+00 : f32
    %18 = vector.broadcast %cst_22 : f32 to vector<256x4xf32>
    %c0_23 = arith.constant 0 : index
    %c0_24 = arith.constant 0 : index
    %c0_25 = arith.constant 0 : index
    %19 = vector.load %arg9[%c0_23, %c0_24, %c0_25] : memref<18x18x4xbf16, #tpu.memory_space<vmem>>, vector<16x16x4xbf16>
    %20 = vector.shape_cast %19 : vector<16x16x4xbf16> to vector<256x4xbf16>
    %c0_26 = arith.constant 0 : index
    %c0_27 = arith.constant 0 : index
    %21 = vector.load %arg4[%c0_26, %c0_27] : memref<36x4xbf16, #tpu.memory_space<vmem>>, vector<4x4xbf16>
    %cst_28 = arith.constant dense<0.000000e+00> : vector<256x4xf32>
    %22 = tpu.matmul %20, %21, %cst_28 {dimension_numbers = #tpu.dot_dimension_numbers<[1], [0], [0], [1], [0, 0, 1, 1], [], []>} : vector<256x4xbf16>, vector<4x4xbf16>, vector<256x4xf32> -> vector<256x4xf32>
    %23 = arith.addf %18, %22 : vector<256x4xf32>
    %c0_29 = arith.constant 0 : index
    %c1_30 = arith.constant 1 : index
    %c0_31 = arith.constant 0 : index
    %24 = vector.load %arg9[%c0_29, %c1_30, %c0_31] : memref<18x18x4xbf16, #tpu.memory_space<vmem>>, vector<16x16x4xbf16>
    %25 = vector.shape_cast %24 : vector<16x16x4xbf16> to vector<256x4xbf16>
    %c4 = arith.constant 4 : index
    %c0_32 = arith.constant 0 : index
    %26 = vector.load %arg4[%c4, %c0_32] : memref<36x4xbf16, #tpu.memory_space<vmem>>, vector<4x4xbf16>
    %cst_33 = arith.constant dense<0.000000e+00> : vector<256x4xf32>
    %27 = tpu.matmul %25, %26, %cst_33 {dimension_numbers = #tpu.dot_dimension_numbers<[1], [0], [0], [1], [0, 0, 1, 1], [], []>} : vector<256x4xbf16>, vector<4x4xbf16>, vector<256x4xf32> -> vector<256x4xf32>
    %28 = arith.addf %23, %27 : vector<256x4xf32>
    %c0_34 = arith.constant 0 : index
    %c2 = arith.constant 2 : index
    %c0_35 = arith.constant 0 : index
    %29 = vector.load %arg9[%c0_34, %c2, %c0_35] : memref<18x18x4xbf16, #tpu.memory_space<vmem>>, vector<16x16x4xbf16>
    %30 = vector.shape_cast %29 : vector<16x16x4xbf16> to vector<256x4xbf16>
    %c8 = arith.constant 8 : index
    %c0_36 = arith.constant 0 : index
    %31 = vector.load %arg4[%c8, %c0_36] : memref<36x4xbf16, #tpu.memory_space<vmem>>, vector<4x4xbf16>
    %cst_37 = arith.constant dense<0.000000e+00> : vector<256x4xf32>
    %32 = tpu.matmul %30, %31, %cst_37 {dimension_numbers = #tpu.dot_dimension_numbers<[1], [0], [0], [1], [0, 0, 1, 1], [], []>} : vector<256x4xbf16>, vector<4x4xbf16>, vector<256x4xf32> -> vector<256x4xf32>
    %33 = arith.addf %28, %32 : vector<256x4xf32>
    %c1_38 = arith.constant 1 : index
    %c0_39 = arith.constant 0 : index
    %c0_40 = arith.constant 0 : index
    %34 = vector.load %arg9[%c1_38, %c0_39, %c0_40] : memref<18x18x4xbf16, #tpu.memory_space<vmem>>, vector<16x16x4xbf16>
    %35 = vector.shape_cast %34 : vector<16x16x4xbf16> to vector<256x4xbf16>
    %c12 = arith.constant 12 : index
    %c0_41 = arith.constant 0 : index
    %36 = vector.load %arg4[%c12, %c0_41] : memref<36x4xbf16, #tpu.memory_space<vmem>>, vector<4x4xbf16>
    %cst_42 = arith.constant dense<0.000000e+00> : vector<256x4xf32>
    %37 = tpu.matmul %35, %36, %cst_42 {dimension_numbers = #tpu.dot_dimension_numbers<[1], [0], [0], [1], [0, 0, 1, 1], [], []>} : vector<256x4xbf16>, vector<4x4xbf16>, vector<256x4xf32> -> vector<256x4xf32>
    %38 = arith.addf %33, %37 : vector<256x4xf32>
    %c1_43 = arith.constant 1 : index
    %c1_44 = arith.constant 1 : index
    %c0_45 = arith.constant 0 : index
    %39 = vector.load %arg9[%c1_43, %c1_44, %c0_45] : memref<18x18x4xbf16, #tpu.memory_space<vmem>>, vector<16x16x4xbf16>
    %40 = vector.shape_cast %39 : vector<16x16x4xbf16> to vector<256x4xbf16>
    %c16 = arith.constant 16 : index
    %c0_46 = arith.constant 0 : index
    %41 = vector.load %arg4[%c16, %c0_46] : memref<36x4xbf16, #tpu.memory_space<vmem>>, vector<4x4xbf16>
    %cst_47 = arith.constant dense<0.000000e+00> : vector<256x4xf32>
    %42 = tpu.matmul %40, %41, %cst_47 {dimension_numbers = #tpu.dot_dimension_numbers<[1], [0], [0], [1], [0, 0, 1, 1], [], []>} : vector<256x4xbf16>, vector<4x4xbf16>, vector<256x4xf32> -> vector<256x4xf32>
    %43 = arith.addf %38, %42 : vector<256x4xf32>
    %c1_48 = arith.constant 1 : index
    %c2_49 = arith.constant 2 : index
    %c0_50 = arith.constant 0 : index
    %44 = vector.load %arg9[%c1_48, %c2_49, %c0_50] : memref<18x18x4xbf16, #tpu.memory_space<vmem>>, vector<16x16x4xbf16>
    %45 = vector.shape_cast %44 : vector<16x16x4xbf16> to vector<256x4xbf16>
    %c20 = arith.constant 20 : index
    %c0_51 = arith.constant 0 : index
    %46 = vector.load %arg4[%c20, %c0_51] : memref<36x4xbf16, #tpu.memory_space<vmem>>, vector<4x4xbf16>
    %cst_52 = arith.constant dense<0.000000e+00> : vector<256x4xf32>
    %47 = tpu.matmul %45, %46, %cst_52 {dimension_numbers = #tpu.dot_dimension_numbers<[1], [0], [0], [1], [0, 0, 1, 1], [], []>} : vector<256x4xbf16>, vector<4x4xbf16>, vector<256x4xf32> -> vector<256x4xf32>
    %48 = arith.addf %43, %47 : vector<256x4xf32>
    %c2_53 = arith.constant 2 : index
    %c0_54 = arith.constant 0 : index
    %c0_55 = arith.constant 0 : index
    %49 = vector.load %arg9[%c2_53, %c0_54, %c0_55] : memref<18x18x4xbf16, #tpu.memory_space<vmem>>, vector<16x16x4xbf16>
    %50 = vector.shape_cast %49 : vector<16x16x4xbf16> to vector<256x4xbf16>
    %c24 = arith.constant 24 : index
    %c0_56 = arith.constant 0 : index
    %51 = vector.load %arg4[%c24, %c0_56] : memref<36x4xbf16, #tpu.memory_space<vmem>>, vector<4x4xbf16>
    %cst_57 = arith.constant dense<0.000000e+00> : vector<256x4xf32>
    %52 = tpu.matmul %50, %51, %cst_57 {dimension_numbers = #tpu.dot_dimension_numbers<[1], [0], [0], [1], [0, 0, 1, 1], [], []>} : vector<256x4xbf16>, vector<4x4xbf16>, vector<256x4xf32> -> vector<256x4xf32>
    %53 = arith.addf %48, %52 : vector<256x4xf32>
    %c2_58 = arith.constant 2 : index
    %c1_59 = arith.constant 1 : index
    %c0_60 = arith.constant 0 : index
    %54 = vector.load %arg9[%c2_58, %c1_59, %c0_60] : memref<18x18x4xbf16, #tpu.memory_space<vmem>>, vector<16x16x4xbf16>
    %55 = vector.shape_cast %54 : vector<16x16x4xbf16> to vector<256x4xbf16>
    %c28 = arith.constant 28 : index
    %c0_61 = arith.constant 0 : index
    %56 = vector.load %arg4[%c28, %c0_61] : memref<36x4xbf16, #tpu.memory_space<vmem>>, vector<4x4xbf16>
    %cst_62 = arith.constant dense<0.000000e+00> : vector<256x4xf32>
    %57 = tpu.matmul %55, %56, %cst_62 {dimension_numbers = #tpu.dot_dimension_numbers<[1], [0], [0], [1], [0, 0, 1, 1], [], []>} : vector<256x4xbf16>, vector<4x4xbf16>, vector<256x4xf32> -> vector<256x4xf32>
    %58 = arith.addf %53, %57 : vector<256x4xf32>
    %c2_63 = arith.constant 2 : index
    %c2_64 = arith.constant 2 : index
    %c0_65 = arith.constant 0 : index
    %59 = vector.load %arg9[%c2_63, %c2_64, %c0_65] : memref<18x18x4xbf16, #tpu.memory_space<vmem>>, vector<16x16x4xbf16>
    %60 = vector.shape_cast %59 : vector<16x16x4xbf16> to vector<256x4xbf16>
    %c32 = arith.constant 32 : index
    %c0_66 = arith.constant 0 : index
    %61 = vector.load %arg4[%c32, %c0_66] : memref<36x4xbf16, #tpu.memory_space<vmem>>, vector<4x4xbf16>
    %cst_67 = arith.constant dense<0.000000e+00> : vector<256x4xf32>
    %62 = tpu.matmul %60, %61, %cst_67 {dimension_numbers = #tpu.dot_dimension_numbers<[1], [0], [0], [1], [0, 0, 1, 1], [], []>} : vector<256x4xbf16>, vector<4x4xbf16>, vector<256x4xf32> -> vector<256x4xf32>
    %63 = arith.addf %58, %62 : vector<256x4xf32>
    %c0_68 = arith.constant 0 : index
    %c0_69 = arith.constant 0 : index
    %64 = vector.load %arg5[%c0_68, %c0_69] : memref<1x4xf32, #tpu.memory_space<vmem>>, vector<1x4xf32>
    %65 = vector.broadcast %64 : vector<1x4xf32> to vector<256x4xf32>
    %66 = arith.addf %63, %65 : vector<256x4xf32>
    %cst_70 = arith.constant 0.000000e+00 : f32
    %67 = vector.broadcast %cst_70 : f32 to vector<256x4xf32>
    %68 = arith.maximumf %66, %67 : vector<256x4xf32>
    %69 = arith.truncf %68 : vector<256x4xf32> to vector<256x4xbf16>
    %c0_71 = arith.constant 0 : index
    %c0_72 = arith.constant 0 : index
    %70 = vector.load %arg6[%c0_71, %c0_72] : memref<4x16xbf16, #tpu.memory_space<vmem>>, vector<4x16xbf16>
    %cst_73 = arith.constant dense<0.000000e+00> : vector<256x16xf32>
    %71 = tpu.matmul %69, %70, %cst_73 {dimension_numbers = #tpu.dot_dimension_numbers<[1], [0], [0], [1], [0, 0, 1, 1], [], []>} : vector<256x4xbf16>, vector<4x16xbf16>, vector<256x16xf32> -> vector<256x16xf32>
    %c0_74 = arith.constant 0 : index
    %c0_75 = arith.constant 0 : index
    %72 = vector.load %arg7[%c0_74, %c0_75] : memref<1x16xf32, #tpu.memory_space<vmem>>, vector<1x16xf32>
    %73 = vector.broadcast %72 : vector<1x16xf32> to vector<256x16xf32>
    %74 = arith.addf %71, %73 : vector<256x16xf32>
    %75 = arith.extf %1 : vector<256x16xbf16> to vector<256x16xf32>
    %76 = arith.addf %74, %75 : vector<256x16xf32>
    %cst_76 = arith.constant 0.000000e+00 : f32
    %77 = vector.broadcast %cst_76 : f32 to vector<256x16xf32>
    %78 = arith.maximumf %76, %77 : vector<256x16xf32>
    %79 = arith.truncf %78 : vector<256x16xf32> to vector<256x16xbf16>
    %c0_77 = arith.constant 0 : index
    %c0_78 = arith.constant 0 : index
    %c0_79 = arith.constant 0 : index
    %80 = vector.load %arg8[%c0_77, %c0_78, %c0_79] : memref<1x256x16xbf16, #tpu.memory_space<vmem>>, vector<1x256x16xbf16>
    %81 = vector.shape_cast %80 : vector<1x256x16xbf16> to vector<256x16xbf16>
    %82 = vector.shape_cast %79 : vector<256x16xbf16> to vector<1x256x16xbf16>
    tpu.vector_store %arg8[%c0_77, %c0_78, %c0_79], %82 {strides = array<i32>} : memref<1x256x16xbf16, #tpu.memory_space<vmem>>, vector<1x256x16xbf16>,
    return
  }
  func.func @transform_0(%arg0: i32) -> (i32, i32, i32) {
    %c0_i32 = arith.constant 0 : i32
    %c0_i32_0 = arith.constant 0 : i32
    %c0_i32_1 = arith.constant 0 : i32
    return %arg0, %c0_i32, %c0_i32_0 : i32, i32, i32
  }
  func.func @transform_1(%arg0: i32) -> (i32, i32) {
    %c0_i32 = arith.constant 0 : i32
    %c0_i32_0 = arith.constant 0 : i32
    %c0_i32_1 = arith.constant 0 : i32
    return %c0_i32, %c0_i32_0 : i32, i32
  }
  func.func @transform_2(%arg0: i32) -> (i32, i32) {
    %c0_i32 = arith.constant 0 : i32
    %c0_i32_0 = arith.constant 0 : i32
    %c0_i32_1 = arith.constant 0 : i32
    return %c0_i32, %c0_i32_0 : i32, i32
  }
  func.func @transform_3(%arg0: i32) -> (i32, i32) {
    %c0_i32 = arith.constant 0 : i32
    %c0_i32_0 = arith.constant 0 : i32
    %c0_i32_1 = arith.constant 0 : i32
    return %c0_i32, %c0_i32_0 : i32, i32
  }
  func.func @transform_4(%arg0: i32) -> (i32, i32) {
    %c0_i32 = arith.constant 0 : i32
    %c0_i32_0 = arith.constant 0 : i32
    %c0_i32_1 = arith.constant 0 : i32
    return %c0_i32, %c0_i32_0 : i32, i32
  }
  func.func @transform_5(%arg0: i32) -> (i32, i32) {
    %c0_i32 = arith.constant 0 : i32
    %c0_i32_0 = arith.constant 0 : i32
    %c0_i32_1 = arith.constant 0 : i32
    return %c0_i32, %c0_i32_0 : i32, i32
  }
  func.func @transform_6(%arg0: i32) -> (i32, i32) {
    %c0_i32 = arith.constant 0 : i32
    %c0_i32_0 = arith.constant 0 : i32
    %c0_i32_1 = arith.constant 0 : i32
    return %c0_i32, %c0_i32_0 : i32, i32
  }
  func.func @transform_7(%arg0: i32) -> (i32, i32, i32) {
    %c0_i32 = arith.constant 0 : i32
    %c0_i32_0 = arith.constant 0 : i32
    %c0_i32_1 = arith.constant 0 : i32
    return %arg0, %c0_i32, %c0_i32_0 : i32, i32, i32
  }
}

</mosaic_0001>

<bundles_post_ra>
// kernel: bottleneck_forward.1
= control target key start
LH: loop header
LB: loop body
LE: loop exit
PB: predicated region body
PF: predicated region fallthrough
CT: control target
= control target key end

     0   :  { %12 = vsyncpa [#allocation4], 0  ;;  %s10169_s0 = inlined_call_operand.vmem [shape: bf16[2,256,16], index: 0, kind: input, shape index: {}]   ;;  %s10170_s1 = inlined_call_operand.vmem [shape: bf16[16,4], index: 1, kind: input, shape index: {}]   ;;  %s10171_s2 = inlined_call_operand.vmem [shape: f32[1,4], index: 2, kind: input, shape index: {}]   ;;  %s10172_s3 = inlined_call_operand.vmem [shape: bf16[36,4], index: 3, kind: input, shape index: {}]   ;;  %s10173_s4 = inlined_call_operand.vmem [shape: f32[1,4], index: 4, kind: input, shape index: {}]   ;;  %s10174_s5 = inlined_call_operand.vmem [shape: bf16[4,16], index: 5, kind: input, shape index: {}]   ;;  %s10175_s6 = inlined_call_operand.vmem [shape: f32[1,16], index: 6, kind: input, shape index: {}]   ;;  %s10176_s7 = inlined_call_operand.hbm [shape: bf16[2,256,16], index: 7, kind: output, shape index: {}]  }
   0x1   :  { %14 = vsyncpa [#allocation4 + $0x1], 0  ;;  %s8156_s24 = smov 0   ;;  %s8158_s25 = smov 0  }
   0x2   :  { %s8160_s26 = smov 0   ;;  %s8162_s27 = smov 0  }
   0x3 LB: > { %s8177_s28 = sadd.s32 4294967295, %s8110_s27   ;;  %s6508_s29 = sadd.s32 4294967294, %s8110_s27   ;;  %s8110_s27 = sphi %s8162_s27, %s10293_s27   ;;  %s8106_s26 = sphi %s8160_s26, %s10292_s26   ;;  %s8102_s25 = sphi %s8158_s25, %s10291_s25   ;;  %s8098_s24 = sphi %s8156_s24, %s10290_s24  }
   0x4   : > { %s8181_s30 = sadd.s32 1, %s8110_s27   ;;  %s179_s8 = sadd.s32 1, %s8106_s26 }
   0x5   : > { %s176_s9 = ssub.s32 %s8110_s27, %s8181_s30  ;;  %p189_p0 = scmp.ne.s32.totalorder %s8106_s26, %s8102_s25 }
   0x6   : > { %p177_p1 = scmp.eq.s32.totalorder %s176_s9, 0  ;;  %p190_p2 = scmp.eq.s32.totalorder %s8177_s28, 1 }
   0x7   : > { %p195_p3 = scmp.ne.s32.totalorder %s8102_s25, %s8098_s24  ;;  %p196_p4 = scmp.eq.s32.totalorder %s6508_s29, 1 }
   0x8   : > { %s8192_s10 = scalar_select %p177_p1, %s8106_s26, %s179_s8  }
   0x9   : > { %p8194_p5 = por %p190_p2, %p189_p0  ;;  %p8198_p6 = por %p196_p4, %p195_p3 }
   0xa   : > { %p6511_p7 = scmp.ge.s32.totalorder %s8110_s27, 1  ;;  %p240_p8 = scmp.lt.s32.totalorder %s8110_s27, 3 }
   0xc   : > { %p241_p9 = pnand %p6511_p7, %p240_p8 }
   0xe   : > { %244 = sbr.rel (%p241_p9) target bundleno = 1183 (0x49f), region = 48 }
  0x15   : > { %v7914_v0 = vld [vmem:[%s10170_s1] sm:$0xff]   ;;  %p272_p10 = scmp.lt.s32.totalorder %s8177_s28, 1  ;;  %vm405_vm0 = vcmask 130048   ;;  %vm650_vm1 = vcmask 24576   ;;  %vm657_vm2 = vsmask.f32 256 }
  0x16   : > { %7229 = vmatprep.subr.bf16.mxu0 %v7914_v0  ;;  %vm8248_vm3 = vmand %vm650_vm1, %vm657_vm2  ;;  %v10204_v17 = vmov 0  ;;  %v665_v18 = vld [vmem:[#allocation2 + $0x18] sm:$0x1]  ;;  %vm713_vm4 = vsmask.f32 7938  ;;  %v10207_v22 = vmov 0 }
  0x17   : > { %s273_s15 = scalar_select %p272_p10, %s8177_s28, 1  ;;  %7230 = vmatpush3.bf16.msra.mxu0 %v7914_v0  ;;  %v10205_v17 = vsel %vm8248_vm3, 4294967295, %v10204_v17  ;;  %v666_v19 = vsel %vm8248_vm3, 0, %v665_v18  ;;  %v662_v20 = vld [vmem:[#allocation2 + $0xc] sm:$0x1]  ;;  %vm8258_vm5 = vmand %vm650_vm1, %vm713_vm4  ;;  %vm647_vm6 = vcmask 27648  }
  0x18   : > { %10206 = vst [vmem:[#allocation6_spill] sm:$0xff] %v10205_v17  ;;  %667 = vst [vmem:[#allocation2 + $0x18] sm:$0x1] %v666_v19  ;;  %v663_v21 = vsel %vm8248_vm3, 0, %v662_v20  ;;  %v10208_v22 = vsel %vm8258_vm5, 4294967295, %v10207_v22  ;;  %v8112_v31 = vmov 0  }
  0x19   : > { %s6976_s16 = sshll.u32 %s273_s15, 7  ;;  %10209 = vst [vmem:[#allocation7_spill] sm:$0xff] %v10208_v22  ;;  %v721_v23 = vld [vmem:[#allocation2 + $0x20] sm:$0x1]  ;;  %664 = vst [vmem:[#allocation2 + $0xc] sm:$0x1] %v663_v21 }
  0x1a   : > { %s8212_s19 = scalar_lea.vmem %s10169_s0, %s6976_s16  ;;  %v722_v24 = vsel %vm8258_vm5, 0, %v721_v23  ;;  %v718_v25 = vld [vmem:[#allocation2 + $0x14] sm:$0x1]  ;;  %v671_v27 = vld [vmem:[#allocation2 + $0x30] sm:$0x1]  ;;  %vm1840_vm7 = vcmask 1041408   ;;  %vm8377_vm13 = vmand %vm647_vm6, %vm713_vm4 }
  0x1b   : > { %v278_v1 = vld [vmem:[%s8212_s19] sm:$0xff]   ;;  %v280_v2 = vld [vmem:[%s8212_s19 + $0x8] sm:$0xff]   ;;  %v282_v3 = vld [vmem:[%s8212_s19 + $0x10] sm:$0xff]   ;;  %723 = vst [vmem:[#allocation2 + $0x20] sm:$0x1] %v722_v24  ;;  %v719_v26 = vsel %vm8258_vm5, 0, %v718_v25 }
  0x1c   : > { %7231 = vmatprep.mubr.msk.bf16.mxu0 %vm405_vm0, %v278_v1  ;;  %v284_v4 = vld [vmem:[%s8212_s19 + $0x18] sm:$0xff]   ;;  %v286_v5 = vld [vmem:[%s8212_s19 + $0x20] sm:$0xff]   ;;  %v288_v6 = vld [vmem:[%s8212_s19 + $0x28] sm:$0xff]   ;;  %720 = vst [vmem:[#allocation2 + $0x14] sm:$0x1] %v719_v26  ;;  %v672_v28 = vsel %vm8248_vm3, 0, %v671_v27 }
  0x1d   : > { %7232 = vmatmul.mubr.msk.bf16.vlgmr.msra.gmra.mrb[0].mxu0 %vm405_vm0, %v280_v2  ;;  %v290_v7 = vld [vmem:[%s8212_s19 + $0x30] sm:$0xff]   ;;  %v292_v8 = vld [vmem:[%s8212_s19 + $0x38] sm:$0xff]   ;;  %v294_v9 = vld [vmem:[%s8212_s19 + $0x40] sm:$0xff]   ;;  %673 = vst [vmem:[#allocation2 + $0x30] sm:$0x1] %v672_v28  ;;  %vm1791_vm11 = vcmask 31744  }
  0x1e   : > { %7235 = vmatprep.mubr.msk.bf16.mxu0 %vm405_vm0, %v282_v3  ;;  %v296_v10 = vld [vmem:[%s8212_s19 + $0x48] sm:$0xff]   ;;  %v298_v11 = vld [vmem:[%s8212_s19 + $0x50] sm:$0xff]   ;;  %v300_v12 = vld [vmem:[%s8212_s19 + $0x58] sm:$0xff]   ;;  %648 = vst.msk [vmem:[#allocation2] sm:$0xf] %vm647_vm6, %v8112_v31  ;;  %vm2345_vm15 = vcmask 1042432  }
  0x1f   : > { %v302_v13 = vld [vmem:[%s8212_s19 + $0x60] sm:$0xff]   ;;  %v304_v14 = vld [vmem:[%s8212_s19 + $0x68] sm:$0xff]   ;;  %v306_v15 = vld [vmem:[%s8212_s19 + $0x70] sm:$0xff]   ;;  %649 = vst.msk [vmem:[#allocation2 + $0x4] sm:$0xf] %vm647_vm6, %v8112_v31  ;;  %s269_s29 = sand.u32 1, %s8102_s25  }
  0x20   : > { %v308_v16 = vld [vmem:[%s8212_s19 + $0x78] sm:$0xff]   ;;  %v668_v29 = vld [vmem:[#allocation2 + $0x24] sm:$0x1]  ;;  %651 = vst.msk [vmem:[#allocation2 + $0x8] sm:$0x1] %vm650_vm1, %v8112_v31  ;;  %s6512_s8 = sshll.u32 %s269_s29, 7 }
  0x21   : > { %v669_v30 = vsel %vm8248_vm3, 0, %v668_v29  ;;  %653 = vst.msk [vmem:[#allocation2 + $0xcc] sm:$0xf] %vm647_vm6, %v8112_v31  ;;  %654 = vst.msk [vmem:[#allocation2 + $0xd0] sm:$0xf] %vm647_vm6, %v8112_v31  ;;  %s10011_s9 = scalar_lea.vmem [#allocation3], %s6512_s8 }
  0x22   : > { %670 = vst [vmem:[#allocation2 + $0x24] sm:$0x1] %v669_v30  ;;  %655 = vst.msk [vmem:[#allocation2 + $0xd4] sm:$0x1] %vm650_vm1, %v8112_v31  ;;  %v727_v32 = vld [vmem:[#allocation2 + $0x38] sm:$0x1] }
  0x23   : > { %v728_v33 = vsel %vm8258_vm5, 0, %v727_v32  ;;  %v724_v34 = vld [vmem:[#allocation2 + $0x2c] sm:$0x1]  ;;  %v677_v36 = vld [vmem:[#allocation2 + $0x48] sm:$0x1]  ;;  %s6446_s13 = sshll.u32 %s10011_s9, 4  ;;  %s10118_s13 = int_to_ptr.vmem [resolvable:$true] %s6446_s13 }
  0x24   : > { %729 = vst [vmem:[#allocation2 + $0x38] sm:$0x1] %v728_v33  ;;  %v725_v35 = vsel %vm8258_vm5, 0, %v724_v34  ;;  %v678_v38 = vsel %vm8248_vm3, 0, %v677_v36  ;;  %v674_v39 = vld [vmem:[#allocation2 + $0x3c] sm:$0x1] }
  0x25   : > { %7236 = vmatmul.mubr.msk.bf16.gmra.mrb[4].mxu0 %vm405_vm0, %v284_v4  ;;  %726 = vst [vmem:[#allocation2 + $0x2c] sm:$0x1] %v725_v35  ;;  %v659_v37 = vld [vmem:[#allocation2] sm:$0x1]  ;;  %679 = vst [vmem:[#allocation2 + $0x48] sm:$0x1] %v678_v38 }
  0x26   : > { %7239 = vmatprep.mubr.msk.bf16.mxu0 %vm405_vm0, %v286_v5  ;;  %v660_v40 = vsel %vm8248_vm3, 0, %v659_v37  ;;  %v675_v41 = vsel %vm8248_vm3, 0, %v674_v39  ;;  %v733_v42 = vld [vmem:[#allocation2 + $0x50] sm:$0x1]  ;;  %v730_v44 = vld [vmem:[#allocation2 + $0x44] sm:$0x1] }
  0x27   : > { %661 = vst [vmem:[#allocation2] sm:$0x1] %v660_v40  ;;  %676 = vst [vmem:[#allocation2 + $0x3c] sm:$0x1] %v675_v41  ;;  %v734_v43 = vsel %vm8258_vm5, 0, %v733_v42  ;;  %v731_v46 = vsel %vm8258_vm5, 0, %v730_v44 }
  0x28   : > { %735 = vst [vmem:[#allocation2 + $0x50] sm:$0x1] %v734_v43  ;;  %v715_v45 = vld [vmem:[#allocation2 + $0x8] sm:$0x1]  ;;  %732 = vst [vmem:[#allocation2 + $0x44] sm:$0x1] %v731_v46 }
  0x29   : > { %v716_v47 = vsel %vm8258_vm5, 0, %v715_v45  ;;  %v683_v48 = vld [vmem:[#allocation2 + $0x60] sm:$0x1]  ;;  %v680_v51 = vld [vmem:[#allocation2 + $0x54] sm:$0x1]  ;;  %s8048_s17 = scalar_lea.vmem %s10118_s13, 2048 }
  0x2a   : > { %717 = vst [vmem:[#allocation2 + $0x8] sm:$0x1] %v716_v47  ;;  %v684_v50 = vsel %vm8248_vm3, 0, %v683_v48  ;;  %v681_v53 = vsel %vm8248_vm3, 0, %v680_v51  ;;  %v739_v54 = vld [vmem:[#allocation2 + $0x68] sm:$0x1]  ;;  %p8049_p11 = scmp.ne.s32.totalorder %s10118_s13, %s8048_s17 }
  0x2b   : > { %685 = vst [vmem:[#allocation2 + $0x60] sm:$0x1] %v684_v50  ;;  %v7931_v55 = vld [vmem:[%s10172_s3] ss:$0 sps:$4 sm:$0xcc]   ;;  %v740_v56 = vsel %vm8258_vm5, 0, %v739_v54 }
  0x2c   : > { %682 = vst [vmem:[#allocation2 + $0x54] sm:$0x1] %v681_v53  ;;  %v736_v57 = vld [vmem:[#allocation2 + $0x5c] sm:$0x1]  ;;  %741 = vst [vmem:[#allocation2 + $0x68] sm:$0x1] %v740_v56  ;;  %p8050_p12 = pnand %p8049_p11, %p8194_p5 }
  0x2d   : > { %7240 = vmatmul.mubr.msk.bf16.gmra.mrb[8].mxu0 %vm405_vm0, %v288_v6  ;;  %v737_v59 = vsel %vm8258_vm5, 0, %v736_v57  ;;  %v1790_v60 = vrot.slane %v7931_v55, 2  ;;  %v1303_v62 = vld [vmem:[#allocation2 + $0x4] sm:$0xf]  ;;  %v689_v5 = vld [vmem:[#allocation2 + $0x78] sm:$0x1] }
  0x2e   : > { %7243 = vmatprep.mubr.msk.bf16.mxu0 %vm405_vm0, %v290_v7  ;;  %v1302_v49 = vld [vmem:[#allocation2] sm:$0xf]  ;;  %738 = vst [vmem:[#allocation2 + $0x5c] sm:$0x1] %v737_v59  ;;  %v1364_v2 = vshll.u32 %v1303_v62, 16  ;;  %v1368_v3 = vshrl.u32 %v1303_v62, 16  ;;  %p8051_p13 = pneg %p8050_p12 }
  0x2f   : > { %v1355_v52 = vshrl.u32 %v1302_v49, 16  ;;  %v1358_v61 = vshll.u32 %v1302_v49, 16  ;;  %7861 = vmatprep.subr.msk.bf16.mxu0 %vm1840_vm7, %v1790_v60  ;;  %v1842_v0 = vsel %vm1840_vm7, %v1790_v60, 0  ;;  %vm1351_vm8 = vsmask.f32 3328  ;;  %s8113_s18 = smov [#allocation3]  }
  0x30   : > { %7264 = vmatpush3.bf16.msra.mxu0 %v1842_v0  ;;  %v1366_v7 = vrot.slane %v1364_v2, 5  ;;  %vm1352_vm9 = vsmask.f32 7440  ;;  %v742_v21 = vld [vmem:[#allocation2 + $0x74] sm:$0x1]  ;;  %s8052_s20 = sshll.u32 %s8113_s18, 4  ;;  %s8053_s20 = int_to_ptr.vmem [resolvable:$false] %s8052_s20 }
  0x31   : > { %v1357_v58 = vrot.slane %v1355_v52, 4  ;;  %v1335_v63 = vld [vmem:[#allocation2 + $0x8] sm:$0x1]  ;;  %v1360_v1 = vrot.slane %v1358_v61, 5  ;;  %vm8309_vm10 = vmor %vm1351_vm8, %vm1352_vm9  ;;  %v743_v24 = vsel %vm8258_vm5, 0, %v742_v21  ;;  %s8054_s21 = scalar_lea.vmem %s8053_s20, 4096  ;;  %p8055_p0 = scmp.lt.s32.totalorder %s10118_s13, %s8053_s20 }
  0x32   : > { %v1374_v4 = vshll.u32 %v1335_v63, 16  ;;  %744 = vst [vmem:[#allocation2 + $0x74] sm:$0x1] %v743_v24  ;;  %v695_v26 = vld [vmem:[#allocation2 + $0x90] sm:$0x1]  ;;  %p8056_p1 = scmp.lt.s32.totalorder %s8054_s21, %s8048_s17 }
  0x33   : > { %v1361_v6 = vor.u32 %v1360_v1, %v1357_v58  ;;  %v696_v27 = vsel %vm8248_vm3, 0, %v695_v26  ;;  %v692_v28 = vld [vmem:[#allocation2 + $0x84] sm:$0x1]  ;;  %v751_v29 = vld [vmem:[#allocation2 + $0x98] sm:$0x1] }
  0x34   : > { %697 = vst [vmem:[#allocation2 + $0x90] sm:$0x1] %v696_v27  ;;  %v693_v30 = vsel %vm8248_vm3, 0, %v692_v28  ;;  %v752_v31 = vsel %vm8258_vm5, 0, %v751_v29  ;;  %v748_v32 = vld [vmem:[#allocation2 + $0x8c] sm:$0x1]  ;;  %p8057_p2 = por %p8056_p1, %p8055_p0 }
  0x35   : > { %7244 = vmatmul.mubr.msk.bf16.gmra.mrb[12].mxu0 %vm405_vm0, %v292_v8  ;;  %v690_v8 = vsel %vm8248_vm3, 0, %v689_v5  ;;  %694 = vst [vmem:[#allocation2 + $0x84] sm:$0x1] %v693_v30  ;;  %753 = vst [vmem:[#allocation2 + $0x98] sm:$0x1] %v752_v31  ;;  %v749_v33 = vsel %vm8258_vm5, 0, %v748_v32 }
  0x36   : > { %7247 = vmatprep.mubr.msk.bf16.mxu0 %vm405_vm0, %v294_v9  ;;  %v686_v9 = vld [vmem:[#allocation2 + $0x6c] sm:$0x1]  ;;  %691 = vst [vmem:[#allocation2 + $0x78] sm:$0x1] %v690_v8  ;;  %750 = vst [vmem:[#allocation2 + $0x8c] sm:$0x1] %v749_v33  ;;  %p8058_p3 = pnand %p8057_p2, %p8051_p13 }
  0x37   : > { %v701_v34 = vld [vmem:[#allocation2 + $0xa8] sm:$0x1]  ;;  %v698_v36 = vld [vmem:[#allocation2 + $0x9c] sm:$0x1]  ;;  %v757_v37 = vld [vmem:[#allocation2 + $0xb0] sm:$0x1] }
  0x38   : > { %v702_v35 = vsel %vm8248_vm3, 0, %v701_v34  ;;  %v699_v38 = vsel %vm8248_vm3, 0, %v698_v36  ;;  %v758_v39 = vsel %vm8258_vm5, 0, %v757_v37  ;;  %v754_v40 = vld [vmem:[#allocation2 + $0xa4] sm:$0x1] }
  0x39   : > { %703 = vst [vmem:[#allocation2 + $0xa8] sm:$0x1] %v702_v35  ;;  %700 = vst [vmem:[#allocation2 + $0x9c] sm:$0x1] %v699_v38  ;;  %v755_v41 = vsel %vm8258_vm5, 0, %v754_v40 }
  0x3a   : > { %759 = vst [vmem:[#allocation2 + $0xb0] sm:$0x1] %v758_v39  ;;  %756 = vst [vmem:[#allocation2 + $0xa4] sm:$0x1] %v755_v41  ;;  %v707_v43 = vld [vmem:[#allocation2 + $0xc0] sm:$0x1] }
  0x3b   : > { %v7932_v42 = vld [vmem:[%s10172_s3 + $0x4] ss:$0 sps:$4 sm:$0xcc]   ;;  %v708_v44 = vsel %vm8248_vm3, 0, %v707_v43  ;;  %v704_v46 = vld [vmem:[#allocation2 + $0xb4] sm:$0x1] }
  0x3c   : > { %v8343_v45 = vrot.slane %v7932_v42, 2  ;;  %709 = vst [vmem:[#allocation2 + $0xc0] sm:$0x1] %v708_v44  ;;  %v705_v47 = vsel %vm8248_vm3, 0, %v704_v46  ;;  %v763_v48 = vld [vmem:[#allocation2 + $0xc8] sm:$0x1] }
  0x3d   : > { %7248 = vmatmul.mubr.msk.bf16.gmra.mrb[16].mxu0 %vm405_vm0, %v296_v10  ;;  %v1370_v10 = vrot.slane %v1368_v3, 4  ;;  %706 = vst [vmem:[#allocation2 + $0xb4] sm:$0x1] %v705_v47  ;;  %v764_v50 = vsel %vm8258_vm5, 0, %v763_v48  ;;  %v760_v51 = vld [vmem:[#allocation2 + $0xbc] sm:$0x1] }
  0x3e   : > { %7251 = vmatprep.mubr.msk.bf16.mxu0 %vm405_vm0, %v298_v11  ;;  %v687_v11 = vsel %vm8248_vm3, 0, %v686_v9  ;;  %7865 = vmatprep.subr.msk.bf16.mxu1 %vm1840_vm7, %v8343_v45  ;;  %v8351_v49 = vsel %vm1840_vm7, %v8343_v45, 0  ;;  %765 = vst [vmem:[#allocation2 + $0xc8] sm:$0x1] %v764_v50  ;;  %v761_v52 = vsel %vm8258_vm5, 0, %v760_v51 }
  0x3f   : > { %688 = vst [vmem:[#allocation2 + $0x6c] sm:$0x1] %v687_v11  ;;  %10212 = vst [vmem:[#allocation8_spill] sm:$0xff] %v8351_v49  ;;  %7604 = vmatpush3.bf16.msra.mxu1 %v8351_v49  ;;  %v8361_v53 = vld [vmem:[%s10172_s3 + $0x8] sm:$0x3] }
  0x40   : > { %762 = vst [vmem:[#allocation2 + $0xbc] sm:$0x1] %v761_v52  ;;  %7866 = vmatprep.subr.msk.bf16.mxu1 %vm1840_vm7, %v8361_v53  ;;  %v8368_v54 = vld [vmem:[%s10171_s2] ss:$0 sm:$0xff]  ;;  %vm865_vm12 = vsmask.f32 4368 }
  0x41   : > { %v1190_v29 = vld [vmem:[#allocation2 + $0xc] sm:$0xf]  ;;  %vm8384_vm14 = vmor %vm657_vm2, %vm865_vm12  ;;  %v1201_v36 = vld [vmem:[#allocation2 + $0x20] sm:$0x1]  ;;  %vm6399_vm2 = vcmask 125952  }
  0x42   : > { %v1194_v42 = vld [vmem:[#allocation2 + $0x14] sm:$0x1] }
  0x45   : > { %7252 = vmatmul.mubr.msk.bf16.gmra.mrb[20].mxu0 %vm405_vm0, %v300_v12  ;;  %v1362_v12 = vrot.slane %v1361_v6, 4 }
  0x46   : > { %7255 = vmatprep.mubr.msk.bf16.mxu0 %vm405_vm0, %v302_v13  ;;  %v1371_v13 = vor.u32 %v1370_v10, %v1366_v7 }
  0x47   : > { %v1367_v18 = vsel %vm8309_vm10, %v1362_v12, %v1366_v7 }
  0x48   : > { %v1372_v19 = vrot.slane %v1371_v13, 4 }
  0x4d   : > { %7256 = vmatmul.mubr.msk.bf16.gmra.mrb[24].mxu0 %vm405_vm0, %v304_v14  ;;  %v1376_v14 = vrot.slane %v1374_v4, 5 }
  0x4e   : > { %7259 = vmatprep.mubr.msk.bf16.mxu0 %vm405_vm0, %v306_v15 }
  0x4f   : > { %v1377_v23 = vsel %vm8309_vm10, %v1372_v19, %v1376_v14 }
  0x50   : > { %v6581_v25 = vcombine.low %v1367_v18, %v1377_v23 }
  0x55   : > { %7260 = vmatmul.mubr.msk.bf16.gmra.mrb[28].mxu0 %vm405_vm0, %v308_v16  ;;  %v745_v16 = vld [vmem:[#allocation2 + $0x80] sm:$0x1]  ;;  %vm2346_vm0 = vcmask 1046532  }
  0x56   : > { %v746_v20 = vsel %vm8258_vm5, 0, %v745_v16  ;;  %7265 = vmatprep.mubr.msk.bf16.mxu0 %vm1791_vm11, %v6581_v25  ;;  %vm9012_vm1 = vmor %vm2345_vm15, %vm2346_vm0 }
  0x57   : > { %747 = vst [vmem:[#allocation2 + $0x80] sm:$0x1] %v746_v20  ;;  %v1197_v20 = vld [vmem:[#allocation2 + $0x18] sm:$0xf] }
  0xf0   : > { %v7233_v55 = vpop.f32.mrb[0].mxu0 }
  0xf1   : > { %v497_v56 = vadd.f32 %v7233_v55, %v8368_v54  ;;  %v488_v57 = vpop.f32.mrb[1].mxu0 }
  0xf2   : > { %v489_v58 = vadd.f32 %v8368_v54, %v488_v57  ;;  %v7234_v59 = vpop.f32.mrb[2].mxu0 }
  0xf3   : > { %v617_v60 = vmax.f32 %v497_v56, 0.0  ;;  %v500_v61 = vadd.f32 %v7234_v59, %v8368_v54  ;;  %v491_v62 = vpop.f32.mrb[3].mxu0 }
  0xf4   : > { %v615_v63 = vmax.f32 %v489_v58, 0.0  ;;  %v492_v0 = vadd.f32 %v8368_v54, %v491_v62 }
  0xf5   : > { %v6979_v1 = vpack.c.bf16 %v617_v60, %v617_v60  ;;  %v618_v2 = vmax.f32 %v500_v61, 0.0 }
  0xf6   : > { %v6977_v3 = vpack.c.bf16 %v615_v63, %v615_v63  ;;  %v616_v4 = vmax.f32 %v492_v0, 0.0 }
  0xf7   : > { %v885_v5 = vshrl.u32 %v6979_v1, 16  ;;  %v6980_v6 = vpack.c.bf16 %v618_v2, %v618_v2  ;;  %v888_v7 = vshll.u32 %v6979_v1, 16  ;;  %v1211_v1 = vld [vmem:[#allocation2 + $0x30] sm:$0xf] }
  0xf8   : > { %v868_v8 = vshrl.u32 %v6977_v3, 16  ;;  %v871_v9 = vshll.u32 %v6977_v3, 16  ;;  %v6978_v10 = vpack.c.bf16 %v616_v4, %v616_v4  ;;  %v7237_v11 = vpop.f32.mrb[4].mxu0 }
  0xf9   : > { %v887_v12 = vrot.slane %v885_v5, 7  ;;  %v893_v13 = vshrl.u32 %v6980_v6, 16  ;;  %v896_v14 = vshll.u32 %v6980_v6, 16  ;;  %v513_v16 = vadd.f32 %v7237_v11, %v8368_v54  ;;  %v504_v18 = vpop.f32.mrb[5].mxu0 }
  0xfa   : > { %v870_v21 = vrot.slane %v868_v8, 7  ;;  %v876_v23 = vshrl.u32 %v6978_v10, 16  ;;  %v879_v24 = vshll.u32 %v6978_v10, 16  ;;  %v505_v25 = vadd.f32 %v8368_v54, %v504_v18  ;;  %v7238_v26 = vpop.f32.mrb[6].mxu0 }
  0xfb   : > { %v890_v27 = vor.u32 %v888_v7, %v887_v12  ;;  %v891_v28 = vrot.slane %v887_v12, 4  ;;  %v895_v30 = vrot.slane %v893_v13, 7  ;;  %v621_v31 = vmax.f32 %v513_v16, 0.0  ;;  %v507_v32 = vpop.f32.mrb[7].mxu0 }
  0xfc   : > { %v873_v33 = vor.u32 %v871_v9, %v870_v21  ;;  %v874_v34 = vrot.slane %v870_v21, 4  ;;  %v878_v37 = vrot.slane %v876_v23, 7  ;;  %v619_v38 = vmax.f32 %v505_v25, 0.0  ;;  %v1204_v9 = vld [vmem:[#allocation2 + $0x24] sm:$0xf] }
  0xfd   : > { %v1198_v39 = vsel %vm8377_vm13, %v890_v27, %v1197_v20  ;;  %v898_v40 = vor.u32 %v896_v14, %v895_v30  ;;  %v900_v41 = vrot.slane %v895_v30, 4  ;;  %v6983_v43 = vpack.c.bf16 %v621_v31, %v621_v31 }
  0xfe   : > { %1199 = vst [vmem:[#allocation2 + $0x18] sm:$0xf] %v1198_v39  ;;  %v1191_v44 = vsel %vm8377_vm13, %v873_v33, %v1190_v29  ;;  %v881_v46 = vor.u32 %v879_v24, %v878_v37  ;;  %v883_v47 = vrot.slane %v878_v37, 4  ;;  %v6981_v48 = vpack.c.bf16 %v619_v38, %v619_v38  ;;  %v1208_v33 = vld [vmem:[#allocation2 + $0x2c] sm:$0x1] }
  0xff   : > { %1192 = vst [vmem:[#allocation2 + $0xc] sm:$0xf] %v1191_v44  ;;  %v899_v50 = vsel %vm8384_vm14, %v891_v28, %v898_v40  ;;  %v1202_v51 = vsel %vm8248_vm3, %v900_v41, %v1201_v36  ;;  %v919_v52 = vshrl.u32 %v6983_v43, 16  ;;  %v922_v57 = vshll.u32 %v6983_v43, 16 }
 0x100   : > { %1200 = vst.msk [vmem:[#allocation2 + $0x1c] sm:$0xf] %vm647_vm6, %v899_v50  ;;  %1203 = vst [vmem:[#allocation2 + $0x20] sm:$0x1] %v1202_v51  ;;  %v882_v55 = vsel %vm8384_vm14, %v874_v34, %v881_v46  ;;  %v1195_v56 = vsel %vm8248_vm3, %v883_v47, %v1194_v42  ;;  %v902_v58 = vshrl.u32 %v6981_v48, 16  ;;  %v7241_v59 = vpop.f32.mrb[8].mxu0  ;;  %v516_v61 = vadd.f32 %v7238_v26, %v8368_v54 }
 0x101   : > { %1193 = vst.msk [vmem:[#allocation2 + $0x10] sm:$0xf] %vm647_vm6, %v882_v55  ;;  %1196 = vst [vmem:[#allocation2 + $0x14] sm:$0x1] %v1195_v56  ;;  %v8402_v60 = vrot.slane %v919_v52, 7  ;;  %v508_v62 = vadd.f32 %v8368_v54, %v507_v32  ;;  %v529_v63 = vadd.f32 %v7241_v59, %v8368_v54  ;;  %v520_v0 = vpop.f32.mrb[9].mxu0 }
 0x102   : > { %v904_v2 = vrot.slane %v902_v58, 7  ;;  %v905_v3 = vshll.u32 %v6981_v48, 16  ;;  %v521_v4 = vadd.f32 %v8368_v54, %v520_v0  ;;  %v7242_v5 = vpop.f32.mrb[10].mxu0  ;;  %v8410_v6 = vsel %vm1840_vm7, %v8361_v53, 0  ;;  %v1215_v32 = vld [vmem:[#allocation2 + $0x38] sm:$0x1] }
 0x103   : > { %v924_v7 = vor.u32 %v922_v57, %v8402_v60  ;;  %v925_v8 = vrot.slane %v8402_v60, 4  ;;  %v622_v10 = vmax.f32 %v516_v61, 0.0  ;;  %v620_v11 = vmax.f32 %v508_v62, 0.0  ;;  %v523_v12 = vpop.f32.mrb[11].mxu0  ;;  %v1225_v47 = vld [vmem:[#allocation2 + $0x48] sm:$0xf] }
 0x104   : > { %v907_v13 = vor.u32 %v905_v3, %v904_v2  ;;  %v908_v14 = vrot.slane %v904_v2, 4  ;;  %v625_v16 = vmax.f32 %v529_v63, 0.0  ;;  %v623_v18 = vmax.f32 %v521_v4, 0.0  ;;  %v1218_v59 = vld [vmem:[#allocation2 + $0x3c] sm:$0xf] }
 0x105   : > { %v1212_v20 = vsel %vm8377_vm13, %v924_v7, %v1211_v1  ;;  %v6984_v21 = vpack.c.bf16 %v622_v10, %v622_v10  ;;  %v6982_v23 = vpack.c.bf16 %v620_v11, %v620_v11  ;;  %v532_v53 = vadd.f32 %v7242_v5, %v8368_v54 }
 0x106   : > { %1213 = vst [vmem:[#allocation2 + $0x30] sm:$0xf] %v1212_v20  ;;  %v1205_v24 = vsel %vm8377_vm13, %v907_v13, %v1204_v9  ;;  %v6987_v25 = vpack.c.bf16 %v625_v16, %v625_v16  ;;  %v6985_v26 = vpack.c.bf16 %v623_v18, %v623_v18  ;;  %v524_v27 = vadd.f32 %v8368_v54, %v523_v12 }
 0x107   : > { %1206 = vst [vmem:[#allocation2 + $0x24] sm:$0xf] %v1205_v24  ;;  %v927_v28 = vshrl.u32 %v6984_v21, 16  ;;  %v930_v29 = vshll.u32 %v6984_v21, 16  ;;  %v910_v30 = vshrl.u32 %v6982_v23, 16  ;;  %v913_v31 = vshll.u32 %v6982_v23, 16 }
 0x108   : > { %v953_v34 = vshrl.u32 %v6987_v25, 16  ;;  %v956_v36 = vshll.u32 %v6987_v25, 16  ;;  %v936_v37 = vshrl.u32 %v6985_v26, 16  ;;  %v939_v38 = vshll.u32 %v6985_v26, 16  ;;  %v7245_v39 = vpop.f32.mrb[12].mxu0 }
 0x109   : > { %v929_v40 = vrot.slane %v927_v28, 7  ;;  %v912_v41 = vrot.slane %v910_v30, 7  ;;  %v626_v42 = vmax.f32 %v532_v53, 0.0  ;;  %v624_v43 = vmax.f32 %v524_v27, 0.0  ;;  %v536_v44 = vpop.f32.mrb[13].mxu0 }
 0x10a   : > { %v8420_v46 = vrot.slane %v953_v34, 7  ;;  %v8422_v48 = vrot.slane %v936_v37, 7  ;;  %v545_v50 = vadd.f32 %v7245_v39, %v8368_v54  ;;  %v537_v51 = vadd.f32 %v8368_v54, %v536_v44  ;;  %v7246_v52 = vpop.f32.mrb[14].mxu0  ;;  %v1229_v23 = vld [vmem:[#allocation2 + $0x50] sm:$0x1] }
 0x10b   : > { %v932_v55 = vor.u32 %v930_v29, %v929_v40  ;;  %v934_v56 = vrot.slane %v929_v40, 4  ;;  %v915_v57 = vor.u32 %v913_v31, %v912_v41  ;;  %v917_v58 = vrot.slane %v912_v41, 4  ;;  %v539_v60 = vpop.f32.mrb[15].mxu0  ;;  %v1222_v53 = vld [vmem:[#allocation2 + $0x44] sm:$0x1] }
 0x10c   : > { %v958_v61 = vor.u32 %v956_v36, %v8420_v46  ;;  %v959_v62 = vrot.slane %v8420_v46, 4  ;;  %v941_v63 = vor.u32 %v939_v38, %v8422_v48  ;;  %v942_v0 = vrot.slane %v8422_v48, 4  ;;  %v1334_v44 = vld [vmem:[%s10172_s3] sm:$0x3] }
 0x10d   : > { %v933_v1 = vsel %vm8384_vm14, %v925_v8, %v932_v55  ;;  %v1216_v2 = vsel %vm8248_vm3, %v934_v56, %v1215_v32  ;;  %v916_v3 = vsel %vm8384_vm14, %v908_v14, %v915_v57  ;;  %v1209_v4 = vsel %vm8248_vm3, %v917_v58, %v1208_v33  ;;  %7862 = vmatprep.subr.msk.bf16.mxu0 %vm1840_vm7, %v1334_v44  ;;  %v1239_v57 = vld [vmem:[#allocation2 + $0x60] sm:$0xf]  ;;  %v1232_v58 = vld [vmem:[#allocation2 + $0x54] sm:$0xf] }
 0x10e   : > { %1214 = vst.msk [vmem:[#allocation2 + $0x34] sm:$0xf] %vm647_vm6, %v933_v1  ;;  %1217 = vst [vmem:[#allocation2 + $0x38] sm:$0x1] %v1216_v2  ;;  %v1226_v5 = vsel %vm8377_vm13, %v958_v61, %v1225_v47  ;;  %v1219_v7 = vsel %vm8377_vm13, %v941_v63, %v1218_v59  ;;  %v6988_v8 = vpack.c.bf16 %v626_v42, %v626_v42  ;;  %v629_v10 = vmax.f32 %v545_v50, 0.0 }
 0x10f   : > { %1207 = vst.msk [vmem:[#allocation2 + $0x28] sm:$0xf] %vm647_vm6, %v916_v3  ;;  %1210 = vst [vmem:[#allocation2 + $0x2c] sm:$0x1] %v1209_v4  ;;  %v6986_v9 = vpack.c.bf16 %v624_v43, %v624_v43  ;;  %v627_v11 = vmax.f32 %v537_v51, 0.0  ;;  %v548_v12 = vadd.f32 %v7246_v52, %v8368_v54  ;;  %v540_v13 = vadd.f32 %v8368_v54, %v539_v60 }
 0x110   : > { %1227 = vst [vmem:[#allocation2 + $0x48] sm:$0xf] %v1226_v5  ;;  %1220 = vst [vmem:[#allocation2 + $0x3c] sm:$0xf] %v1219_v7  ;;  %v961_v14 = vshrl.u32 %v6988_v8, 16  ;;  %v964_v16 = vshll.u32 %v6988_v8, 16  ;;  %v6991_v24 = vpack.c.bf16 %v629_v10, %v629_v10 }
 0x111   : > { %v944_v18 = vshrl.u32 %v6986_v9, 16  ;;  %v947_v20 = vshll.u32 %v6986_v9, 16  ;;  %v7249_v21 = vpop.f32.mrb[16].mxu0  ;;  %v6989_v25 = vpack.c.bf16 %v627_v11, %v627_v11  ;;  %v630_v26 = vmax.f32 %v548_v12, 0.0  ;;  %v1304_v63 = vld [vmem:[#allocation2 + $0xc] sm:$0xf] }
 0x112   : > { %v628_v27 = vmax.f32 %v540_v13, 0.0  ;;  %v552_v28 = vpop.f32.mrb[17].mxu0  ;;  %v963_v29 = vrot.slane %v961_v14, 7  ;;  %v561_v31 = vadd.f32 %v7249_v21, %v8368_v54  ;;  %v987_v34 = vshrl.u32 %v6991_v24, 16  ;;  %v1243_v12 = vld [vmem:[#allocation2 + $0x68] sm:$0x1] }
 0x113   : > { %v946_v30 = vrot.slane %v944_v18, 7  ;;  %v553_v32 = vadd.f32 %v8368_v54, %v552_v28  ;;  %v7250_v33 = vpop.f32.mrb[18].mxu0  ;;  %v990_v36 = vshll.u32 %v6991_v24, 16  ;;  %v970_v37 = vshrl.u32 %v6989_v25, 16 }
 0x114   : > { %v973_v38 = vshll.u32 %v6989_v25, 16  ;;  %v555_v39 = vpop.f32.mrb[19].mxu0  ;;  %v966_v40 = vor.u32 %v964_v16, %v963_v29  ;;  %v968_v41 = vrot.slane %v963_v29, 4  ;;  %v989_v46 = vrot.slane %v987_v34, 7 }
 0x115   : > { %v949_v42 = vor.u32 %v947_v20, %v946_v30  ;;  %v951_v43 = vrot.slane %v946_v30, 4  ;;  %v972_v47 = vrot.slane %v970_v37, 7  ;;  %v6992_v48 = vpack.c.bf16 %v630_v26, %v630_v26  ;;  %v1236_v20 = vld [vmem:[#allocation2 + $0x5c] sm:$0x1]  ;;  %v1305_v30 = vld [vmem:[#allocation2 + $0x10] sm:$0xf] }
 0x116   : > { %v6990_v50 = vpack.c.bf16 %v628_v27, %v628_v27  ;;  %v967_v51 = vsel %vm8384_vm14, %v959_v62, %v966_v40  ;;  %v1230_v52 = vsel %vm8248_vm3, %v968_v41, %v1229_v23  ;;  %v992_v59 = vor.u32 %v990_v36, %v989_v46  ;;  %v1253_v40 = vld [vmem:[#allocation2 + $0x78] sm:$0xf]  ;;  %v1246_v41 = vld [vmem:[#allocation2 + $0x6c] sm:$0xf] }
 0x117   : > { %v950_v55 = vsel %vm8384_vm14, %v942_v0, %v949_v42  ;;  %v1223_v56 = vsel %vm8248_vm3, %v951_v43, %v1222_v53  ;;  %1228 = vst.msk [vmem:[#allocation2 + $0x4c] sm:$0xf] %vm647_vm6, %v967_v51  ;;  %1231 = vst [vmem:[#allocation2 + $0x50] sm:$0x1] %v1230_v52  ;;  %v993_v60 = vrot.slane %v989_v46, 4  ;;  %v975_v61 = vor.u32 %v973_v38, %v972_v47 }
 0x118   : > { %1221 = vst.msk [vmem:[#allocation2 + $0x40] sm:$0xf] %vm647_vm6, %v950_v55  ;;  %1224 = vst [vmem:[#allocation2 + $0x44] sm:$0x1] %v1223_v56  ;;  %v976_v62 = vrot.slane %v972_v47, 4  ;;  %v995_v1 = vshrl.u32 %v6992_v48, 16  ;;  %v1240_v5 = vsel %vm8377_vm13, %v992_v59, %v1239_v57  ;;  %v564_v14 = vadd.f32 %v7250_v33, %v8368_v54 }
 0x119   : > { %v998_v2 = vshll.u32 %v6992_v48, 16  ;;  %v978_v3 = vshrl.u32 %v6990_v50, 16  ;;  %v981_v0 = vshll.u32 %v6990_v50, 16  ;;  %v8462_v4 = vpop.f32.mrb[20].mxu0  ;;  %v1233_v7 = vsel %vm8377_vm13, %v975_v61, %v1232_v58  ;;  %1241 = vst [vmem:[#allocation2 + $0x60] sm:$0xf] %v1240_v5 }
 0x11a   : > { %v633_v8 = vmax.f32 %v561_v31, 0.0  ;;  %v631_v9 = vmax.f32 %v553_v32, 0.0  ;;  %v8468_v10 = vpop.f32.mrb[21].mxu0  ;;  %1234 = vst [vmem:[#allocation2 + $0x54] sm:$0xf] %v1233_v7  ;;  %v997_v11 = vrot.slane %v995_v1, 7  ;;  %v556_v16 = vadd.f32 %v8368_v54, %v555_v39 }
 0x11b   : > { %v980_v13 = vrot.slane %v978_v3, 7  ;;  %v8472_v18 = vpop.f32.mrb[22].mxu0  ;;  %v1379_v53 = vshrl.u32 %v1304_v63, 16  ;;  %v1382_v24 = vshll.u32 %v1304_v63, 16  ;;  %v634_v44 = vmax.f32 %v564_v14, 0.0 }
 0x11c   : > { %v6995_v21 = vpack.c.bf16 %v633_v8, %v633_v8  ;;  %v6993_v23 = vpack.c.bf16 %v631_v9, %v631_v9  ;;  %v8474_v25 = vpop.f32.mrb[23].mxu0  ;;  %v1000_v26 = vor.u32 %v998_v2, %v997_v11  ;;  %v1002_v27 = vrot.slane %v997_v11, 4  ;;  %v1336_v47 = vld [vmem:[#allocation2 + $0x14] sm:$0x1]  ;;  %v1306_v2 = vld [vmem:[#allocation2 + $0x18] sm:$0xf] }
 0x11d   : > { %v983_v28 = vor.u32 %v981_v0, %v980_v13  ;;  %v985_v29 = vrot.slane %v980_v13, 4  ;;  %v632_v46 = vmax.f32 %v556_v16, 0.0  ;;  %v1381_v48 = vrot.slane %v1379_v53, 4  ;;  %v1307_v9 = vld [vmem:[#allocation2 + $0x1c] sm:$0xf] }
 0x11e   : > { %v1021_v31 = vshrl.u32 %v6995_v21, 16  ;;  %v1024_v32 = vshll.u32 %v6995_v21, 16  ;;  %v1004_v34 = vshrl.u32 %v6993_v23, 16  ;;  %v1007_v33 = vshll.u32 %v6993_v23, 16  ;;  %v8834_v17 = vld [vmem:[#allocation2 + $0x4c] sm:$0xf] }
 0x11f   : > { %v1001_v36 = vsel %vm8384_vm14, %v993_v60, %v1000_v26  ;;  %v1244_v37 = vsel %vm8248_vm3, %v1002_v27, %v1243_v12  ;;  %v984_v38 = vsel %vm8384_vm14, %v976_v62, %v983_v28  ;;  %v1237_v39 = vsel %vm8248_vm3, %v985_v29, %v1236_v20  ;;  %v1257_v26 = vld [vmem:[#allocation2 + $0x80] sm:$0x1]  ;;  %v8844_v49 = vld [vmem:[#allocation2 + $0x50] sm:$0x1] }
 0x120   : > { %1242 = vst.msk [vmem:[#allocation2 + $0x64] sm:$0xf] %vm647_vm6, %v1001_v36  ;;  %1245 = vst [vmem:[#allocation2 + $0x68] sm:$0x1] %v1244_v37  ;;  %v1023_v42 = vrot.slane %v1021_v31, 7  ;;  %v1006_v43 = vrot.slane %v1004_v34, 7  ;;  %v6996_v61 = vpack.c.bf16 %v634_v44, %v634_v44  ;;  %v6994_v62 = vpack.c.bf16 %v632_v46, %v632_v46 }
 0x121   : > { %1235 = vst.msk [vmem:[#allocation2 + $0x58] sm:$0xf] %vm647_vm6, %v984_v38  ;;  %1238 = vst [vmem:[#allocation2 + $0x5c] sm:$0x1] %v1237_v39  ;;  %v1384_v50 = vrot.slane %v1382_v24, 5  ;;  %v1388_v51 = vshll.u32 %v1305_v30, 16 }
 0x122   : > { %v1392_v52 = vshrl.u32 %v1305_v30, 16  ;;  %v8486_v55 = vpop.f32.mrb[24].mxu0  ;;  %v1026_v56 = vor.u32 %v1024_v32, %v1023_v42  ;;  %v1027_v57 = vrot.slane %v1023_v42, 4  ;;  %v1009_v58 = vor.u32 %v1007_v33, %v1006_v43  ;;  %v1250_v30 = vld [vmem:[#allocation2 + $0x74] sm:$0x1]  ;;  %10220 = vst [vmem:[#allocation12_spill] sm:$0xff] %v8844_v49 }
 0x123   : > { %v1010_v59 = vrot.slane %v1006_v43, 4  ;;  %v8488_v60 = vpop.f32.mrb[25].mxu0  ;;  %v1385_v63 = vor.u32 %v1384_v50, %v1381_v48  ;;  %v1390_v1 = vrot.slane %v1388_v51, 5  ;;  %v1398_v8 = vshll.u32 %v1336_v47, 16 }
 0x124   : > { %v8490_v3 = vpop.f32.mrb[26].mxu0  ;;  %v1254_v0 = vsel %vm8377_vm13, %v1026_v56, %v1253_v40  ;;  %v1247_v5 = vsel %vm8377_vm13, %v1009_v58, %v1246_v41  ;;  %v1394_v7 = vrot.slane %v1392_v52, 4  ;;  %v1029_v12 = vshrl.u32 %v6996_v61, 16  ;;  %v1337_v40 = vld [vmem:[#allocation2 + $0x20] sm:$0x1] }
 0x125   : > { %v8496_v11 = vpop.f32.mrb[27].mxu0  ;;  %1255 = vst [vmem:[#allocation2 + $0x78] sm:$0xf] %v1254_v0  ;;  %1248 = vst [vmem:[#allocation2 + $0x6c] sm:$0xf] %v1247_v5  ;;  %v1032_v13 = vshll.u32 %v6996_v61, 16  ;;  %v580_v0 = vadd.f32 %v8472_v18, %v8368_v54  ;;  %v572_v5 = vadd.f32 %v8368_v54, %v8474_v25 }
 0x126   : > { %v1012_v14 = vshrl.u32 %v6994_v62, 16  ;;  %v1015_v16 = vshll.u32 %v6994_v62, 16  ;;  %v1386_v20 = vrot.slane %v1385_v63, 4  ;;  %v1395_v21 = vor.u32 %v1394_v7, %v1390_v1  ;;  %v1308_v56 = vld [vmem:[#allocation2 + $0x24] sm:$0xf] }
 0x127   : > { %v1400_v23 = vrot.slane %v1398_v8, 5  ;;  %v1403_v53 = vshrl.u32 %v1306_v2, 16  ;;  %v1031_v24 = vrot.slane %v1029_v12, 7  ;;  %v1406_v28 = vshll.u32 %v1306_v2, 16 }
 0x128   : > { %v1014_v27 = vrot.slane %v1012_v14, 7  ;;  %v1412_v29 = vshll.u32 %v1307_v9, 16  ;;  %v1391_v31 = vsel %vm8309_vm10, %v1386_v20, %v1390_v1  ;;  %v1396_v32 = vrot.slane %v1395_v21, 4  ;;  %v8500_v41 = vpop.f32.mrb[28].mxu0 }
 0x129   : > { %v1405_v34 = vrot.slane %v1403_v53, 4  ;;  %v1416_v33 = vshrl.u32 %v1307_v9, 16  ;;  %v1034_v36 = vor.u32 %v1032_v13, %v1031_v24  ;;  %v1036_v37 = vrot.slane %v1031_v24, 4  ;;  %v8504_v47 = vpop.f32.mrb[29].mxu0 }
 0x12a   : > { %v1017_v38 = vor.u32 %v1015_v16, %v1014_v27  ;;  %v1019_v39 = vrot.slane %v1014_v27, 4  ;;  %v1401_v42 = vsel %vm8309_vm10, %v1396_v32, %v1400_v23  ;;  %v1408_v43 = vrot.slane %v1406_v28, 5  ;;  %v8514_v58 = vpop.f32.mrb[30].mxu0  ;;  %v1338_v27 = vld [vmem:[#allocation2 + $0x2c] sm:$0x1] }
 0x12b   : > { %v1414_v44 = vrot.slane %v1412_v29, 5  ;;  %v1418_v46 = vrot.slane %v1416_v33, 4  ;;  %v1035_v48 = vsel %vm8384_vm14, %v1027_v57, %v1034_v36  ;;  %v1258_v50 = vsel %vm8248_vm3, %v1036_v37, %v1257_v26  ;;  %v8518_v1 = vpop.f32.mrb[31].mxu0  ;;  %v1267_v37 = vld [vmem:[#allocation2 + $0x90] sm:$0xf] }
 0x12c   : > { %v1018_v51 = vsel %vm8384_vm14, %v1010_v59, %v1017_v38  ;;  %v1251_v52 = vsel %vm8248_vm3, %v1019_v39, %v1250_v30  ;;  %1256 = vst.msk [vmem:[#allocation2 + $0x7c] sm:$0xf] %vm647_vm6, %v1035_v48  ;;  %1259 = vst [vmem:[#allocation2 + $0x80] sm:$0x1] %v1258_v50  ;;  %v6582_v61 = vcombine.low %v1391_v31, %v1401_v42  ;;  %v1422_v63 = vshll.u32 %v1337_v40, 16 }
 0x12d   : > { %1249 = vst.msk [vmem:[#allocation2 + $0x70] sm:$0xf] %vm647_vm6, %v1018_v51  ;;  %1252 = vst [vmem:[#allocation2 + $0x74] sm:$0x1] %v1251_v52  ;;  %v1409_v57 = vor.u32 %v1408_v43, %v1405_v34  ;;  %v1419_v62 = vor.u32 %v1418_v46, %v1414_v44  ;;  %v577_v59 = vadd.f32 %v8462_v4, %v8368_v54  ;;  %v1427_v12 = vshrl.u32 %v1308_v56, 16 }
 0x12e   : > { %v569_v2 = vadd.f32 %v8368_v54, %v8468_v10  ;;  %7266 = vmatmul.mubr.msk.bf16.vlgmr.msra.gmra.mrb[32].mxu0 %vm1791_vm11, %v6582_v61  ;;  %v1424_v9 = vrot.slane %v1422_v63, 5  ;;  %v638_v16 = vmax.f32 %v580_v0, 0.0  ;;  %v636_v20 = vmax.f32 %v572_v5, 0.0  ;;  %v1309_v4 = vld [vmem:[#allocation2 + $0x28] sm:$0xf] }
 0x12f   : > { %v1410_v7 = vrot.slane %v1409_v57, 4  ;;  %v1420_v8 = vrot.slane %v1419_v62, 4  ;;  %v637_v13 = vmax.f32 %v577_v59, 0.0  ;;  %v1429_v21 = vrot.slane %v1427_v12, 4  ;;  %v1260_v52 = vld [vmem:[#allocation2 + $0x84] sm:$0xf] }
 0x130   : > { %v635_v14 = vmax.f32 %v569_v2, 0.0  ;;  %v1430_v23 = vshll.u32 %v1308_v56, 16  ;;  %v7000_v26 = vpack.c.bf16 %v638_v16, %v638_v16  ;;  %v6998_v28 = vpack.c.bf16 %v636_v20, %v636_v20  ;;  %v1271_v5 = vld [vmem:[#allocation2 + $0x98] sm:$0x1] }
 0x131   : > { %v1415_v10 = vsel %vm8309_vm10, %v1410_v7, %v1414_v44  ;;  %v1425_v18 = vsel %vm8309_vm10, %v1420_v8, %v1424_v9  ;;  %v6999_v53 = vpack.c.bf16 %v637_v13, %v637_v13  ;;  %v1436_v30 = vshll.u32 %v1309_v4, 16  ;;  %v1264_v7 = vld [vmem:[#allocation2 + $0x8c] sm:$0x1] }
 0x132   : > { %v6583_v25 = vcombine.low %v1415_v10, %v1425_v18  ;;  %v6997_v24 = vpack.c.bf16 %v635_v14, %v635_v14  ;;  %v1432_v29 = vrot.slane %v1430_v23, 5  ;;  %v1440_v31 = vshrl.u32 %v1309_v4, 16  ;;  %v1310_v14 = vld [vmem:[#allocation2 + $0x30] sm:$0xf]  ;;  %v1311_v18 = vld [vmem:[#allocation2 + $0x34] sm:$0xf] }
 0x133   : > { %v1055_v32 = vshrl.u32 %v6999_v53, 16  ;;  %v1058_v34 = vshll.u32 %v6999_v53, 16  ;;  %v1063_v38 = vshrl.u32 %v7000_v26, 16  ;;  %v1066_v39 = vshll.u32 %v7000_v26, 16  ;;  %v7934_v51 = vld [vmem:[#allocation2 + $0x78] sm:$0xff]  }
 0x134   : > { %7269 = vmatprep.mubr.msk.bf16.mxu0 %vm1791_vm11, %v6583_v25  ;;  %v1038_v33 = vshrl.u32 %v6997_v24, 16  ;;  %v1041_v36 = vshll.u32 %v6997_v24, 16  ;;  %v1046_v40 = vshrl.u32 %v6998_v28, 16  ;;  %v1049_v42 = vshll.u32 %v6998_v28, 16  ;;  %v7933_v43 = vld [vmem:[#allocation2 + $0x6c] sm:$0xff]  }
 0x135   : > { %v1057_v44 = vrot.slane %v1055_v32, 7  ;;  %v1433_v48 = vor.u32 %v1432_v29, %v1429_v21  ;;  %v1438_v50 = vrot.slane %v1436_v30, 5  ;;  %v1065_v56 = vrot.slane %v1063_v38, 7  ;;  %7383 = vmatprep.mubr.msk.bf16.mxu1 %vm1791_vm11, %v7933_v43  ;;  %v1339_v21 = vld [vmem:[#allocation2 + $0x38] sm:$0x1] }
 0x136   : > { %v1040_v46 = vrot.slane %v1038_v33, 7  ;;  %v1048_v61 = vrot.slane %v1046_v40, 7  ;;  %v1442_v57 = vrot.slane %v1440_v31, 4  ;;  %v1446_v62 = vshll.u32 %v1338_v27, 16  ;;  %7384 = vmatmul.mubr.msk.bf16.vlgmr.msra.gmra.mrb[0].mxu1 %vm1791_vm11, %v7934_v51  ;;  %v1312_v29 = vld [vmem:[#allocation2 + $0x3c] sm:$0xf] }
 0x137   : > { %v1060_v63 = vor.u32 %v1058_v34, %v1057_v44  ;;  %v1061_v59 = vrot.slane %v1057_v44, 4  ;;  %v1068_v8 = vor.u32 %v1066_v39, %v1065_v56  ;;  %v1070_v9 = vrot.slane %v1065_v56, 4  ;;  %7400 = vmatpush3.bf16.msra.mxu1 %v8410_v6 }
 0x138   : > { %v1043_v2 = vor.u32 %v1041_v36, %v1040_v46  ;;  %v1044_v0 = vrot.slane %v1040_v46, 4  ;;  %v1051_v12 = vor.u32 %v1049_v42, %v1048_v61  ;;  %v1053_v13 = vrot.slane %v1048_v61, 4 }
 0x139   : > { %v1268_v16 = vsel %vm8377_vm13, %v1060_v63, %v1267_v37  ;;  %v1434_v4 = vrot.slane %v1433_v48, 4  ;;  %v1443_v10 = vor.u32 %v1442_v57, %v1438_v50  ;;  %v1069_v23 = vsel %vm8384_vm14, %v1061_v59, %v1068_v8 }
 0x13a   : > { %v1261_v20 = vsel %vm8377_vm13, %v1043_v2, %v1260_v52  ;;  %1269 = vst [vmem:[#allocation2 + $0x90] sm:$0xf] %v1268_v16  ;;  %v1272_v25 = vsel %vm8248_vm3, %v1070_v9, %v1271_v5  ;;  %v1052_v6 = vsel %vm8384_vm14, %v1044_v0, %v1051_v12  ;;  %v1265_v53 = vsel %vm8248_vm3, %v1053_v13, %v1264_v7  ;;  %v1274_v13 = vld [vmem:[#allocation2 + $0x9c] sm:$0xf] }
 0x13b   : > { %1262 = vst [vmem:[#allocation2 + $0x84] sm:$0xf] %v1261_v20  ;;  %1270 = vst.msk [vmem:[#allocation2 + $0x94] sm:$0xf] %vm647_vm6, %v1069_v23  ;;  %v1439_v24 = vsel %vm8309_vm10, %v1434_v4, %v1438_v50  ;;  %v1444_v26 = vrot.slane %v1443_v10, 4  ;;  %v1448_v27 = vrot.slane %v1446_v62, 5  ;;  %v593_v37 = vadd.f32 %v8486_v55, %v8368_v54 }
 0x13c   : > { %1273 = vst [vmem:[#allocation2 + $0x98] sm:$0x1] %v1272_v25  ;;  %1263 = vst.msk [vmem:[#allocation2 + $0x88] sm:$0xf] %vm647_vm6, %v1052_v6  ;;  %v1451_v28 = vshrl.u32 %v1310_v14, 16  ;;  %v1454_v30 = vshll.u32 %v1310_v14, 16  ;;  %v585_v38 = vadd.f32 %v8368_v54, %v8488_v60  ;;  %v596_v50 = vadd.f32 %v8490_v3, %v8368_v54 }
 0x13d   : > { %1266 = vst [vmem:[#allocation2 + $0x8c] sm:$0x1] %v1265_v53  ;;  %v1460_v31 = vshll.u32 %v1311_v18, 16  ;;  %v1464_v32 = vshrl.u32 %v1311_v18, 16  ;;  %v1470_v34 = vshll.u32 %v1339_v21, 16  ;;  %v1449_v33 = vsel %vm8309_vm10, %v1444_v26, %v1448_v27 }
 0x13e   : > { %v1453_v36 = vrot.slane %v1451_v28, 4  ;;  %v6584_v39 = vcombine.low %v1439_v24, %v1449_v33  ;;  %v1456_v40 = vrot.slane %v1454_v30, 5  ;;  %v641_v46 = vmax.f32 %v593_v37, 0.0  ;;  %v8568_v21 = vld [vmem:[#allocation2 + $0x40] sm:$0xf] }
 0x13f   : > { %v1462_v42 = vrot.slane %v1460_v31, 5  ;;  %v1466_v43 = vrot.slane %v1464_v32, 4  ;;  %v1472_v44 = vrot.slane %v1470_v34, 5  ;;  %v639_v48 = vmax.f32 %v585_v38, 0.0  ;;  %v1340_v26 = vld [vmem:[#allocation2 + $0x44] sm:$0x1] }
 0x140   : > { %7270 = vmatmul.mubr.msk.bf16.gmra.mrb[36].mxu0 %vm1791_vm11, %v6584_v39  ;;  %v1457_v51 = vor.u32 %v1456_v40, %v1453_v36  ;;  %v588_v55 = vadd.f32 %v8368_v54, %v8496_v11  ;;  %v1475_v56 = vshrl.u32 %v1312_v29, 16  ;;  %v7003_v61 = vpack.c.bf16 %v641_v46, %v641_v46  ;;  %v1281_v11 = vld [vmem:[#allocation2 + $0xa8] sm:$0xf]  ;;  %v1285_v38 = vld [vmem:[#allocation2 + $0xb0] sm:$0x1] }
 0x141   : > { %v1467_v52 = vor.u32 %v1466_v43, %v1462_v42  ;;  %v7001_v60 = vpack.c.bf16 %v639_v48, %v639_v48  ;;  %v642_v57 = vmax.f32 %v596_v50, 0.0  ;;  %v1478_v62 = vshll.u32 %v1312_v29, 16  ;;  %v1278_v39 = vld [vmem:[#allocation2 + $0xa4] sm:$0x1]  ;;  %v8579_v50 = vld [vmem:[#allocation2 + $0x48] sm:$0xf] }
 0x142   : > { %v1458_v63 = vrot.slane %v1457_v51, 4  ;;  %v640_v2 = vmax.f32 %v588_v55, 0.0  ;;  %v1477_v0 = vrot.slane %v1475_v56, 4  ;;  %v1089_v5 = vshrl.u32 %v7003_v61, 16  ;;  %v7936_v20 = vld [vmem:[#allocation2 + $0x90] sm:$0xff]  }
 0x143   : > { %v1468_v59 = vrot.slane %v1467_v52, 4  ;;  %v1092_v7 = vshll.u32 %v7003_v61, 16  ;;  %v1072_v8 = vshrl.u32 %v7001_v60, 16  ;;  %v1075_v3 = vshll.u32 %v7001_v60, 16  ;;  %v7935_v9 = vld [vmem:[#allocation2 + $0x84] sm:$0xff]  }
 0x144   : > { %v1463_v12 = vsel %vm8309_vm10, %v1458_v63, %v1462_v42  ;;  %v7004_v14 = vpack.c.bf16 %v642_v57, %v642_v57  ;;  %v7002_v16 = vpack.c.bf16 %v640_v2, %v640_v2  ;;  %v1091_v10 = vrot.slane %v1089_v5, 7  ;;  %7387 = vmatprep.mubr.msk.bf16.mxu1 %vm1791_vm11, %v7935_v9  ;;  %v8581_v51 = vld [vmem:[#allocation2 + $0x4c] sm:$0xf]  ;;  %v1341_v60 = vld [vmem:[#allocation2 + $0x50] sm:$0x1] }
 0x145   : > { %v1473_v54 = vsel %vm8309_vm10, %v1468_v59, %v1472_v44  ;;  %v1074_v18 = vrot.slane %v1072_v8, 7  ;;  %v1480_v23 = vrot.slane %v1478_v62, 5  ;;  %7388 = vmatmul.mubr.msk.bf16.gmra.mrb[4].mxu1 %vm1791_vm11, %v7936_v20  ;;  %v1484_v33 = vshll.u32 %v8568_v21, 16  ;;  %v8604_v20 = vld [vmem:[#allocation2 + $0x54] sm:$0xf] }
 0x146   : > { %v6585_v4 = vcombine.low %v1463_v12, %v1473_v54  ;;  %v1097_v25 = vshrl.u32 %v7004_v14, 16  ;;  %v1100_v6 = vshll.u32 %v7004_v14, 16  ;;  %v1080_v53 = vshrl.u32 %v7002_v16, 16  ;;  %v7992_v12 = vld [vmem:[%s10171_s2] ss:$0 sm:$0xff] }
 0x147   : > { %v1083_v24 = vshll.u32 %v7002_v16, 16  ;;  %v1094_v27 = vor.u32 %v1092_v7, %v1091_v10  ;;  %v1095_v28 = vrot.slane %v1091_v10, 4  ;;  %v1077_v29 = vor.u32 %v1075_v3, %v1074_v18 }
 0x148   : > { %7273 = vmatprep.mubr.msk.bf16.mxu0 %vm1791_vm11, %v6585_v4  ;;  %v1078_v30 = vrot.slane %v1074_v18, 4  ;;  %v1099_v31 = vrot.slane %v1097_v25, 7  ;;  %v1082_v32 = vrot.slane %v1080_v53, 7  ;;  %v1481_v34 = vor.u32 %v1480_v23, %v1477_v0 }
 0x149   : > { %v1282_v36 = vsel %vm8377_vm13, %v1094_v27, %v1281_v11  ;;  %v1275_v37 = vsel %vm8377_vm13, %v1077_v29, %v1274_v13  ;;  %v1488_v40 = vshrl.u32 %v8568_v21, 16  ;;  %v1494_v42 = vshll.u32 %v1340_v26, 16 }
 0x14a   : > { %1283 = vst [vmem:[#allocation2 + $0xa8] sm:$0xf] %v1282_v36  ;;  %1276 = vst [vmem:[#allocation2 + $0x9c] sm:$0xf] %v1275_v37  ;;  %v1102_v43 = vor.u32 %v1100_v6, %v1099_v31  ;;  %v1104_v44 = vrot.slane %v1099_v31, 4  ;;  %v1085_v46 = vor.u32 %v1083_v24, %v1082_v32  ;;  %v1087_v48 = vrot.slane %v1082_v32, 4 }
 0x14b   : > { %v1482_v52 = vrot.slane %v1481_v34, 4  ;;  %v1486_v55 = vrot.slane %v1484_v33, 5  ;;  %v1490_v56 = vrot.slane %v1488_v40, 4  ;;  %v1496_v61 = vrot.slane %v1494_v42, 5 }
 0x14c   : > { %v1103_v57 = vsel %vm8384_vm14, %v1095_v28, %v1102_v43  ;;  %v1286_v62 = vsel %vm8248_vm3, %v1104_v44, %v1285_v38  ;;  %v1086_v63 = vsel %vm8384_vm14, %v1078_v30, %v1085_v46  ;;  %v1279_v59 = vsel %vm8248_vm3, %v1087_v48, %v1278_v39  ;;  %v1295_v43 = vld [vmem:[#allocation2 + $0xc0] sm:$0xf] }
 0x14d   : > { %1284 = vst.msk [vmem:[#allocation2 + $0xac] sm:$0xf] %vm647_vm6, %v1103_v57  ;;  %1287 = vst [vmem:[#allocation2 + $0xb0] sm:$0x1] %v1286_v62  ;;  %v1487_v2 = vsel %vm8309_vm10, %v1482_v52, %v1486_v55  ;;  %v1491_v0 = vor.u32 %v1490_v56, %v1486_v55  ;;  %v1499_v5 = vshrl.u32 %v8579_v50, 16  ;;  %v1502_v7 = vshll.u32 %v8579_v50, 16 }
 0x14e   : > { %1277 = vst.msk [vmem:[#allocation2 + $0xa0] sm:$0xf] %vm647_vm6, %v1086_v63  ;;  %1280 = vst [vmem:[#allocation2 + $0xa4] sm:$0x1] %v1279_v59  ;;  %v1508_v8 = vshll.u32 %v8581_v51, 16  ;;  %v1512_v3 = vshrl.u32 %v8581_v51, 16  ;;  %v609_v54 = vadd.f32 %v7992_v12, %v8500_v41  ;;  %v601_v16 = vadd.f32 %v7992_v12, %v8504_v47 }
 0x14f   : > { %v1518_v9 = vshll.u32 %v1341_v60, 16  ;;  %v1492_v11 = vrot.slane %v1491_v0, 4  ;;  %v1501_v13 = vrot.slane %v1499_v5, 4  ;;  %v1504_v14 = vrot.slane %v1502_v7, 5  ;;  %v8616_v60 = vld [vmem:[#allocation2 + $0x58] sm:$0xf] }
 0x150   : > { %v1510_v4 = vrot.slane %v1508_v8, 5  ;;  %v1514_v10 = vrot.slane %v1512_v3, 4  ;;  %v645_v23 = vmax.f32 %v609_v54, 0.0  ;;  %v643_v53 = vmax.f32 %v601_v16, 0.0  ;;  %v1288_v63 = vld [vmem:[#allocation2 + $0xb4] sm:$0xf] }
 0x151   : > { %v1520_v18 = vrot.slane %v1518_v9, 5  ;;  %v1497_v25 = vsel %vm8309_vm10, %v1492_v11, %v1496_v61  ;;  %v1505_v6 = vor.u32 %v1504_v14, %v1501_v13  ;;  %v612_v24 = vadd.f32 %v7992_v12, %v8514_v58  ;;  %v1299_v8 = vld [vmem:[#allocation2 + $0xc8] sm:$0x1]  ;;  %v1342_v54 = vld [vmem:[#allocation2 + $0x5c] sm:$0x1] }
 0x152   : > { %v6586_v26 = vcombine.low %v1487_v2, %v1497_v25  ;;  %v1515_v41 = vor.u32 %v1514_v10, %v1510_v4  ;;  %v7007_v27 = vpack.c.bf16 %v645_v23, %v645_v23  ;;  %v604_v28 = vadd.f32 %v7992_v12, %v8518_v1  ;;  %v1292_v10 = vld [vmem:[#allocation2 + $0xbc] sm:$0x1]  ;;  %v8628_v23 = vld [vmem:[#allocation2 + $0x60] sm:$0xf] }
 0x153   : > { %v1506_v29 = vrot.slane %v1505_v6, 4  ;;  %v7005_v47 = vpack.c.bf16 %v643_v53, %v643_v53  ;;  %v646_v30 = vmax.f32 %v612_v24, 0.0  ;;  %v1523_v31 = vshrl.u32 %v8604_v20, 16 }
 0x154   : > { %7274 = vmatmul.mubr.msk.bf16.gmra.mrb[40].mxu0 %vm1791_vm11, %v6586_v26  ;;  %v1516_v32 = vrot.slane %v1515_v41, 4  ;;  %v1123_v34 = vshrl.u32 %v7007_v27, 16  ;;  %v1126_v33 = vshll.u32 %v7007_v27, 16  ;;  %v644_v36 = vmax.f32 %v604_v28, 0.0  ;;  %v7938_v48 = vld [vmem:[#allocation2 + $0xa8] sm:$0xff]  }
 0x155   : > { %v1511_v37 = vsel %vm8309_vm10, %v1506_v29, %v1510_v4  ;;  %v1106_v58 = vshrl.u32 %v7005_v47, 16  ;;  %v1109_v38 = vshll.u32 %v7005_v47, 16  ;;  %v7008_v39 = vpack.c.bf16 %v646_v30, %v646_v30  ;;  %v7937_v40 = vld [vmem:[#allocation2 + $0x9c] sm:$0xff]   ;;  %v8630_v26 = vld [vmem:[#allocation2 + $0x64] sm:$0xf] }
 0x156   : > { %v1521_v1 = vsel %vm8309_vm10, %v1516_v32, %v1520_v18  ;;  %v1125_v42 = vrot.slane %v1123_v34, 7  ;;  %v7006_v44 = vpack.c.bf16 %v644_v36, %v644_v36  ;;  %v1525_v46 = vrot.slane %v1523_v31, 4  ;;  %7391 = vmatprep.mubr.msk.bf16.mxu1 %vm1791_vm11, %v7937_v40  ;;  %v1343_v29 = vld [vmem:[#allocation2 + $0x68] sm:$0x1]  ;;  %v8642_v34 = vld [vmem:[#allocation2 + $0x6c] sm:$0xf] }
 0x157   : > { %v6587_v52 = vcombine.low %v1511_v37, %v1521_v1  ;;  %v1108_v55 = vrot.slane %v1106_v58, 7  ;;  %v1131_v56 = vshrl.u32 %v7008_v39, 16  ;;  %v1134_v61 = vshll.u32 %v7008_v39, 16  ;;  %7392 = vmatmul.mubr.msk.bf16.gmra.mrb[8].mxu1 %vm1791_vm11, %v7938_v48  ;;  %v8648_v1 = vld [vmem:[#allocation2 + $0x70] sm:$0xf] }
 0x158   : > { %v1128_v57 = vor.u32 %v1126_v33, %v1125_v42  ;;  %v1129_v62 = vrot.slane %v1125_v42, 4  ;;  %v1114_v59 = vshrl.u32 %v7006_v44, 16  ;;  %v1117_v2 = vshll.u32 %v7006_v44, 16  ;;  %v8650_v42 = vld [vmem:[#allocation2 + $0x78] sm:$0xf] }
 0x159   : > { %7277 = vmatprep.mubr.msk.bf16.mxu0 %vm1791_vm11, %v6587_v52  ;;  %v1111_v0 = vor.u32 %v1109_v38, %v1108_v55  ;;  %v1112_v5 = vrot.slane %v1108_v55, 4  ;;  %v1133_v7 = vrot.slane %v1131_v56, 7  ;;  %v1526_v3 = vshll.u32 %v8604_v20, 16  ;;  %v1344_v48 = vld [vmem:[#allocation2 + $0x74] sm:$0x1] }
 0x15a   : > { %v1296_v9 = vsel %vm8377_vm13, %v1128_v57, %v1295_v43  ;;  %v1116_v12 = vrot.slane %v1114_v59, 7  ;;  %v1532_v11 = vshll.u32 %v8616_v60, 16  ;;  %v1536_v13 = vshrl.u32 %v8616_v60, 16 }
 0x15b   : > { %1297 = vst [vmem:[#allocation2 + $0xc0] sm:$0xf] %v1296_v9  ;;  %v1289_v14 = vsel %vm8377_vm13, %v1111_v0, %v1288_v63  ;;  %v1136_v16 = vor.u32 %v1134_v61, %v1133_v7  ;;  %v1138_v4 = vrot.slane %v1133_v7, 4  ;;  %v1528_v18 = vrot.slane %v1526_v3, 5  ;;  %v8659_v0 = vld [vmem:[#allocation2 + $0x7c] sm:$0xf] }
 0x15c   : > { %1290 = vst [vmem:[#allocation2 + $0xb4] sm:$0xf] %v1289_v14  ;;  %v1119_v25 = vor.u32 %v1117_v2, %v1116_v12  ;;  %v1121_v6 = vrot.slane %v1116_v12, 4  ;;  %v1534_v53 = vrot.slane %v1532_v11, 5  ;;  %v1538_v24 = vrot.slane %v1536_v13, 4 }
 0x15d   : > { %v1137_v41 = vsel %vm8384_vm14, %v1129_v62, %v1136_v16  ;;  %v1300_v19 = vsel %vm8248_vm3, %v1138_v4, %v1299_v8  ;;  %v1529_v27 = vor.u32 %v1528_v18, %v1525_v46  ;;  %v1542_v28 = vshll.u32 %v1342_v54, 16  ;;  %v1345_v9 = vld [vmem:[#allocation2 + $0x80] sm:$0x1] }
 0x15e   : > { %1298 = vst.msk [vmem:[#allocation2 + $0xc4] sm:$0xf] %vm647_vm6, %v1137_v41  ;;  %1301 = vst [vmem:[#allocation2 + $0xc8] sm:$0x1] %v1300_v19  ;;  %v1120_v47 = vsel %vm8384_vm14, %v1112_v5, %v1119_v25  ;;  %v1293_v30 = vsel %vm8248_vm3, %v1121_v6, %v1292_v10  ;;  %v1539_v31 = vor.u32 %v1538_v24, %v1534_v53  ;;  %v1547_v32 = vshrl.u32 %v8628_v23, 16 }
 0x15f   : > { %1291 = vst.msk [vmem:[#allocation2 + $0xb8] sm:$0xf] %vm647_vm6, %v1120_v47  ;;  %1294 = vst [vmem:[#allocation2 + $0xbc] sm:$0x1] %v1293_v30  ;;  %v1530_v33 = vrot.slane %v1529_v27, 4  ;;  %v1544_v36 = vrot.slane %v1542_v28, 5 }
 0x160   : > { %v1550_v37 = vshll.u32 %v8628_v23, 16  ;;  %v1556_v58 = vshll.u32 %v8630_v26, 16  ;;  %v1540_v38 = vrot.slane %v1539_v31, 4  ;;  %v1549_v35 = vrot.slane %v1547_v32, 4  ;;  %v8668_v41 = vld [vmem:[#allocation2 + $0x84] sm:$0xf] }
 0x161   : > { %v1560_v39 = vshrl.u32 %v8630_v26, 16  ;;  %v1566_v40 = vshll.u32 %v1343_v29, 16  ;;  %v1535_v43 = vsel %vm8309_vm10, %v1530_v33, %v1534_v53  ;;  %v1571_v52 = vshrl.u32 %v8642_v34, 16  ;;  %v8673_v30 = vld [vmem:[#allocation2 + $0x88] sm:$0xf] }
 0x162   : > { %v1552_v44 = vrot.slane %v1550_v37, 5  ;;  %v1558_v46 = vrot.slane %v1556_v58, 5  ;;  %v1545_v55 = vsel %vm8309_vm10, %v1540_v38, %v1544_v36  ;;  %v1574_v57 = vshll.u32 %v8642_v34, 16 }
 0x163   : > { %v1562_v56 = vrot.slane %v1560_v39, 4  ;;  %v1568_v61 = vrot.slane %v1566_v40, 5  ;;  %v6588_v62 = vcombine.low %v1535_v43, %v1545_v55  ;;  %v1573_v59 = vrot.slane %v1571_v52, 4 }
 0x164   : > { %v1553_v63 = vor.u32 %v1552_v44, %v1549_v35  ;;  %v1580_v2 = vshll.u32 %v8648_v1, 16  ;;  %v1576_v7 = vrot.slane %v1574_v57, 5  ;;  %v1584_v8 = vshrl.u32 %v8648_v1, 16  ;;  %v1346_v35 = vld [vmem:[#allocation2 + $0x8c] sm:$0x1] }
 0x165   : > { %v1563_v5 = vor.u32 %v1562_v56, %v1558_v46  ;;  %v1590_v3 = vshll.u32 %v1344_v48, 16  ;;  %7278 = vmatmul.mubr.msk.bf16.gmra.mrb[44].mxu0 %vm1791_vm11, %v6588_v62  ;;  %v1595_v11 = vshrl.u32 %v8650_v42, 16  ;;  %v1598_v13 = vshll.u32 %v8650_v42, 16  ;;  %v7940_v19 = vld [vmem:[#allocation2 + $0xc0] sm:$0xff]   ;;  %v8683_v48 = vld [vmem:[#allocation2 + $0x90] sm:$0xf] }
 0x166   : > { %v1554_v12 = vrot.slane %v1553_v63, 4  ;;  %v1582_v54 = vrot.slane %v1580_v2, 5  ;;  %v1577_v16 = vor.u32 %v1576_v7, %v1573_v59  ;;  %v1586_v4 = vrot.slane %v1584_v8, 4  ;;  %v7939_v18 = vld [vmem:[#allocation2 + $0xb4] sm:$0xff]  }
 0x167   : > { %v1564_v14 = vrot.slane %v1563_v5, 4  ;;  %v1592_v10 = vrot.slane %v1590_v3, 5  ;;  %v1597_v6 = vrot.slane %v1595_v11, 4  ;;  %v1600_v53 = vrot.slane %v1598_v13, 5  ;;  %7395 = vmatprep.mubr.msk.bf16.mxu1 %vm1791_vm11, %v7939_v18  ;;  %v8688_v57 = vld [vmem:[#allocation2 + $0x94] sm:$0xf] }
 0x168   : > { %v1559_v25 = vsel %vm8309_vm10, %v1554_v12, %v1558_v46  ;;  %v1604_v24 = vshll.u32 %v8659_v0, 16  ;;  %v1578_v28 = vrot.slane %v1577_v16, 4  ;;  %v1587_v29 = vor.u32 %v1586_v4, %v1582_v54  ;;  %7396 = vmatmul.mubr.msk.bf16.gmra.mrb[12].mxu1 %vm1791_vm11, %v7940_v19  ;;  %v1347_v3 = vld [vmem:[#allocation2 + $0x98] sm:$0x1] }
 0x169   : > { %v1569_v27 = vsel %vm8309_vm10, %v1564_v14, %v1568_v61  ;;  %v1608_v47 = vshrl.u32 %v8659_v0, 16  ;;  %v1601_v32 = vor.u32 %v1600_v53, %v1597_v6  ;;  %v1614_v36 = vshll.u32 %v1345_v9, 16  ;;  %v8697_v14 = vld [vmem:[#allocation2 + $0x9c] sm:$0xf] }
 0x16a   : > { %v6589_v31 = vcombine.low %v1559_v25, %v1569_v27  ;;  %v1606_v33 = vrot.slane %v1604_v24, 5  ;;  %v1583_v37 = vsel %vm8309_vm10, %v1578_v28, %v1582_v54  ;;  %v1588_v58 = vrot.slane %v1587_v29, 4  ;;  %v8701_v25 = vld [vmem:[#allocation2 + $0xa0] sm:$0xf] }
 0x16b   : > { %v1610_v38 = vrot.slane %v1608_v47, 4  ;;  %v1619_v39 = vshrl.u32 %v8668_v41, 16  ;;  %v1602_v40 = vrot.slane %v1601_v32, 4  ;;  %v1616_v43 = vrot.slane %v1614_v36, 5  ;;  %v1348_v36 = vld [vmem:[#allocation2 + $0xa4] sm:$0x1] }
 0x16c   : > { %7281 = vmatprep.mubr.msk.bf16.mxu0 %vm1791_vm11, %v6589_v31  ;;  %v1622_v44 = vshll.u32 %v8668_v41, 16  ;;  %v1628_v46 = vshll.u32 %v8673_v30, 16  ;;  %v1593_v52 = vsel %vm8309_vm10, %v1588_v58, %v1592_v10  ;;  %v1632_v61 = vshrl.u32 %v8673_v30, 16  ;;  %v8704_v31 = vld [vmem:[#allocation2 + $0xa8] sm:$0xf] }
 0x16d   : > { %v1611_v55 = vor.u32 %v1610_v38, %v1606_v33  ;;  %v1621_v56 = vrot.slane %v1619_v39, 4  ;;  %v6590_v62 = vcombine.low %v1583_v37, %v1593_v52  ;;  %v1607_v63 = vsel %vm8309_vm10, %v1602_v40, %v1606_v33 }
 0x16e   : > { %v1624_v59 = vrot.slane %v1622_v44, 5  ;;  %v1630_v2 = vrot.slane %v1628_v46, 5  ;;  %v1634_v7 = vrot.slane %v1632_v61, 4  ;;  %v1638_v8 = vshll.u32 %v1346_v35, 16  ;;  %v3114_v61 = vld [vmem:[#allocation2 + $0xc] sm:$0xf] }
 0x16f   : > { %v1612_v5 = vrot.slane %v1611_v55, 4  ;;  %v1643_v9 = vshrl.u32 %v8683_v48, 16  ;;  %7282 = vmatmul.mubr.msk.bf16.gmra.mrb[48].mxu0 %vm1791_vm11, %v6590_v62  ;;  %v1646_v54 = vshll.u32 %v8683_v48, 16  ;;  %v1652_v11 = vshll.u32 %v8688_v57, 16 }
 0x170   : > { %v1625_v12 = vor.u32 %v1624_v59, %v1621_v56  ;;  %v1656_v13 = vshrl.u32 %v8688_v57, 16  ;;  %v1635_v4 = vor.u32 %v1634_v7, %v1630_v2  ;;  %v1640_v10 = vrot.slane %v1638_v8, 5  ;;  %v1349_v56 = vld [vmem:[#allocation2 + $0xb0] sm:$0x1] }
 0x171   : > { %v1617_v16 = vsel %vm8309_vm10, %v1612_v5, %v1616_v43  ;;  %v1645_v18 = vrot.slane %v1643_v9, 4  ;;  %v1648_v24 = vrot.slane %v1646_v54, 5  ;;  %v1654_v19 = vrot.slane %v1652_v11, 5  ;;  %v8713_v43 = vld [vmem:[#allocation2 + $0xac] sm:$0xf] }
 0x172   : > { %v6591_v6 = vcombine.low %v1607_v63, %v1617_v16  ;;  %v1626_v53 = vrot.slane %v1625_v12, 4  ;;  %v1636_v27 = vrot.slane %v1635_v4, 4  ;;  %v1658_v28 = vrot.slane %v1656_v13, 4  ;;  %v8717_v5 = vld [vmem:[#allocation2 + $0x10] sm:$0xf] }
 0x173   : > { %v1662_v29 = vshll.u32 %v1347_v3, 16  ;;  %v1667_v47 = vshrl.u32 %v8697_v14, 16  ;;  %v1649_v33 = vor.u32 %v1648_v24, %v1645_v18  ;;  %v1670_v37 = vshll.u32 %v8697_v14, 16 }
 0x174   : > { %7285 = vmatprep.mubr.msk.bf16.mxu0 %vm1791_vm11, %v6591_v6  ;;  %v1631_v32 = vsel %vm8309_vm10, %v1626_v53, %v1630_v2  ;;  %v1676_v58 = vshll.u32 %v8701_v25, 16  ;;  %v1641_v38 = vsel %vm8309_vm10, %v1636_v27, %v1640_v10  ;;  %v1659_v35 = vor.u32 %v1658_v28, %v1654_v19  ;;  %v8726_v6 = vld [vmem:[#allocation2 + $0x14] sm:$0x1]  ;;  %v8732_v28 = vld [vmem:[%s10172_s3 + $0x8] ss:$0 sps:$4 sm:$0xcc]  }
 0x175   : > { %v1664_v39 = vrot.slane %v1662_v29, 5  ;;  %v1669_v40 = vrot.slane %v1667_v47, 4  ;;  %v6592_v44 = vcombine.low %v1631_v32, %v1641_v38  ;;  %v1650_v46 = vrot.slane %v1649_v33, 4 }
 0x176   : > { %v1672_v52 = vrot.slane %v1670_v37, 5  ;;  %v1678_v55 = vrot.slane %v1676_v58, 5  ;;  %v1660_v62 = vrot.slane %v1659_v35, 4  ;;  %v1680_v63 = vshrl.u32 %v8701_v25, 16 }
 0x177   : > { %v1686_v59 = vshll.u32 %v1348_v36, 16  ;;  %v1691_v2 = vshrl.u32 %v8704_v31, 16  ;;  %7286 = vmatmul.mubr.msk.bf16.gmra.mrb[52].mxu0 %vm1791_vm11, %v6592_v44  ;;  %v1655_v7 = vsel %vm8309_vm10, %v1650_v46, %v1654_v19  ;;  %v1694_v3 = vshll.u32 %v8704_v31, 16  ;;  %v8738_v36 = vld [vmem:[#allocation2 + $0xb4] sm:$0xf] }
 0x178   : > { %v1673_v8 = vor.u32 %v1672_v52, %v1669_v40  ;;  %v1700_v9 = vshll.u32 %v8713_v43, 16  ;;  %v1665_v12 = vsel %vm8309_vm10, %v1660_v62, %v1664_v39  ;;  %v1682_v54 = vrot.slane %v1680_v63, 4  ;;  %v8740_v39 = vld [vmem:[#allocation2 + $0xb8] sm:$0xf] }
 0x179   : > { %v1688_v11 = vrot.slane %v1686_v59, 5  ;;  %v1693_v13 = vrot.slane %v1691_v2, 4  ;;  %v6593_v16 = vcombine.low %v1655_v7, %v1665_v12  ;;  %v1696_v10 = vrot.slane %v1694_v3, 5 }
 0x17a   : > { %v1674_v4 = vrot.slane %v1673_v8, 4  ;;  %v1702_v18 = vrot.slane %v1700_v9, 5  ;;  %v1683_v53 = vor.u32 %v1682_v54, %v1678_v55  ;;  %v1704_v24 = vshrl.u32 %v8713_v43, 16 }
 0x17b   : > { %v1710_v19 = vshll.u32 %v1349_v56, 16  ;;  %v3163_v27 = vshrl.u32 %v3114_v61, 16  ;;  %7289 = vmatprep.mubr.msk.bf16.mxu0 %vm1791_vm11, %v6593_v16  ;;  %v1697_v47 = vor.u32 %v1696_v10, %v1693_v13  ;;  %v3166_v32 = vshll.u32 %v3114_v61, 16  ;;  %v1350_v56 = vld [vmem:[#allocation2 + $0xbc] sm:$0x1] }
 0x17c   : > { %v1679_v29 = vsel %vm8309_vm10, %v1674_v4, %v1678_v55  ;;  %v3172_v33 = vshll.u32 %v8717_v5, 16  ;;  %v1684_v37 = vrot.slane %v1683_v53, 4  ;;  %v1706_v58 = vrot.slane %v1704_v24, 4  ;;  %v3117_v10 = vld [vmem:[#allocation2 + $0x18] sm:$0xf] }
 0x17d   : > { %v1712_v38 = vrot.slane %v1710_v19, 5  ;;  %v3165_v35 = vrot.slane %v3163_v27, 4  ;;  %v1698_v40 = vrot.slane %v1697_v47, 4  ;;  %v3168_v44 = vrot.slane %v3166_v32, 5  ;;  %v8757_v27 = vld [vmem:[#allocation2 + $0x1c] sm:$0xf] }
 0x17e   : > { %v3174_v46 = vrot.slane %v3172_v33, 5  ;;  %v3176_v52 = vshrl.u32 %v8717_v5, 16  ;;  %v1689_v55 = vsel %vm8309_vm10, %v1684_v37, %v1688_v11  ;;  %v1707_v61 = vor.u32 %v1706_v58, %v1702_v18  ;;  %v8761_v33 = vld [vmem:[#allocation2 + $0x20] sm:$0x1] }
 0x17f   : > { %v3182_v62 = vshll.u32 %v8726_v6, 16  ;;  %v4067_v63 = vrot.slane %v8732_v28, 2  ;;  %v6594_v59 = vcombine.low %v1679_v29, %v1689_v55  ;;  %v1703_v2 = vsel %vm8309_vm10, %v1698_v40, %v1702_v18 }
 0x180   : > { %v3169_v7 = vor.u32 %v3168_v44, %v3165_v35  ;;  %v3178_v8 = vrot.slane %v3176_v52, 4  ;;  %v1708_v3 = vrot.slane %v1707_v61, 4  ;;  %v1715_v12 = vshrl.u32 %v8738_v36, 16  ;;  %v3120_v44 = vld [vmem:[#allocation2 + $0x24] sm:$0xf] }
 0x181   : > { %v3184_v9 = vrot.slane %v3182_v62, 5  ;;  %7867 = vmatprep.subr.msk.bf16.mxu1 %vm1840_vm7, %v4067_v63  ;;  %v1718_v54 = vshll.u32 %v8738_v36, 16  ;;  %7290 = vmatmul.mubr.msk.bf16.gmra.mrb[56].mxu0 %vm1791_vm11, %v6594_v59  ;;  %v1724_v16 = vshll.u32 %v8740_v39, 16  ;;  %v1728_v4 = vshrl.u32 %v8740_v39, 16 }
 0x182   : > { %v3170_v11 = vrot.slane %v3169_v7, 4  ;;  %v3179_v13 = vor.u32 %v3178_v8, %v3174_v46  ;;  %v1713_v18 = vsel %vm8309_vm10, %v1708_v3, %v1712_v38  ;;  %v1717_v53 = vrot.slane %v1715_v12, 4  ;;  %v8769_v12 = vld [vmem:[#allocation2 + $0x28] sm:$0xf] }
 0x183   : > { %v1720_v24 = vrot.slane %v1718_v54, 5  ;;  %v1734_v19 = vshll.u32 %v1350_v56, 16  ;;  %v6595_v28 = vcombine.low %v1703_v2, %v1713_v18  ;;  %v1726_v32 = vrot.slane %v1724_v16, 5  ;;  %v8775_v18 = vld [vmem:[#allocation2 + $0x2c] sm:$0x1] }
 0x184   : > { %v3175_v29 = vsel %vm8309_vm10, %v3170_v11, %v3174_v46  ;;  %v3180_v47 = vrot.slane %v3179_v13, 4  ;;  %v1730_v58 = vrot.slane %v1728_v4, 4  ;;  %v3187_v40 = vshrl.u32 %v3117_v10, 16 }
 0x185   : > { %v1721_v37 = vor.u32 %v1720_v24, %v1717_v53  ;;  %v1736_v35 = vrot.slane %v1734_v19, 5  ;;  %7293 = vmatprep.mubr.msk.bf16.mxu0 %vm1791_vm11, %v6595_v28  ;;  %v3190_v52 = vshll.u32 %v3117_v10, 16  ;;  %v3196_v56 = vshll.u32 %v8757_v27, 16 }
 0x186   : > { %v3185_v38 = vsel %vm8309_vm10, %v3180_v47, %v3184_v9  ;;  %v3200_v55 = vshrl.u32 %v8757_v27, 16  ;;  %v1731_v62 = vor.u32 %v1730_v58, %v1726_v32  ;;  %v3189_v59 = vrot.slane %v3187_v40, 4  ;;  %v3123_v47 = vld [vmem:[#allocation2 + $0x30] sm:$0xf] }
 0x187   : > { %v6727_v46 = vcombine.low %v3175_v29, %v3185_v38  ;;  %v1722_v61 = vrot.slane %v1721_v37, 4  ;;  %v3192_v2 = vrot.slane %v3190_v52, 5  ;;  %v3198_v7 = vrot.slane %v3196_v56, 5  ;;  %v8783_v38 = vld [vmem:[#allocation2 + $0x38] sm:$0x1] }
 0x188   : > { %v3202_v8 = vrot.slane %v3200_v55, 4  ;;  %v3206_v3 = vshll.u32 %v8761_v33, 16  ;;  %v1732_v54 = vrot.slane %v1731_v62, 4  ;;  %v4117_v11 = vsel %vm1840_vm7, %v4067_v63, 0 }
 0x189   : > { %7401 = vmatprep.mubr.msk.bf16.mxu1 %vm1791_vm11, %v6727_v46  ;;  %v1727_v9 = vsel %vm8309_vm10, %v1722_v61, %v1726_v32  ;;  %v3211_v13 = vshrl.u32 %v3120_v44, 16  ;;  %v3193_v16 = vor.u32 %v3192_v2, %v3189_v59  ;;  %v3214_v53 = vshll.u32 %v3120_v44, 16  ;;  %v8781_v32 = vld [vmem:[#allocation2 + $0x34] sm:$0xf]  ;;  %v8793_v46 = vld [vmem:[%s10172_s3 + $0x4] sm:$0x3] }
 0x18a   : > { %v3203_v4 = vor.u32 %v3202_v8, %v3198_v7  ;;  %v3208_v10 = vrot.slane %v3206_v3, 5  ;;  %v1737_v24 = vsel %vm8309_vm10, %v1732_v54, %v1736_v35  ;;  %v3220_v28 = vshll.u32 %v8769_v12, 16  ;;  %v7993_v35 = vld [vmem:[%s10172_s3] sm:$0x3]  ;;  %v8800_v8 = vld [vmem:[#allocation2 + $0x4] sm:$0xf] }
 0x18b   : > { %v3213_v19 = vrot.slane %v3211_v13, 4  ;;  %v3224_v29 = vshrl.u32 %v8769_v12, 16  ;;  %v6596_v37 = vcombine.low %v1727_v9, %v1737_v24  ;;  %v3194_v63 = vrot.slane %v3193_v16, 4  ;;  %v7994_v2 = vld [vmem:[#allocation2] sm:$0xf] }
 0x18c   : > { %v3204_v58 = vrot.slane %v3203_v4, 4  ;;  %v3216_v40 = vrot.slane %v3214_v53, 5  ;;  %v3222_v52 = vrot.slane %v3220_v28, 5  ;;  %v3230_v44 = vshll.u32 %v8775_v18, 16  ;;  %v7996_v16 = vld [vmem:[#allocation2 + $0xc] sm:$0xf] }
 0x18d   : > { %v3226_v56 = vrot.slane %v3224_v29, 4  ;;  %v2134_v55 = vsel %vm1840_vm7, %v7993_v35, 0  ;;  %7294 = vmatmul.mubr.msk.bf16.gmra.mrb[60].mxu0 %vm1791_vm11, %v6596_v37  ;;  %v3199_v61 = vsel %vm8309_vm10, %v3194_v63, %v3198_v7  ;;  %v6614_v3 = vcombine.low %v7994_v2, %v8800_v8  ;;  %v8803_v4 = vld [vmem:[#allocation2 + $0x10] sm:$0xf]  ;;  %v3126_v24 = vld [vmem:[#allocation2 + $0x3c] sm:$0xf] }
 0x18e   : > { %v3209_v62 = vsel %vm8309_vm10, %v3204_v58, %v3208_v10  ;;  %v3217_v59 = vor.u32 %v3216_v40, %v3213_v19  ;;  %v3232_v13 = vrot.slane %v3230_v44, 5  ;;  %7298 = vmatpush3.bf16.msra.mxu0 %v2134_v55  ;;  %v6615_v53 = vcombine.low %v7996_v16, %v8803_v4  ;;  %v8811_v29 = vld [vmem:[%s10172_s3 + $0xc] sm:$0x3]  ;;  %v7998_v40 = vld [vmem:[#allocation2 + $0x18] sm:$0xf] }
 0x18f   : > { %v6728_v9 = vcombine.low %v3199_v61, %v3209_v62  ;;  %v3227_v54 = vor.u32 %v3226_v56, %v3222_v52  ;;  %7299 = vmatprep.mubr.msk.bf16.mxu0 %vm1791_vm11, %v6614_v3  ;;  %v3235_v10 = vshrl.u32 %v3123_v47, 16  ;;  %v3238_v19 = vshll.u32 %v3123_v47, 16  ;;  %7863 = vmatprep.subr.msk.bf16.mxu0 %vm1840_vm7, %v8793_v46  ;;  %v8818_v56 = vld [vmem:[#allocation2 + $0x1c] sm:$0xf]  ;;  %v8821_v44 = vld [vmem:[#allocation2 + $0x40] sm:$0xf] }
 0x190   : > { %v3218_v7 = vrot.slane %v3217_v59, 4  ;;  %v3244_v28 = vshll.u32 %v8781_v32, 16  ;;  %v3248_v63 = vshrl.u32 %v8781_v32, 16  ;;  %v3254_v58 = vshll.u32 %v8783_v38, 16  ;;  %10217 = vst [vmem:[#allocation9_spill] sm:$0xff] %v8821_v44 }
 0x191   : > { %7402 = vmatmul.mubr.msk.bf16.vlgmr.msra.gmra.mrb[16].mxu1 %vm1791_vm11, %v6728_v9  ;;  %v3228_v37 = vrot.slane %v3227_v54, 4  ;;  %v6616_v47 = vcombine.low %v7998_v40, %v8818_v56  ;;  %v3237_v55 = vrot.slane %v3235_v10, 4  ;;  %v3240_v61 = vrot.slane %v3238_v19, 5  ;;  %v8825_v59 = vld [vmem:[#allocation2 + $0x44] sm:$0x1] }
 0x192   : > { %7434 = vmatpush3.bf16.msra.mxu1 %v4117_v11  ;;  %v3223_v35 = vsel %vm8309_vm10, %v3218_v7, %v3222_v52  ;;  %v3246_v62 = vrot.slane %v3244_v28, 5  ;;  %10218 = vst [vmem:[#allocation10_spill] sm:$0xff] %v8825_v59  ;;  %v3250_v3 = vrot.slane %v3248_v63, 4  ;;  %v3256_v9 = vrot.slane %v3254_v58, 5  ;;  %v3129_v52 = vld [vmem:[#allocation2 + $0x48] sm:$0xf] }
 0x193   : > { %v3233_v2 = vsel %vm8309_vm10, %v3228_v37, %v3232_v13  ;;  %v3259_v54 = vshrl.u32 %v3126_v24, 16  ;;  %7868 = vmatprep.subr.msk.bf16.mxu1 %vm1840_vm7, %v8811_v29  ;;  %v3241_v40 = vor.u32 %v3240_v61, %v3237_v55  ;;  %v3262_v11 = vshll.u32 %v3126_v24, 16  ;;  %v8000_v58 = vld [vmem:[#allocation2 + $0x24] sm:$0xf]  ;;  %v8838_v24 = vld [vmem:[#allocation2 + $0x28] sm:$0xf] }
 0x194   : > { %v6729_v16 = vcombine.low %v3223_v35, %v3233_v2  ;;  %v3268_v22 = vshll.u32 %v8821_v44, 16  ;;  %v3251_v7 = vor.u32 %v3250_v3, %v3246_v62  ;;  %v3272_v19 = vshrl.u32 %v8821_v44, 16  ;;  %10219 = vst [vmem:[#allocation11_spill] sm:$0xff] %v8838_v24  ;;  %v8850_v44 = vld [vmem:[#allocation2 + $0x58] sm:$0xf] }
 0x195   : > { %v3261_v10 = vrot.slane %v3259_v54, 4  ;;  %v3278_v28 = vshll.u32 %v8825_v59, 16  ;;  %7300 = vmatmul.mubr.msk.bf16.vlgmr.msra.gmra.mrb[32].mxu0 %vm1791_vm11, %v6615_v53  ;;  %v3242_v13 = vrot.slane %v3241_v40, 4  ;;  %v3264_v37 = vrot.slane %v3262_v11, 5 }
 0x196   : > { %7405 = vmatprep.mubr.msk.bf16.mxu1 %vm1791_vm11, %v6729_v16  ;;  %v3270_v63 = vrot.slane %v3268_v22, 5  ;;  %v6617_v35 = vcombine.low %v8000_v58, %v8838_v24  ;;  %v3252_v55 = vrot.slane %v3251_v7, 4  ;;  %7303 = vmatprep.mubr.msk.bf16.mxu0 %vm1791_vm11, %v6616_v47  ;;  %v3274_v61 = vrot.slane %v3272_v19, 4  ;;  %v3132_v47 = vld [vmem:[#allocation2 + $0x54] sm:$0xf] }
 0x197   : > { %v3280_v2 = vrot.slane %v3278_v28, 5  ;;  %v3283_v3 = vshrl.u32 %v3129_v52, 16  ;;  %v3247_v54 = vsel %vm8309_vm10, %v3242_v13, %v3246_v62  ;;  %v3265_v16 = vor.u32 %v3264_v37, %v3261_v10  ;;  %v8002_v13 = vld [vmem:[#allocation2 + $0x30] sm:$0xf]  ;;  %v8853_v37 = vld [vmem:[#allocation2 + $0x34] sm:$0xf] }
 0x198   : > { %v3286_v53 = vshll.u32 %v3129_v52, 16  ;;  %v3292_v22 = vshll.u32 %v8834_v17, 16  ;;  %v3257_v40 = vsel %vm8309_vm10, %v3252_v55, %v3256_v9  ;;  %v3275_v11 = vor.u32 %v3274_v61, %v3270_v63  ;;  %10221 = vst [vmem:[#allocation13_spill] sm:$0xff] %v8853_v37 }
 0x199   : > { %v3285_v58 = vrot.slane %v3283_v3, 4  ;;  %v3296_v7 = vshrl.u32 %v8834_v17, 16  ;;  %v6730_v19 = vcombine.low %v3247_v54, %v3257_v40  ;;  %v3266_v28 = vrot.slane %v3265_v16, 4  ;;  %v8859_v3 = vld [vmem:[#allocation2 + $0x5c] sm:$0x1] }
 0x19a   : > { %v3288_v24 = vrot.slane %v3286_v53, 5  ;;  %v3294_v59 = vrot.slane %v3292_v22, 5  ;;  %v3276_v62 = vrot.slane %v3275_v11, 4  ;;  %v3302_v52 = vshll.u32 %v8844_v49, 16  ;;  %10222 = vst [vmem:[#allocation14_spill] sm:$0xff] %v8859_v3 }
 0x19b   : > { %v3298_v10 = vrot.slane %v3296_v7, 4  ;;  %v6618_v9 = vcombine.low %v8002_v13, %v8853_v37  ;;  %7406 = vmatmul.mubr.msk.bf16.gmra.mrb[20].mxu1 %vm1791_vm11, %v6730_v19  ;;  %v3271_v55 = vsel %vm8309_vm10, %v3266_v28, %v3270_v63  ;;  %v3307_v54 = vshrl.u32 %v3132_v47, 16  ;;  %v3135_v7 = vld [vmem:[#allocation2 + $0x60] sm:$0xf] }
 0x19c   : > { %v3289_v61 = vor.u32 %v3288_v24, %v3285_v58  ;;  %v3310_v16 = vshll.u32 %v3132_v47, 16  ;;  %v3281_v53 = vsel %vm8309_vm10, %v3276_v62, %v3280_v2  ;;  %v3304_v40 = vrot.slane %v3302_v52, 5  ;;  %v8868_v2 = vld [vmem:[#allocation2 + $0x64] sm:$0xf]  ;;  %v8874_v52 = vld [vmem:[#allocation2 + $0x68] sm:$0x1] }
 0x19d   : > { %v3299_v22 = vor.u32 %v3298_v10, %v3294_v59  ;;  %v3316_v11 = vshll.u32 %v8850_v44, 16  ;;  %v6731_v49 = vcombine.low %v3271_v55, %v3281_v53  ;;  %7304 = vmatmul.mubr.msk.bf16.gmra.mrb[36].mxu0 %vm1791_vm11, %v6617_v35  ;;  %v3309_v13 = vrot.slane %v3307_v54, 4  ;;  %v8004_v35 = vld [vmem:[#allocation2 + $0x3c] sm:$0xf]  ;;  %v3138_v53 = vld [vmem:[#allocation2 + $0x6c] sm:$0xf] }
 0x19e   : > { %v3290_v19 = vrot.slane %v3289_v61, 4  ;;  %v3312_v37 = vrot.slane %v3310_v16, 5  ;;  %7307 = vmatprep.mubr.msk.bf16.mxu0 %vm1791_vm11, %v6618_v9  ;;  %v3320_v58 = vshrl.u32 %v8850_v44, 16  ;;  %v3326_v47 = vshll.u32 %v8859_v3, 16 }
 0x19f   : > { %v3300_v63 = vrot.slane %v3299_v22, 4  ;;  %v3318_v24 = vrot.slane %v3316_v11, 5  ;;  %7409 = vmatprep.mubr.msk.bf16.mxu1 %vm1791_vm11, %v6731_v49  ;;  %v6619_v10 = vcombine.low %v8004_v35, %v8568_v21  ;;  %v3331_v55 = vshrl.u32 %v3135_v7, 16 }
 0x1a0   : > { %v3295_v28 = vsel %vm8309_vm10, %v3290_v19, %v3294_v59  ;;  %v3313_v62 = vor.u32 %v3312_v37, %v3309_v13  ;;  %v3322_v61 = vrot.slane %v3320_v58, 4  ;;  %v3328_v54 = vrot.slane %v3326_v47, 5  ;;  %v8881_v13 = vld [vmem:[#allocation2 + $0x70] sm:$0xf]  ;;  %v8888_v58 = vld [vmem:[#allocation2 + $0x74] sm:$0x1] }
 0x1a1   : > { %v3305_v9 = vsel %vm8309_vm10, %v3300_v63, %v3304_v40  ;;  %v3334_v16 = vshll.u32 %v3135_v7, 16  ;;  %v3333_v49 = vrot.slane %v3331_v55, 4  ;;  %v3340_v3 = vshll.u32 %v8868_v2, 16  ;;  %10223 = vst [vmem:[#allocation15_spill] sm:$0xff] %v8888_v58 }
 0x1a2   : > { %v6732_v22 = vcombine.low %v3295_v28, %v3305_v9  ;;  %v3314_v11 = vrot.slane %v3313_v62, 4  ;;  %v3323_v59 = vor.u32 %v3322_v61, %v3318_v24  ;;  %v3344_v19 = vshrl.u32 %v8868_v2, 16 }
 0x1a3   : > { %v3336_v37 = vrot.slane %v3334_v16, 5  ;;  %v3350_v21 = vshll.u32 %v8874_v52, 16  ;;  %v3342_v7 = vrot.slane %v3340_v3, 5  ;;  %v6620_v63 = vcombine.low %v8579_v50, %v8581_v51 }
 0x1a4   : > { %7410 = vmatmul.mubr.msk.bf16.gmra.mrb[24].mxu1 %vm1791_vm11, %v6732_v22  ;;  %v3319_v40 = vsel %vm8309_vm10, %v3314_v11, %v3318_v24  ;;  %v3355_v47 = vshrl.u32 %v3138_v53, 16  ;;  %v3324_v28 = vrot.slane %v3323_v59, 4  ;;  %v3346_v35 = vrot.slane %v3344_v19, 4  ;;  %v3141_v11 = vld [vmem:[#allocation2 + $0x78] sm:$0xf] }
 0x1a5   : > { %v3337_v62 = vor.u32 %v3336_v37, %v3333_v49  ;;  %v3352_v55 = vrot.slane %v3350_v21, 5  ;;  %7308 = vmatmul.mubr.msk.bf16.gmra.mrb[40].mxu0 %vm1791_vm11, %v6619_v10  ;;  %v3358_v61 = vshll.u32 %v3138_v53, 16  ;;  %v3364_v16 = vshll.u32 %v8881_v13, 16  ;;  %v8897_v49 = vld [vmem:[#allocation2 + $0x7c] sm:$0xf] }
 0x1a6   : > { %v3357_v9 = vrot.slane %v3355_v47, 4  ;;  %v3368_v22 = vshrl.u32 %v8881_v13, 16  ;;  %v3329_v3 = vsel %vm8309_vm10, %v3324_v28, %v3328_v54  ;;  %v3347_v50 = vor.u32 %v3346_v35, %v3342_v7  ;;  %7311 = vmatprep.mubr.msk.bf16.mxu0 %vm1791_vm11, %v6620_v63  ;;  %v8899_v19 = vld [vmem:[#allocation2 + $0x80] sm:$0x1] }
 0x1a7   : > { %v3338_v24 = vrot.slane %v3337_v62, 4  ;;  %v3374_v51 = vshll.u32 %v8888_v58, 16  ;;  %v6733_v59 = vcombine.low %v3319_v40, %v3329_v3  ;;  %v3360_v10 = vrot.slane %v3358_v61, 5 }
 0x1a8   : > { %v3366_v37 = vrot.slane %v3364_v16, 5  ;;  %v3370_v53 = vrot.slane %v3368_v22, 4  ;;  %v3348_v47 = vrot.slane %v3347_v50, 4  ;;  %v6621_v28 = vcombine.low %v8604_v20, %v8616_v60  ;;  %v3144_v22 = vld [vmem:[#allocation2 + $0x84] sm:$0xf] }
 0x1a9   : > { %v3343_v21 = vsel %vm8309_vm10, %v3338_v24, %v3342_v7  ;;  %v3376_v54 = vrot.slane %v3374_v51, 5  ;;  %7413 = vmatprep.mubr.msk.bf16.mxu1 %vm1791_vm11, %v6733_v59  ;;  %v3361_v63 = vor.u32 %v3360_v10, %v3357_v9  ;;  %v3379_v35 = vshrl.u32 %v3141_v11, 16  ;;  %v8911_v60 = vld [vmem:[#allocation2 + $0x88] sm:$0xf]  ;;  %v8913_v10 = vld [vmem:[#allocation2 + $0x8c] sm:$0x1] }
 0x1aa   : > { %v3371_v62 = vor.u32 %v3370_v53, %v3366_v37  ;;  %v3382_v58 = vshll.u32 %v3141_v11, 16  ;;  %v3353_v40 = vsel %vm8309_vm10, %v3348_v47, %v3352_v55  ;;  %v3388_v61 = vshll.u32 %v8897_v49, 16 }
 0x1ab   : > { %v3392_v16 = vshrl.u32 %v8897_v49, 16  ;;  %v3398_v7 = vshll.u32 %v8899_v19, 16  ;;  %v6734_v3 = vcombine.low %v3343_v21, %v3353_v40  ;;  %v3362_v24 = vrot.slane %v3361_v63, 4  ;;  %v3147_v40 = vld [vmem:[#allocation2 + $0x90] sm:$0xf] }
 0x1ac   : > { %v3372_v50 = vrot.slane %v3371_v62, 4  ;;  %v3381_v20 = vrot.slane %v3379_v35, 4  ;;  %v3384_v9 = vrot.slane %v3382_v58, 5  ;;  %v3390_v51 = vrot.slane %v3388_v61, 5 }
 0x1ad   : > { %v3394_v59 = vrot.slane %v3392_v16, 4  ;;  %v3400_v11 = vrot.slane %v3398_v7, 5  ;;  %7414 = vmatmul.mubr.msk.bf16.gmra.mrb[28].mxu1 %vm1791_vm11, %v6734_v3  ;;  %v3367_v55 = vsel %vm8309_vm10, %v3362_v24, %v3366_v37  ;;  %7312 = vmatmul.mubr.msk.bf16.gmra.mrb[44].mxu0 %vm1791_vm11, %v6621_v28  ;;  %v6622_v21 = vcombine.low %v8628_v23, %v8630_v26  ;;  %v8930_v3 = vld [vmem:[#allocation2 + $0x94] sm:$0xf] }
 0x1ae   : > { %v3377_v53 = vsel %vm8309_vm10, %v3372_v50, %v3376_v54  ;;  %v3403_v47 = vshrl.u32 %v3144_v22, 16  ;;  %v3385_v63 = vor.u32 %v3384_v9, %v3381_v20  ;;  %v3406_v35 = vshll.u32 %v3144_v22, 16  ;;  %v8932_v20 = vld [vmem:[#allocation2 + $0x98] sm:$0x1] }
 0x1af   : > { %v6735_v58 = vcombine.low %v3367_v55, %v3377_v53  ;;  %v3395_v62 = vor.u32 %v3394_v59, %v3390_v51  ;;  %7315 = vmatprep.mubr.msk.bf16.mxu0 %vm1791_vm11, %v6622_v21  ;;  %v3412_v16 = vshll.u32 %v8911_v60, 16  ;;  %v3416_v37 = vshrl.u32 %v8911_v60, 16 }
 0x1b0   : > { %v3405_v61 = vrot.slane %v3403_v47, 4  ;;  %v3422_v54 = vshll.u32 %v8913_v10, 16  ;;  %v3386_v28 = vrot.slane %v3385_v63, 4  ;;  %v3408_v23 = vrot.slane %v3406_v35, 5  ;;  %v3150_v47 = vld [vmem:[#allocation2 + $0x9c] sm:$0xf] }
 0x1b1   : > { %7417 = vmatprep.mubr.msk.bf16.mxu1 %vm1791_vm11, %v6735_v58  ;;  %v3396_v7 = vrot.slane %v3395_v62, 4  ;;  %v6623_v26 = vcombine.low %v8642_v34, %v8648_v1  ;;  %v3414_v22 = vrot.slane %v3412_v16, 5  ;;  %v3418_v24 = vrot.slane %v3416_v37, 4 }
 0x1b2   : > { %v3424_v50 = vrot.slane %v3422_v54, 5  ;;  %v3427_v9 = vshrl.u32 %v3147_v40, 16  ;;  %v3391_v59 = vsel %vm8309_vm10, %v3386_v28, %v3390_v51  ;;  %v3409_v53 = vor.u32 %v3408_v23, %v3405_v61  ;;  %v8941_v54 = vld [vmem:[#allocation2 + $0xa0] sm:$0xf] }
 0x1b3   : > { %v3401_v55 = vsel %vm8309_vm10, %v3396_v7, %v3400_v11  ;;  %v3430_v21 = vshll.u32 %v3147_v40, 16  ;;  %v3419_v63 = vor.u32 %v3418_v24, %v3414_v22  ;;  %v3436_v1 = vshll.u32 %v8930_v3, 16 }
 0x1b4   : > { %v6736_v58 = vcombine.low %v3391_v59, %v3401_v55  ;;  %v3429_v34 = vrot.slane %v3427_v9, 4  ;;  %v3410_v62 = vrot.slane %v3409_v53, 4  ;;  %v3440_v16 = vshrl.u32 %v8930_v3, 16  ;;  %v8949_v9 = vld [vmem:[#allocation2 + $0xa4] sm:$0x1] }
 0x1b5   : > { %v3432_v35 = vrot.slane %v3430_v21, 5  ;;  %v3446_v37 = vshll.u32 %v8932_v20, 16  ;;  %v3420_v51 = vrot.slane %v3419_v63, 4  ;;  %7316 = vmatmul.mubr.msk.bf16.gmra.mrb[48].mxu0 %vm1791_vm11, %v6623_v26  ;;  %v3438_v11 = vrot.slane %v3436_v1, 5  ;;  %v3153_v21 = vld [vmem:[#allocation2 + $0xa8] sm:$0xf] }
 0x1b6   : > { %7418 = vmatmul.mubr.msk.bf16.gmra.mrb[0].mxu1 %vm1791_vm11, %v6736_v58  ;;  %v6624_v40 = vcombine.low %v8650_v42, %v8659_v0  ;;  %v3451_v61 = vshrl.u32 %v3150_v47, 16  ;;  %v3415_v28 = vsel %vm8309_vm10, %v3410_v62, %v3414_v22  ;;  %v3442_v23 = vrot.slane %v3440_v16, 4  ;;  %v8956_v63 = vld [vmem:[#allocation2 + $0xac] sm:$0xf] }
 0x1b7   : > { %v3433_v7 = vor.u32 %v3432_v35, %v3429_v34  ;;  %v3448_v24 = vrot.slane %v3446_v37, 5  ;;  %v3425_v59 = vsel %vm8309_vm10, %v3420_v51, %v3424_v50  ;;  %v3454_v26 = vshll.u32 %v3150_v47, 16 }
 0x1b8   : > { %7319 = vmatprep.mubr.msk.bf16.mxu0 %vm1791_vm11, %v6624_v40  ;;  %v3453_v55 = vrot.slane %v3451_v61, 4  ;;  %v3460_v53 = vshll.u32 %v8941_v54, 16  ;;  %v6737_v42 = vcombine.low %v3415_v28, %v3425_v59  ;;  %v3443_v58 = vor.u32 %v3442_v23, %v3438_v11  ;;  %v8964_v61 = vld [vmem:[#allocation2 + $0xb0] sm:$0x1] }
 0x1b9   : > { %v3434_v0 = vrot.slane %v3433_v7, 4  ;;  %v3464_v22 = vshrl.u32 %v8941_v54, 16  ;;  %v3456_v34 = vrot.slane %v3454_v26, 5  ;;  %v3470_v62 = vshll.u32 %v8949_v9, 16  ;;  %v3156_v26 = vld [vmem:[#allocation2 + $0xb4] sm:$0xf] }
 0x1ba   : > { %v3462_v1 = vrot.slane %v3460_v53, 5  ;;  %v6625_v50 = vcombine.low %v8668_v41, %v8673_v30  ;;  %7421 = vmatprep.mubr.msk.bf16.mxu1 %vm1791_vm11, %v6737_v42  ;;  %v3444_v35 = vrot.slane %v3443_v58, 4  ;;  %v3475_v37 = vshrl.u32 %v3153_v21, 16 }
 0x1bb   : > { %v3439_v47 = vsel %vm8309_vm10, %v3434_v0, %v3438_v11  ;;  %v3466_v16 = vrot.slane %v3464_v22, 4  ;;  %v3457_v51 = vor.u32 %v3456_v34, %v3453_v55  ;;  %v3472_v40 = vrot.slane %v3470_v62, 5  ;;  %v8971_v0 = vld [vmem:[#allocation2 + $0xb8] sm:$0xf] }
 0x1bc   : > { %v3478_v28 = vshll.u32 %v3153_v21, 16  ;;  %v3484_v7 = vshll.u32 %v8956_v63, 16  ;;  %v3449_v23 = vsel %vm8309_vm10, %v3444_v35, %v3448_v24  ;;  %v3477_v41 = vrot.slane %v3475_v37, 4  ;;  %v8982_v37 = vld [vmem:[#allocation2 + $0xbc] sm:$0x1] }
 0x1bd   : > { %v3467_v59 = vor.u32 %v3466_v16, %v3462_v1  ;;  %v3488_v30 = vshrl.u32 %v8956_v63, 16  ;;  %v6738_v53 = vcombine.low %v3439_v47, %v3449_v23  ;;  %v3458_v11 = vrot.slane %v3457_v51, 4  ;;  %7320 = vmatmul.mubr.msk.bf16.gmra.mrb[52].mxu0 %vm1791_vm11, %v6625_v50 }
 0x1be   : > { %v3480_v42 = vrot.slane %v3478_v28, 5  ;;  %v3486_v55 = vrot.slane %v3484_v7, 5  ;;  %v3494_v22 = vshll.u32 %v8964_v61, 16  ;;  %v6626_v24 = vcombine.low %v8683_v48, %v8688_v57  ;;  %v3159_v28 = vld [vmem:[#allocation2 + $0xc0] sm:$0xf] }
 0x1bf   : > { %v3468_v58 = vrot.slane %v3467_v59, 4  ;;  %v3490_v21 = vrot.slane %v3488_v30, 4  ;;  %7422 = vmatmul.mubr.msk.bf16.gmra.mrb[4].mxu1 %vm1791_vm11, %v6738_v53  ;;  %v3499_v62 = vshrl.u32 %v3156_v26, 16  ;;  %v3502_v35 = vshll.u32 %v3156_v26, 16  ;;  %v8986_v26 = vld [vmem:[#allocation2 + $0xc4] sm:$0xf] }
 0x1c0   : > { %v3481_v34 = vor.u32 %v3480_v42, %v3477_v41  ;;  %v3463_v47 = vsel %vm8309_vm10, %v3458_v11, %v3462_v1  ;;  %7323 = vmatprep.mubr.msk.bf16.mxu0 %vm1791_vm11, %v6626_v24  ;;  %v3508_v51 = vshll.u32 %v8971_v0, 16  ;;  %v3496_v41 = vrot.slane %v3494_v22, 5  ;;  %v8992_v42 = vld [vmem:[#allocation2 + $0xc8] sm:$0x1] }
 0x1c1   : > { %v3473_v50 = vsel %vm8309_vm10, %v3468_v58, %v3472_v40  ;;  %v3491_v16 = vor.u32 %v3490_v21, %v3486_v55  ;;  %v3501_v7 = vrot.slane %v3499_v62, 4  ;;  %v3504_v23 = vrot.slane %v3502_v35, 5 }
 0x1c2   : > { %v6739_v48 = vcombine.low %v3463_v47, %v3473_v50  ;;  %v3482_v57 = vrot.slane %v3481_v34, 4  ;;  %v3510_v30 = vrot.slane %v3508_v51, 5  ;;  %v3512_v1 = vshrl.u32 %v8971_v0, 16 }
 0x1c3   : > { %v3492_v59 = vrot.slane %v3491_v16, 4  ;;  %v3505_v40 = vor.u32 %v3504_v23, %v3501_v7  ;;  %v3518_v53 = vshll.u32 %v8982_v37, 16  ;;  %v6627_v11 = vcombine.low %v8697_v14, %v8701_v25 }
 0x1c4   : > { %7425 = vmatprep.mubr.msk.bf16.mxu1 %vm1791_vm11, %v6739_v48  ;;  %v3523_v58 = vshrl.u32 %v3159_v28, 16  ;;  %v3487_v21 = vsel %vm8309_vm10, %v3482_v57, %v3486_v55  ;;  %v3514_v24 = vrot.slane %v3512_v1, 4  ;;  %v3526_v34 = vshll.u32 %v3159_v28, 16  ;;  %v3839_v28 = vld [vmem:[#allocation2 + $0xc] sm:$0xe] }
 0x1c5   : > { %v3497_v22 = vsel %vm8309_vm10, %v3492_v59, %v3496_v41  ;;  %v3506_v35 = vrot.slane %v3505_v40, 4  ;;  %7324 = vmatmul.mubr.msk.bf16.gmra.mrb[56].mxu0 %vm1791_vm11, %v6627_v11  ;;  %v3532_v50 = vshll.u32 %v8986_v26, 16  ;;  %v3536_v25 = vshrl.u32 %v8986_v26, 16  ;;  %v3840_v11 = vld [vmem:[#allocation2 + $0x18] sm:$0xe] }
 0x1c6   : > { %v6740_v62 = vcombine.low %v3487_v21, %v3497_v22  ;;  %v3525_v47 = vrot.slane %v3523_v58, 4  ;;  %v3515_v16 = vor.u32 %v3514_v24, %v3510_v30  ;;  %v3528_v14 = vrot.slane %v3526_v34, 5 }
 0x1c7   : > { %v3542_v51 = vshll.u32 %v8992_v42, 16  ;;  %v3534_v55 = vrot.slane %v3532_v50, 5  ;;  %v6628_v48 = vcombine.low %v8704_v31, %v8713_v43  ;;  %v3520_v7 = vrot.slane %v3518_v53, 5 }
 0x1c8   : > { %7426 = vmatmul.mubr.msk.bf16.gmra.mrb[8].mxu1 %vm1791_vm11, %v6740_v62  ;;  %v3516_v57 = vrot.slane %v3515_v16, 4  ;;  %v3529_v23 = vor.u32 %v3528_v14, %v3525_v47  ;;  %v3538_v59 = vrot.slane %v3536_v25, 4  ;;  %v3511_v41 = vsel %vm8309_vm10, %v3506_v35, %v3510_v30 }
 0x1c9   : > { %v3544_v1 = vrot.slane %v3542_v51, 5  ;;  %7327 = vmatprep.mubr.msk.bf16.mxu0 %vm1791_vm11, %v6628_v48  ;;  %v3905_v40 = vrot.slane %v8717_v5, 5  ;;  %v6759_v21 = vrot.slane %v3839_v28, 9  ;;  %v3908_v24 = vrot.slane %v8726_v6, 5  ;;  %v3841_v5 = vld [vmem:[#allocation2 + $0x24] sm:$0xe] }
 0x1ca   : > { %v3521_v58 = vsel %vm8309_vm10, %v3516_v57, %v3520_v7  ;;  %v3530_v31 = vrot.slane %v3529_v23, 4  ;;  %v3539_v43 = vor.u32 %v3538_v59, %v3534_v55  ;;  %v6629_v34 = vcombine.low %v8738_v36, %v8740_v39  ;;  %v2297_v39 = vld [vmem:[#allocation2] sm:$0xe] }
 0x1cb   : > { %v6741_v22 = vcombine.low %v3511_v41, %v3521_v58  ;;  %v3907_v30 = vrot.slane %v3905_v40, 4  ;;  %v3906_v35 = vsel %vm9012_vm1, %v6759_v21, %v3905_v40  ;;  %v6760_v47 = vrot.slane %v3840_v11, 9  ;;  %v2298_v41 = vld [vmem:[#allocation2 + $0xc] sm:$0xe]  ;;  %v8005_v40 = vld [vmem:[#allocation2 + $0x8] sm:$0x1] }
 0x1cc   : > { %v3540_v62 = vrot.slane %v3539_v43, 4  ;;  %v3912_v50 = vrot.slane %v8757_v27, 5  ;;  %v3535_v16 = vsel %vm8309_vm10, %v3530_v31, %v3534_v55  ;;  %v3915_v6 = vrot.slane %v8761_v33, 5  ;;  %v3842_v58 = vld [vmem:[#allocation2 + $0x30] sm:$0xe] }
 0x1cd   : > { %7429 = vmatprep.mubr.msk.bf16.mxu1 %vm1791_vm11, %v6741_v22  ;;  %v3909_v14 = vsel %vm9012_vm1, %v3907_v30, %v3908_v24  ;;  %7328 = vmatmul.mubr.msk.bf16.gmra.mrb[60].mxu0 %vm1791_vm11, %v6629_v34  ;;  %v3919_v36 = vrot.slane %v8769_v12, 5  ;;  %v4475_v27 = vsel %vm1840_vm7, %v8811_v29, 0  ;;  %v6761_v48 = vrot.slane %v3841_v5, 9  ;;  %v8006_v30 = vld [vmem:[#allocation2 + $0x14] sm:$0x1] }
 0x1ce   : > { %v3545_v25 = vsel %vm8309_vm10, %v3540_v62, %v3544_v1  ;;  %v3914_v51 = vrot.slane %v3912_v50, 4  ;;  %v6775_v55 = vcombine.low %v3906_v35, %v3909_v14  ;;  %v3922_v7 = vrot.slane %v8775_v18, 5  ;;  %v2299_v5 = vld [vmem:[#allocation2 + $0x18] sm:$0xe] }
 0x1cf   : > { %v6742_v28 = vcombine.low %v3535_v16, %v3545_v25  ;;  %v3921_v57 = vrot.slane %v3919_v36, 4  ;;  %v2558_v33 = vsel %vm1840_vm7, %v8793_v46, 0  ;;  %v6646_v12 = vrot.slane %v2297_v39, 9  ;;  %v3843_v16 = vld [vmem:[#allocation2 + $0x3c] sm:$0xe] }
 0x1d0   : > { %v3916_v23 = vsel %vm9012_vm1, %v3914_v51, %v3915_v6  ;;  %v2350_v59 = vrot.slane %v8800_v8, 5  ;;  %v3913_v29 = vsel %vm9012_vm1, %v6760_v47, %v3912_v50  ;;  %v3920_v1 = vsel %vm9012_vm1, %v6761_v48, %v3919_v36  ;;  %7332 = vmatpush3.bf16.msra.mxu0 %v2558_v33  ;;  %v8007_v39 = vld [vmem:[#allocation2 + $0x20] sm:$0x1]  ;;  %v10226_v51 = vld [vmem:[#allocation9_spill] sm:$0xff] }
 0x1d1   : > { %7430 = vmatmul.mubr.msk.bf16.gmra.mrb[12].mxu1 %vm1791_vm11, %v6742_v28  ;;  %v3923_v18 = vsel %vm9012_vm1, %v3921_v57, %v3922_v7  ;;  %v2353_v11 = vrot.slane %v8005_v40, 5  ;;  %v6776_v46 = vcombine.low %v3913_v29, %v3916_v23  ;;  %v2357_v43 = vrot.slane %v8803_v4, 5  ;;  %7864 = vmatprep.subr.msk.bf16.mxu0 %vm1840_vm7, %v8343_v45  ;;  %v2300_v7 = vld [vmem:[#allocation2 + $0x24] sm:$0xe] }
 0x1d2   : > { %7435 = vmatprep.mubr.msk.bf16.mxu1 %vm1791_vm11, %v6775_v55  ;;  %v2351_v8 = vsel %vm9012_vm1, %v6646_v12, %v2350_v59  ;;  %v2352_v31 = vrot.slane %v2350_v59, 4  ;;  %v6777_v21 = vcombine.low %v3920_v1, %v3923_v18  ;;  %v6647_v22 = vrot.slane %v2298_v41, 9  ;;  %v10227_v12 = vld [vmem:[#allocation10_spill] sm:$0xff]  ;;  %v3844_v41 = vld [vmem:[#allocation2 + $0x48] sm:$0xe]  ;;  %v10228_v40 = vld [vmem:[#allocation11_spill] sm:$0xff] }
 0x1d3   : > { %v2360_v24 = vrot.slane %v8006_v30, 5  ;;  %v3926_v34 = vrot.slane %v8781_v32, 5  ;;  %v2359_v35 = vrot.slane %v2357_v43, 4  ;;  %v6762_v47 = vrot.slane %v3842_v58, 9 }
 0x1d4   : > { %v2354_v62 = vsel %vm9012_vm1, %v2352_v31, %v2353_v11  ;;  %v3929_v50 = vrot.slane %v8783_v38, 5  ;;  %v2358_v4 = vsel %vm9012_vm1, %v6647_v22, %v2357_v43  ;;  %v2364_v6 = vrot.slane %v8818_v56, 5  ;;  %v2301_v43 = vld [vmem:[#allocation2 + $0x30] sm:$0xe] }
 0x1d5   : > { %v6662_v14 = vcombine.low %v2351_v8, %v2354_v62  ;;  %v3928_v45 = vrot.slane %v3926_v34, 4  ;;  %v2361_v36 = vsel %vm9012_vm1, %v2359_v35, %v2360_v24  ;;  %v6648_v32 = vrot.slane %v2299_v5, 9  ;;  %v8008_v24 = vld [vmem:[#allocation2 + $0x2c] sm:$0x1]  ;;  %v3845_v62 = vld [vmem:[#allocation2 + $0x54] sm:$0xe] }
 0x1d6   : > { %v2367_v25 = vrot.slane %v8007_v39, 5  ;;  %v3933_v48 = vrot.slane %v10226_v51, 5  ;;  %v6663_v28 = vcombine.low %v2358_v4, %v2361_v36  ;;  %v2366_v55 = vrot.slane %v2364_v6, 4  ;;  %v10229_v35 = vld [vmem:[#allocation8_spill] sm:$0xff]  ;;  %v8009_v39 = vld [vmem:[#allocation2 + $0x38] sm:$0x1] }
 0x1d7   : > { %7333 = vmatprep.mubr.msk.bf16.mxu0 %vm1791_vm11, %v6662_v14  ;;  %v3930_v38 = vsel %vm9012_vm1, %v3928_v45, %v3929_v50  ;;  %v6763_v57 = vrot.slane %v3843_v16, 9  ;;  %v3927_v56 = vsel %vm9012_vm1, %v6762_v47, %v3926_v34  ;;  %v2365_v23 = vsel %vm9012_vm1, %v6648_v32, %v2364_v6  ;;  %v10230_v47 = vld [vmem:[#allocation12_spill] sm:$0xff]  ;;  %v10231_v16 = vld [vmem:[#allocation13_spill] sm:$0xff] }
 0x1d8   : > { %v3935_v33 = vrot.slane %v3933_v48, 4  ;;  %v3936_v59 = vrot.slane %v10227_v12, 5  ;;  %7334 = vmatmul.mubr.msk.bf16.vlgmr.msra.gmra.mrb[32].mxu0 %vm1791_vm11, %v6663_v28  ;;  %v6778_v29 = vcombine.low %v3927_v56, %v3930_v38  ;;  %v2368_v1 = vsel %vm9012_vm1, %v2366_v55, %v2367_v25  ;;  %v3846_v56 = vld [vmem:[#allocation2 + $0x60] sm:$0xe] }
 0x1d9   : > { %7436 = vmatmul.mubr.msk.bf16.vlgmr.msra.gmra.mrb[16].mxu1 %vm1791_vm11, %v6776_v46  ;;  %v3934_v18 = vsel %vm9012_vm1, %v6763_v57, %v3933_v48  ;;  %v2371_v11 = vrot.slane %v10228_v40, 5  ;;  %v6664_v58 = vcombine.low %v2365_v23, %v2368_v1  ;;  %v6649_v31 = vrot.slane %v2300_v7, 9  ;;  %7366 = vmatpush3.bf16.msra.mxu0 %v10229_v35  ;;  %v2302_v48 = vld [vmem:[#allocation2 + $0x3c] sm:$0xe]  ;;  %v8010_v12 = vld [vmem:[#allocation2 + $0x40] sm:$0xf] }
 0x1da   : > { %7468 = vmatpush3.bf16.msra.mxu1 %v4475_v27  ;;  %7439 = vmatprep.mubr.msk.bf16.mxu1 %vm1791_vm11, %v6777_v21  ;;  %v3937_v8 = vsel %vm9012_vm1, %v3935_v33, %v3936_v59  ;;  %v3940_v46 = vrot.slane %v8834_v17, 5  ;;  %v2374_v34 = vrot.slane %v8008_v24, 5  ;;  %v6764_v5 = vrot.slane %v3844_v41, 9  ;;  %v10232_v57 = vld [vmem:[#allocation14_spill] sm:$0xff] }
 0x1db   : > { %v6779_v22 = vcombine.low %v3934_v18, %v3937_v8  ;;  %v2373_v30 = vrot.slane %v2371_v11, 4  ;;  %7337 = vmatprep.mubr.msk.bf16.mxu0 %vm1791_vm11, %v6664_v58  ;;  %v2372_v27 = vsel %vm9012_vm1, %v6649_v31, %v2371_v11  ;;  %v3943_v50 = vrot.slane %v10230_v47, 5  ;;  %v2303_v11 = vld [vmem:[#allocation2 + $0x48] sm:$0xe]  ;;  %v8011_v31 = vld [vmem:[#allocation2 + $0x44] sm:$0x1] }
 0x1dc   : > { %v3942_v21 = vrot.slane %v3940_v46, 4  ;;  %v2378_v14 = vrot.slane %v10231_v16, 5  ;;  %v9092_v4 = vsel %vm9012_vm1, %v6764_v5, %v3940_v46  ;;  %v6650_v45 = vrot.slane %v2301_v43, 9  ;;  %v8012_v5 = vld [vmem:[#allocation2 + $0x4c] sm:$0xf] }
 0x1dd   : > { %v2375_v17 = vsel %vm9012_vm1, %v2373_v30, %v2374_v34  ;;  %v3947_v6 = vrot.slane %v8850_v44, 5  ;;  %v2381_v25 = vrot.slane %v8009_v39, 5  ;;  %v6765_v51 = vrot.slane %v3845_v62, 9  ;;  %v3847_v30 = vld [vmem:[#allocation2 + $0x6c] sm:$0xe] }
 0x1de   : > { %v3944_v36 = vsel %vm9012_vm1, %v3942_v21, %v3943_v50  ;;  %v2380_v32 = vrot.slane %v2378_v14, 4  ;;  %v6665_v28 = vcombine.low %v2372_v27, %v2375_v17  ;;  %v2379_v38 = vsel %vm9012_vm1, %v6650_v45, %v2378_v14  ;;  %v8013_v50 = vld [vmem:[#allocation2 + $0x50] sm:$0x1]  ;;  %v2304_v14 = vld [vmem:[#allocation2 + $0x54] sm:$0xe] }
 0x1df   : > { %v3949_v55 = vrot.slane %v3947_v6, 4  ;;  %v3950_v7 = vrot.slane %v10232_v57, 5  ;;  %v6780_v23 = vcombine.low %v9092_v4, %v3944_v36  ;;  %v3948_v33 = vsel %vm9012_vm1, %v6765_v51, %v3947_v6  ;;  %v10233_v6 = vld [vmem:[#allocation15_spill] sm:$0xff]  ;;  %v8014_v51 = vld [vmem:[#allocation2 + $0x58] sm:$0xf] }
 0x1e0   : > { %v2382_v44 = vsel %vm9012_vm1, %v2380_v32, %v2381_v25  ;;  %v2385_v59 = vrot.slane %v8010_v12, 5  ;;  %7338 = vmatmul.mubr.msk.bf16.gmra.mrb[36].mxu0 %vm1791_vm11, %v6665_v28  ;;  %v6651_v18 = vrot.slane %v2302_v48, 9  ;;  %v3954_v40 = vrot.slane %v8868_v2, 5  ;;  %v3848_v32 = vld [vmem:[#allocation2 + $0x78] sm:$0xe] }
 0x1e1   : > { %7440 = vmatmul.mubr.msk.bf16.gmra.mrb[20].mxu1 %vm1791_vm11, %v6778_v29  ;;  %v6666_v41 = vcombine.low %v2379_v38, %v2382_v44  ;;  %v3951_v1 = vsel %vm9012_vm1, %v3949_v55, %v3950_v7  ;;  %v2388_v46 = vrot.slane %v8011_v31, 5  ;;  %v6766_v43 = vrot.slane %v3846_v56, 9  ;;  %v8015_v44 = vld [vmem:[#allocation2 + $0x5c] sm:$0x1] }
 0x1e2   : > { %7443 = vmatprep.mubr.msk.bf16.mxu1 %vm1791_vm11, %v6779_v22  ;;  %v6781_v58 = vcombine.low %v3948_v33, %v3951_v1  ;;  %v2387_v8 = vrot.slane %v2385_v59, 4  ;;  %v2386_v29 = vsel %vm9012_vm1, %v6651_v18, %v2385_v59  ;;  %v3956_v24 = vrot.slane %v3954_v40, 4  ;;  %v2305_v59 = vld [vmem:[#allocation2 + $0x60] sm:$0xe]  ;;  %v8016_v18 = vld [vmem:[#allocation2 + $0x64] sm:$0xf] }
 0x1e3   : > { %7341 = vmatprep.mubr.msk.bf16.mxu0 %vm1791_vm11, %v6666_v41  ;;  %v3957_v34 = vrot.slane %v8874_v52, 5  ;;  %v2392_v62 = vrot.slane %v8012_v5, 5  ;;  %v9119_v22 = vsel %vm9012_vm1, %v6766_v43, %v3954_v40  ;;  %v6652_v35 = vrot.slane %v2303_v11, 9  ;;  %v8017_v43 = vld [vmem:[#allocation2 + $0x68] sm:$0x1] }
 0x1e4   : > { %v2389_v2 = vsel %vm9012_vm1, %v2387_v8, %v2388_v46  ;;  %v3961_v27 = vrot.slane %v8881_v13, 5  ;;  %v2395_v16 = vrot.slane %v8013_v50, 5  ;;  %v6767_v52 = vrot.slane %v3847_v30, 9  ;;  %v2306_v50 = vld [vmem:[#allocation2 + $0x6c] sm:$0xe] }
 0x1e5   : > { %v9124_v21 = vsel %vm9012_vm1, %v3956_v24, %v3957_v34  ;;  %v2394_v47 = vrot.slane %v2392_v62, 4  ;;  %v6667_v17 = vcombine.low %v2386_v29, %v2389_v2  ;;  %v3964_v36 = vrot.slane %v10233_v6, 5  ;;  %v8019_v6 = vld [vmem:[#allocation2 + $0x74] sm:$0x1] }
 0x1e6   : > { %v6782_v4 = vcombine.low %v9119_v22, %v9124_v21  ;;  %v3963_v45 = vrot.slane %v3961_v27, 4  ;;  %v2393_v13 = vsel %vm9012_vm1, %v6652_v35, %v2392_v62  ;;  %v3962_v25 = vsel %vm9012_vm1, %v6767_v52, %v3961_v27  ;;  %v3850_v62 = vld [vmem:[#allocation2 + $0x90] sm:$0xe] }
 0x1e7   : > { %v2396_v39 = vsel %vm9012_vm1, %v2394_v47, %v2395_v16  ;;  %v2399_v48 = vrot.slane %v8014_v51, 5  ;;  %v6653_v55 = vrot.slane %v2304_v14, 9  ;;  %v3968_v57 = vrot.slane %v8897_v49, 5  ;;  %v3849_v49 = vld [vmem:[#allocation2 + $0x84] sm:$0xe] }
 0x1e8   : > { %v6668_v28 = vcombine.low %v2393_v13, %v2396_v39  ;;  %v3965_v38 = vsel %vm9012_vm1, %v3963_v45, %v3964_v36  ;;  %7342 = vmatmul.mubr.msk.bf16.gmra.mrb[40].mxu0 %vm1791_vm11, %v6667_v17  ;;  %v2402_v33 = vrot.slane %v8015_v44, 5  ;;  %v6768_v12 = vrot.slane %v3848_v32, 9  ;;  %v8018_v22 = vld [vmem:[#allocation2 + $0x70] sm:$0xf]  ;;  %v8020_v39 = vld [vmem:[#allocation2 + $0x7c] sm:$0xf] }
 0x1e9   : > { %7444 = vmatmul.mubr.msk.bf16.gmra.mrb[24].mxu1 %vm1791_vm11, %v6780_v23  ;;  %v6783_v7 = vcombine.low %v3962_v25, %v3965_v38  ;;  %v2401_v56 = vrot.slane %v2399_v48, 4  ;;  %v3970_v41 = vrot.slane %v3968_v57, 4  ;;  %v3971_v1 = vrot.slane %v8899_v19, 5  ;;  %v3851_v51 = vld [vmem:[#allocation2 + $0x9c] sm:$0xe] }
 0x1ea   : > { %7447 = vmatprep.mubr.msk.bf16.mxu1 %vm1791_vm11, %v6781_v58  ;;  %7345 = vmatprep.mubr.msk.bf16.mxu0 %vm1791_vm11, %v6668_v28  ;;  %v2406_v40 = vrot.slane %v8016_v18, 5  ;;  %v2400_v23 = vsel %vm9012_vm1, %v6653_v55, %v2399_v48  ;;  %v9149_v8 = vsel %vm9012_vm1, %v6768_v12, %v3968_v57  ;;  %v3975_v58 = vrot.slane %v8911_v60, 5  ;;  %v8021_v57 = vld [vmem:[#allocation2 + $0x80] sm:$0x1]  ;;  %v3852_v18 = vld [vmem:[#allocation2 + $0xa8] sm:$0xe] }
 0x1eb   : > { %v2403_v11 = vsel %vm9012_vm1, %v2401_v56, %v2402_v33  ;;  %v9154_v31 = vsel %vm9012_vm1, %v3970_v41, %v3971_v1  ;;  %v6654_v19 = vrot.slane %v2305_v59, 9  ;;  %v2409_v30 = vrot.slane %v8017_v43, 5  ;;  %v8022_v41 = vld [vmem:[#allocation2 + $0x88] sm:$0xf] }
 0x1ec   : > { %v2408_v46 = vrot.slane %v2406_v40, 4  ;;  %v6784_v29 = vcombine.low %v9149_v8, %v9154_v31  ;;  %v6769_v24 = vrot.slane %v3849_v49, 9  ;;  %v3977_v34 = vrot.slane %v3975_v58, 4 }
 0x1ed   : > { %v3978_v5 = vrot.slane %v8913_v10, 5  ;;  %v6669_v2 = vcombine.low %v2400_v23, %v2403_v11  ;;  %v2413_v35 = vrot.slane %v8018_v22, 5  ;;  %v2407_v27 = vsel %vm9012_vm1, %v6654_v19, %v2406_v40  ;;  %v2307_v10 = vld [vmem:[#allocation2 + $0x78] sm:$0xe]  ;;  %v2308_v19 = vld [vmem:[#allocation2 + $0x84] sm:$0xe] }
 0x1ee   : > { %v2410_v60 = vsel %vm9012_vm1, %v2408_v46, %v2409_v30  ;;  %v3976_v21 = vsel %vm9012_vm1, %v6769_v24, %v3975_v58  ;;  %v3982_v16 = vrot.slane %v8930_v3, 5  ;;  %v6770_v45 = vrot.slane %v3850_v62, 9  ;;  %v8023_v24 = vld [vmem:[#allocation2 + $0x94] sm:$0xf] }
 0x1ef   : > { %v3979_v47 = vsel %vm9012_vm1, %v3977_v34, %v3978_v5  ;;  %v6670_v52 = vcombine.low %v2407_v27, %v2410_v60  ;;  %v2415_v17 = vrot.slane %v2413_v35, 4  ;;  %v2416_v36 = vrot.slane %v8019_v6, 5  ;;  %v8024_v5 = vld [vmem:[#allocation2 + $0x8c] sm:$0x1]  ;;  %v8025_v27 = vld [vmem:[#allocation2 + $0x98] sm:$0x1] }
 0x1f0   : > { %v6785_v14 = vcombine.low %v3976_v21, %v3979_v47  ;;  %7346 = vmatmul.mubr.msk.bf16.gmra.mrb[44].mxu0 %vm1791_vm11, %v6669_v2  ;;  %v3984_v32 = vrot.slane %v3982_v16, 4  ;;  %v3985_v13 = vrot.slane %v8932_v20, 5  ;;  %v2420_v25 = vrot.slane %v8020_v39, 5  ;;  %v2309_v2 = vld [vmem:[#allocation2 + $0x90] sm:$0xe] }
 0x1f1   : > { %7448 = vmatmul.mubr.msk.bf16.gmra.mrb[28].mxu1 %vm1791_vm11, %v6782_v4  ;;  %7349 = vmatprep.mubr.msk.bf16.mxu0 %vm1791_vm11, %v6670_v52  ;;  %v6655_v3 = vrot.slane %v2306_v50, 9  ;;  %v9175_v48 = vsel %vm9012_vm1, %v6770_v45, %v3982_v16  ;;  %v6656_v4 = vrot.slane %v2307_v10, 9  ;;  %v3989_v28 = vrot.slane %v8941_v54, 5  ;;  %v3854_v47 = vld [vmem:[#allocation2 + $0xc0] sm:$0xe] }
 0x1f2   : > { %7451 = vmatprep.mubr.msk.bf16.mxu1 %vm1791_vm11, %v6783_v7  ;;  %v2417_v38 = vsel %vm9012_vm1, %v2415_v17, %v2416_v36  ;;  %v9182_v20 = vsel %vm9012_vm1, %v3984_v32, %v3985_v13  ;;  %v2422_v55 = vrot.slane %v2420_v25, 4  ;;  %v2423_v7 = vrot.slane %v8021_v57, 5  ;;  %v8026_v16 = vld [vmem:[#allocation2 + $0xa0] sm:$0xf]  ;;  %v3853_v57 = vld [vmem:[#allocation2 + $0xb4] sm:$0xe] }
 0x1f3   : > { %v6786_v56 = vcombine.low %v9175_v48, %v9182_v20  ;;  %v6771_v44 = vrot.slane %v3851_v51, 9  ;;  %v3991_v33 = vrot.slane %v3989_v28, 4  ;;  %v3992_v12 = vrot.slane %v8949_v9, 5  ;;  %v9218_v52 = vld [vmem:[%s10172_s3 + $0xc] ss:$0 sps:$4 sm:$0xcc]  }
 0x1f4   : > { %v2414_v54 = vsel %vm9012_vm1, %v6655_v3, %v2413_v35  ;;  %v2424_v59 = vsel %vm9012_vm1, %v2422_v55, %v2423_v7  ;;  %v2427_v1 = vrot.slane %v8022_v41, 5  ;;  %v2421_v40 = vsel %vm9012_vm1, %v6656_v4, %v2420_v25  ;;  %v8027_v51 = vld [vmem:[#allocation2 + $0xac] sm:$0xf]  ;;  %v8028_v7 = vld [vmem:[#allocation2 + $0xa4] sm:$0x1] }
 0x1f5   : > { %v3990_v49 = vsel %vm9012_vm1, %v6771_v44, %v3989_v28  ;;  %v3993_v23 = vsel %vm9012_vm1, %v3991_v33, %v3992_v12  ;;  %v3996_v9 = vrot.slane %v8956_v63, 5  ;;  %v6671_v11 = vcombine.low %v2414_v54, %v2417_v38  ;;  %v710_v38 = vld [vmem:[#allocation2 + $0xcc] sm:$0x1]  ;;  %v8029_v54 = vld [vmem:[#allocation2 + $0xb0] sm:$0x1] }
 0x1f6   : > { %v6672_v8 = vcombine.low %v2421_v40, %v2424_v59  ;;  %v6787_v58 = vcombine.low %v3990_v49, %v3993_v23  ;;  %v2429_v31 = vrot.slane %v2427_v1, 4  ;;  %v6772_v46 = vrot.slane %v3852_v18, 9  ;;  %v8030_v49 = vld [vmem:[#allocation2 + $0xb8] sm:$0xf]  ;;  %v9292_v41 = vld [vmem:[#allocation2 + $0x2c] sm:$0x1] }
 0x1f7   : > { %v3998_v43 = vrot.slane %v3996_v9, 4  ;;  %v3999_v30 = vrot.slane %v8964_v61, 5  ;;  %v2434_v34 = vrot.slane %v8023_v24, 5  ;;  %v2430_v62 = vrot.slane %v8024_v5, 5  ;;  %v8031_v5 = vld [vmem:[#allocation2 + $0xbc] sm:$0x1] }
 0x1f8   : > { %7350 = vmatmul.mubr.msk.bf16.gmra.mrb[48].mxu0 %vm1791_vm11, %v6671_v11  ;;  %v9205_v63 = vsel %vm9012_vm1, %v6772_v46, %v3996_v9  ;;  %v6657_v22 = vrot.slane %v2308_v19, 9  ;;  %v2437_v21 = vrot.slane %v8025_v27, 5  ;;  %v6658_v50 = vrot.slane %v2309_v2, 9 }
 0x1f9   : > { %7452 = vmatmul.mubr.msk.bf16.gmra.mrb[0].mxu1 %vm1791_vm11, %v6784_v29  ;;  %7353 = vmatprep.mubr.msk.bf16.mxu0 %vm1791_vm11, %v6672_v8  ;;  %v9209_v61 = vsel %vm9012_vm1, %v3998_v43, %v3999_v30  ;;  %v2436_v60 = vrot.slane %v2434_v34, 4  ;;  %v2431_v29 = vsel %vm9012_vm1, %v2429_v31, %v2430_v62  ;;  %v2441_v10 = vrot.slane %v8026_v16, 5  ;;  %v7958_v16 = vld [vmem:[#allocation2 + $0x24] sm:$0xff]  }
 0x1fa   : > { %7455 = vmatprep.mubr.msk.bf16.mxu1 %vm1791_vm11, %v6785_v14  ;;  %v6788_v35 = vcombine.low %v9205_v63, %v9209_v61  ;;  %v2428_v14 = vsel %vm9012_vm1, %v6657_v22, %v2427_v1  ;;  %v4003_v45 = vrot.slane %v8971_v0, 5  ;;  %v4010_v6 = vrot.slane %v8986_v26, 5  ;;  %v2310_v26 = vld [vmem:[#allocation2 + $0x9c] sm:$0xe] }
 0x1fb   : > { %v2438_v17 = vsel %vm9012_vm1, %v2436_v60, %v2437_v21  ;;  %v6673_v36 = vcombine.low %v2428_v14, %v2431_v29  ;;  %v2435_v32 = vsel %vm9012_vm1, %v6658_v50, %v2434_v34  ;;  %v6774_v13 = vrot.slane %v3854_v47, 9  ;;  %v2312_v34 = vld [vmem:[#allocation2 + $0xb4] sm:$0xe]  ;;  %v7951_v22 = vld [vmem:[#allocation2 + $0x18] sm:$0xff]   ;;  %v7954_v29 = vld [vmem:[#allocation2 + $0xc] sm:$0xff]  }
 0x1fc   : > { %v4012_v39 = vrot.slane %v4010_v6, 4  ;;  %v4013_v25 = vrot.slane %v8992_v42, 5  ;;  %v2448_v3 = vrot.slane %v8027_v51, 5  ;;  %v6674_v48 = vcombine.low %v2435_v32, %v2438_v17  ;;  %v7956_v21 = vld [vmem:[#allocation2 + $0x18] sm:$0xff]   ;;  %v7955_v47 = vld [vmem:[#allocation2 + $0x30] sm:$0xff]  }
 0x1fd   : > { %v2443_v4 = vrot.slane %v2441_v10, 4  ;;  %v5154_v28 = vrot.slane %v9218_v52, 2  ;;  %v4005_v0 = vrot.slane %v4003_v45, 4  ;;  %v4011_v20 = vsel %vm9012_vm1, %v6774_v13, %v4010_v6  ;;  %v9270_v50 = vld [vmem:[%s10172_s3 + $0x10] sm:$0x3]  ;;  %v7957_v14 = vld [vmem:[#allocation2 + $0x3c] sm:$0xff]  }
 0x1fe   : > { %v4014_v55 = vsel %vm9012_vm1, %v4012_v39, %v4013_v25  ;;  %v2450_v42 = vrot.slane %v2448_v3, 4  ;;  %v2444_v44 = vrot.slane %v8028_v7, 5  ;;  %v4006_v12 = vrot.slane %v8982_v37, 5  ;;  %v9278_v52 = vld [vmem:[#allocation2 + $0x1c] sm:$0xf]  ;;  %v7960_v17 = vld [vmem:[#allocation2 + $0x30] sm:$0xff]  }
 0x1ff   : > { %v6790_v33 = vcombine.low %v4011_v20, %v4014_v55  ;;  %v2451_v59 = vrot.slane %v8029_v54, 5  ;;  %7869 = vmatprep.subr.msk.bf16.mxu1 %vm1840_vm7, %v5154_v28  ;;  %v711_v1 = vsel %vm8248_vm3, 0, %v710_v38  ;;  %v6659_v18 = vrot.slane %v2310_v26, 9  ;;  %v4673_v13 = vld [vmem:[#allocation2 + $0x24] sm:$0xf]  ;;  %v7959_v39 = vld [vmem:[#allocation2 + $0x48] sm:$0xff]  }
 0x200   : > { %7354 = vmatmul.mubr.msk.bf16.gmra.mrb[52].mxu0 %vm1791_vm11, %v6673_v36  ;;  %v2445_v40 = vsel %vm9012_vm1, %v2443_v4, %v2444_v44  ;;  %v2455_v23 = vrot.slane %v8030_v49, 5  ;;  %712 = vst [vmem:[#allocation2 + $0xcc] sm:$0x1] %v711_v1  ;;  %v6773_v9 = vrot.slane %v3853_v57, 9  ;;  %v4007_v11 = vsel %vm9012_vm1, %v4005_v0, %v4006_v12  ;;  %v7962_v25 = vld [vmem:[#allocation2 + $0x3c] sm:$0xff]   ;;  %v7961_v44 = vld [vmem:[#allocation2 + $0x54] sm:$0xff]  }
 0x201   : > { %7456 = vmatmul.mubr.msk.bf16.gmra.mrb[4].mxu1 %vm1791_vm11, %v6786_v56  ;;  %7357 = vmatprep.mubr.msk.bf16.mxu0 %vm1791_vm11, %v6674_v48  ;;  %v2311_v56 = vld [vmem:[#allocation2 + $0xa8] sm:$0xe]  ;;  %v2452_v37 = vsel %vm9012_vm1, %v2450_v42, %v2451_v59  ;;  %v2458_v62 = vrot.slane %v8031_v5, 5  ;;  %v6661_v2 = vrot.slane %v2312_v34, 9  ;;  %v5204_v27 = vsel %vm1840_vm7, %v5154_v28, 0  ;;  %v7963_v54 = vld [vmem:[#allocation2 + $0x60] sm:$0xff]  }
 0x202   : > { %7459 = vmatprep.mubr.msk.bf16.mxu1 %vm1791_vm11, %v6787_v58  ;;  %v6660_v8 = vrot.slane %v2311_v56, 9  ;;  %v2442_v58 = vsel %vm9012_vm1, %v6659_v18, %v2441_v10  ;;  %v4004_v31 = vsel %vm9012_vm1, %v6773_v9, %v4003_v45  ;;  %v2457_v24 = vrot.slane %v2455_v23, 4  ;;  %v4670_v10 = vld [vmem:[#allocation2 + $0x18] sm:$0xf]  ;;  %v9284_v51 = vld [vmem:[#allocation2 + $0x28] sm:$0xf] }
 0x203   : > { %v6675_v19 = vcombine.low %v2442_v58, %v2445_v40  ;;  %v6789_v43 = vcombine.low %v4004_v31, %v4007_v11  ;;  %v2456_v61 = vsel %vm9012_vm1, %v6661_v2, %v2455_v23  ;;  %v4719_v45 = vshrl.u32 %v4670_v10, 16  ;;  %v9290_v55 = vld [vmem:[#allocation2 + $0x20] sm:$0x1]  ;;  %v4676_v7 = vld [vmem:[#allocation2 + $0x30] sm:$0xf]  ;;  %v7966_v59 = vld [vmem:[#allocation2 + $0x54] sm:$0xff]  }
 0x204   : > { %v2449_v46 = vsel %vm9012_vm1, %v6660_v8, %v2448_v3  ;;  %v2459_v63 = vsel %vm9012_vm1, %v2457_v24, %v2458_v62  ;;  %v4722_v6 = vshll.u32 %v4670_v10, 16  ;;  %v4728_v36 = vshll.u32 %v9278_v52, 16  ;;  %v9299_v49 = vld [vmem:[#allocation2 + $0x34] sm:$0xf]  ;;  %v7965_v5 = vld [vmem:[#allocation2 + $0x6c] sm:$0xff]   ;;  %v7967_v62 = vld [vmem:[#allocation2 + $0x78] sm:$0xff]  }
 0x205   : > { %v6676_v30 = vcombine.low %v2449_v46, %v2452_v37  ;;  %v6677_v60 = vcombine.low %v2456_v61, %v2459_v63  ;;  %v4732_v32 = vshrl.u32 %v9278_v52, 16  ;;  %v4743_v3 = vshrl.u32 %v4673_v13, 16  ;;  %v4679_v63 = vld [vmem:[#allocation2 + $0x3c] sm:$0xf]  ;;  %v7968_v61 = vld [vmem:[#allocation2 + $0x60] sm:$0xff]  }
 0x206   : > { %v4746_v48 = vshll.u32 %v4673_v13, 16  ;;  %v4721_v4 = vrot.slane %v4719_v45, 4  ;;  %v4724_v28 = vrot.slane %v4722_v6, 5  ;;  %v4730_v38 = vrot.slane %v4728_v36, 5  ;;  %v9326_v36 = vld [vmem:[#allocation2 + $0x58] sm:$0xf] }
 0x207   : > { %v4734_v0 = vrot.slane %v4732_v32, 4  ;;  %v4752_v26 = vshll.u32 %v9284_v51, 16  ;;  %v4756_v20 = vshrl.u32 %v9284_v51, 16  ;;  %v4745_v42 = vrot.slane %v4743_v3, 4 }
 0x208   : > { %7358 = vmatmul.mubr.msk.bf16.gmra.mrb[56].mxu0 %vm1791_vm11, %v6675_v19  ;;  %v4748_v57 = vrot.slane %v4746_v48, 5  ;;  %v4725_v56 = vor.u32 %v4724_v28, %v4721_v4  ;;  %v4738_v40 = vshll.u32 %v9290_v55, 16  ;;  %v4767_v23 = vshrl.u32 %v4676_v7, 16 }
 0x209   : > { %7460 = vmatmul.mubr.msk.bf16.gmra.mrb[8].mxu1 %vm1791_vm11, %v6788_v35  ;;  %7361 = vmatprep.mubr.msk.bf16.mxu0 %vm1791_vm11, %v6676_v30  ;;  %v7953_v35 = vld [vmem:[#allocation2 + $0x24] sm:$0xff]   ;;  %v4735_v12 = vor.u32 %v4734_v0, %v4730_v38  ;;  %v9294_v1 = vrot.slane %v4752_v26, 5  ;;  %v4758_v18 = vrot.slane %v4756_v20, 4  ;;  %v4770_v9 = vshll.u32 %v4676_v7, 16 }
 0x20a   : > { %7463 = vmatprep.mubr.msk.bf16.mxu1 %vm1791_vm11, %v6789_v43  ;;  %v4749_v11 = vor.u32 %v4748_v57, %v4745_v42  ;;  %v4726_v8 = vrot.slane %v4725_v56, 4  ;;  %v4762_v31 = vshll.u32 %v9292_v41, 16  ;;  %v4776_v19 = vshll.u32 %v9299_v49, 16  ;;  %v9306_v43 = vld [vmem:[#allocation2 + $0x38] sm:$0x1] }
 0x20b   : > { %v4736_v37 = vrot.slane %v4735_v12, 4  ;;  %v4759_v58 = vor.u32 %v4758_v18, %v9294_v1  ;;  %v4740_v46 = vrot.slane %v4738_v40, 5  ;;  %v4769_v30 = vrot.slane %v4767_v23, 4  ;;  %v9342_v20 = vld [vmem:[#allocation2 + $0x44] sm:$0x1] }
 0x20c   : > { %v4772_v24 = vrot.slane %v4770_v9, 5  ;;  %v4780_v34 = vshrl.u32 %v9299_v49, 16  ;;  %v4750_v2 = vrot.slane %v4749_v11, 4  ;;  %v4786_v10 = vshll.u32 %v9306_v43, 16  ;;  %v4688_v12 = vld [vmem:[#allocation2 + $0x60] sm:$0xf] }
 0x20d   : > { %v4791_v6 = vshrl.u32 %v4679_v63, 16  ;;  %v4848_v42 = vshll.u32 %v9326_v36, 16  ;;  %v4852_v57 = vshrl.u32 %v9326_v36, 16  ;;  %v9351_v40 = vld [vmem:[#allocation2 + $0x64] sm:$0xf]  ;;  %v7970_v9 = vld [vmem:[#allocation2 + $0x90] sm:$0xff]  }
 0x20e   : > { %v4782_v45 = vrot.slane %v4780_v34, 4  ;;  %v4755_v13 = vsel %vm8309_vm10, %v4750_v2, %v9294_v1  ;;  %v9340_v26 = vrot.slane %v4786_v10, 5  ;;  %v7969_v23 = vld [vmem:[#allocation2 + $0x84] sm:$0xff]   ;;  %v4876_v2 = vshrl.u32 %v9351_v40, 16 }
 0x20f   : > { %v5475_v15 = vrot.slane %v9292_v41, 5 }
 0x210   : > { %7362 = vmatmul.mubr.msk.bf16.gmra.mrb[60].mxu0 %vm1791_vm11, %v6677_v60  ;;  %v4731_v60 = vsel %vm8309_vm10, %v4726_v8, %v4730_v38  ;;  %v4685_v38 = vld [vmem:[#allocation2 + $0x54] sm:$0xf] }
 0x211   : > { %7464 = vmatmul.mubr.msk.bf16.gmra.mrb[12].mxu1 %vm1791_vm11, %v6790_v33  ;;  %7367 = vmatprep.mubr.msk.bf16.mxu0 %vm1791_vm11, %v7954_v29  ;;  %v7964_v33 = vld [vmem:[#allocation2 + $0x48] sm:$0xff]   ;;  %v9315_v29 = vsel %vm1840_vm7, %v9270_v50, 0  ;;  %v4839_v1 = vshrl.u32 %v4685_v38, 16  ;;  %v4842_v18 = vshll.u32 %v4685_v38, 16  ;;  %v7971_v38 = vld [vmem:[#allocation2 + $0x9c] sm:$0xff]  }
 0x212   : > { %7469 = vmatprep.mubr.msk.bf16.mxu1 %vm1791_vm11, %v7951_v22  ;;  %v4741_v22 = vsel %vm8309_vm10, %v4736_v37, %v4740_v46  ;;  %v4854_v46 = vrot.slane %v4852_v57, 4 }
 0x213   : > { %v9329_v32 = vcombine.low %v4731_v60, %v4741_v22  ;;  %v4841_v60 = vrot.slane %v4839_v1, 4  ;;  %v4844_v22 = vrot.slane %v4842_v18, 5  ;;  %v9385_v18 = vld [vmem:[#allocation2 + $0x68] sm:$0x1] }
 0x218   : > { %7368 = vmatmul.mubr.msk.bf16.vlgmr.msra.gmra.mrb[32].mxu0 %vm1791_vm11, %v7956_v21  ;;  %v4760_v21 = vrot.slane %v4759_v58, 4 }
 0x219   : > { %7470 = vmatmul.mubr.msk.bf16.vlgmr.msra.gmra.mrb[16].mxu1 %vm1791_vm11, %v7953_v35  ;;  %7371 = vmatprep.mubr.msk.bf16.mxu0 %vm1791_vm11, %v7958_v16  ;;  %v9317_v35 = vld [vmem:[#allocation2 + $0x40] sm:$0xf]  ;;  %v9319_v16 = vrot.slane %v4776_v19, 5  ;;  %v9357_v19 = vrot.slane %v4848_v42, 5 }
 0x21a   : > { %7502 = vmatpush3.bf16.msra.mxu1 %v5204_v27  ;;  %7473 = vmatprep.mubr.msk.bf16.mxu1 %vm1791_vm11, %v7955_v47  ;;  %v4682_v27 = vld [vmem:[#allocation2 + $0x48] sm:$0xf]  ;;  %v4764_v47 = vrot.slane %v4762_v31, 5  ;;  %v9355_v31 = vld [vmem:[#allocation2 + $0x50] sm:$0x1] }
 0x21b   : > { %7870 = vmatprep.subr.msk.bf16.mxu1 %vm1840_vm7, %v9270_v50  ;;  %v4794_v50 = vshll.u32 %v4679_v63, 16  ;;  %v4815_v3 = vshrl.u32 %v4682_v27, 16  ;;  %v4818_v48 = vshll.u32 %v4682_v27, 16  ;;  %v4691_v27 = vld [vmem:[#allocation2 + $0x6c] sm:$0xf] }
 0x21c   : > { %v4765_v0 = vsel %vm8309_vm10, %v4760_v21, %v4764_v47 }
 0x21d   : > { %v4796_v56 = vrot.slane %v4794_v50, 5  ;;  %v4817_v11 = vrot.slane %v4815_v3, 4  ;;  %v4820_v8 = vrot.slane %v4818_v48, 5  ;;  %v9360_v34 = vcombine.low %v4755_v13, %v4765_v0 }
 0x21e   : > { %v4855_v13 = vor.u32 %v4854_v46, %v9357_v19  ;;  %v4878_v48 = vrot.slane %v4876_v2, 4  ;;  %v4845_v0 = vor.u32 %v4844_v22, %v4841_v60  ;;  %v4694_v46 = vld [vmem:[#allocation2 + $0x78] sm:$0xf] }
 0x21f   : > { %v4821_v10 = vor.u32 %v4820_v8, %v4817_v11 }
 0x220   : > { %7372 = vmatmul.mubr.msk.bf16.gmra.mrb[36].mxu0 %vm1791_vm11, %v7960_v17  ;;  %v4773_v17 = vor.u32 %v4772_v24, %v4769_v30  ;;  %v4863_v30 = vshrl.u32 %v4688_v12, 16  ;;  %v4866_v24 = vshll.u32 %v4688_v12, 16  ;;  %v4856_v8 = vrot.slane %v4855_v13, 4 }
 0x221   : > { %7474 = vmatmul.mubr.msk.bf16.gmra.mrb[20].mxu1 %vm1791_vm11, %v7957_v14  ;;  %7375 = vmatprep.mubr.msk.bf16.mxu0 %vm1791_vm11, %v7962_v25  ;;  %v9322_v14 = vld [vmem:[#allocation2 + $0x4c] sm:$0xf]  ;;  %v4804_v25 = vshrl.u32 %v9317_v35, 16  ;;  %v4822_v1 = vrot.slane %v4821_v10, 4  ;;  %v4911_v13 = vshrl.u32 %v4694_v46, 16 }
 0x222   : > { %7477 = vmatprep.mubr.msk.bf16.mxu1 %vm1791_vm11, %v7959_v39  ;;  %v4800_v39 = vshll.u32 %v9317_v35, 16  ;;  %v4824_v4 = vshll.u32 %v9322_v14, 16  ;;  %v4828_v28 = vshrl.u32 %v9322_v14, 16  ;;  %v9346_v7 = vrot.slane %v4773_v17, 4 }
 0x223   : > { %v4834_v17 = vshll.u32 %v9355_v31, 16 }
 0x224   : > { %v9353_v37 = vrot.slane %v4824_v4, 5  ;;  %v4830_v58 = vrot.slane %v4828_v28, 4  ;;  %v4779_v63 = vsel %vm8309_vm10, %v9346_v7, %v9319_v16  ;;  %v4887_v4 = vshrl.u32 %v4691_v27, 16 }
 0x225   : > { %v4890_v28 = vshll.u32 %v4691_v27, 16  ;;  %v4836_v11 = vrot.slane %v4834_v17, 5  ;;  %v9392_v27 = vld [vmem:[#allocation2 + $0x74] sm:$0x1]  ;;  %v4882_v17 = vshll.u32 %v9385_v18, 16 }
 0x226   : > { %v4831_v50 = vor.u32 %v4830_v58, %v9353_v37 }
 0x228   : > { %7376 = vmatmul.mubr.msk.bf16.gmra.mrb[40].mxu0 %vm1791_vm11, %v7964_v33  ;;  %v4793_v33 = vrot.slane %v4791_v6, 4  ;;  %v9376_v6 = vld [vmem:[#allocation2 + $0x70] sm:$0xf] }
 0x229   : > { %7478 = vmatmul.mubr.msk.bf16.gmra.mrb[24].mxu1 %vm1791_vm11, %v7961_v44  ;;  %7379 = vmatprep.mubr.msk.bf16.mxu0 %vm1791_vm11, %v7966_v59  ;;  %v4783_v44 = vor.u32 %v4782_v45, %v9319_v16  ;;  %v4806_v59 = vrot.slane %v4804_v25, 4  ;;  %v9374_v45 = vld [vmem:[#allocation2 + $0x5c] sm:$0x1]  ;;  %v4868_v25 = vrot.slane %v4866_v24, 5  ;;  %v4896_v57 = vshll.u32 %v9376_v6, 16 }
 0x22a   : > { %7481 = vmatprep.mubr.msk.bf16.mxu1 %vm1791_vm11, %v7963_v54  ;;  %v9349_v54 = vrot.slane %v4800_v39, 5  ;;  %v4797_v21 = vor.u32 %v4796_v56, %v4793_v33  ;;  %v4865_v39 = vrot.slane %v4863_v30, 4  ;;  %v4858_v42 = vshll.u32 %v9374_v45, 16  ;;  %v766_v33 = vld [vmem:[#allocation2 + $0xd4] sm:$0x1] }
 0x22b   : > { %v4889_v24 = vrot.slane %v4887_v4, 4  ;;  %v767_v60 = vsel %vm8258_vm5, 0, %v766_v33 }
 0x22c   : > { %v4807_v47 = vor.u32 %v4806_v59, %v9349_v54  ;;  %v4798_v56 = vrot.slane %v4797_v21, 4  ;;  %v4869_v58 = vor.u32 %v4868_v25, %v4865_v39  ;;  %v4860_v22 = vrot.slane %v4858_v42, 5  ;;  %768 = vst [vmem:[#allocation2 + $0xd4] sm:$0x1] %v767_v60  ;;  %v7973_v42 = vld [vmem:[#allocation2 + $0xb4] sm:$0xff]  }
 0x22d   : > { %v9394_v21 = vrot.slane %v4896_v57, 5  ;;  %v4914_v39 = vshll.u32 %v4694_v46, 16  ;;  %v5489_v46 = vrot.slane %v9342_v20, 5  ;;  %v9591_v60 = vld [vmem:[#allocation2 + $0xb8] sm:$0xf] }
 0x22e   : > { %v4808_v12 = vrot.slane %v4807_v47, 4  ;;  %v4803_v25 = vsel %vm8309_vm10, %v4798_v56, %v9349_v54  ;;  %v4827_v54 = vsel %vm8309_vm10, %v4822_v1, %v9353_v37  ;;  %v9425_v56 = vrot.slane %v4882_v17, 5 }
 0x230   : > { %7380 = vmatmul.mubr.msk.bf16.gmra.mrb[44].mxu0 %vm1791_vm11, %v7968_v61  ;;  %v9370_v61 = vrot.slane %v4783_v44, 4  ;;  %v4900_v44 = vshrl.u32 %v9376_v6, 16 }
 0x231   : > { %7482 = vmatmul.mubr.msk.bf16.gmra.mrb[28].mxu1 %vm1791_vm11, %v7965_v5  ;;  %v4810_v5 = vshll.u32 %v9342_v20, 16  ;;  %v5503_v20 = vrot.slane %v9374_v45, 5 }
 0x232   : > { %7485 = vmatprep.mubr.msk.bf16.mxu1 %vm1791_vm11, %v7967_v62  ;;  %v4872_v62 = vshll.u32 %v9351_v40, 16  ;;  %v4902_v47 = vrot.slane %v4900_v44, 4  ;;  %v4789_v10 = vsel %vm8309_vm10, %v9370_v61, %v9340_v26  ;;  %v9412_v26 = vrot.slane %v4869_v58, 4  ;;  %v9447_v58 = vld [vmem:[#allocation2 + $0x88] sm:$0xf] }
 0x233   : > { %v4812_v59 = vrot.slane %v4810_v5, 5  ;;  %v4846_v5 = vrot.slane %v4845_v0, 4  ;;  %v4906_v0 = vshll.u32 %v9392_v27, 16  ;;  %v9439_v37 = vcombine.low %v4779_v63, %v4789_v10 }
 0x234   : > { %v9380_v3 = vrot.slane %v4872_v62, 5  ;;  %v4892_v62 = vrot.slane %v4890_v28, 5  ;;  %v4861_v28 = vsel %vm8309_vm10, %v4856_v8, %v4860_v22  ;;  %v4903_v44 = vor.u32 %v4902_v47, %v9394_v21 }
 0x235   : > { %v4851_v57 = vsel %vm8309_vm10, %v4846_v5, %v9357_v19  ;;  %v9460_v63 = vrot.slane %v4906_v0, 5  ;;  %v9470_v5 = vld [vmem:[#allocation2 + $0x94] sm:$0xf]  ;;  %v5479_v22 = vrot.slane %v9299_v49, 5  ;;  %v7975_v0 = vld [vmem:[#allocation2 + $0xcc] sm:$0xff]  }
 0x236   : > { %v4879_v30 = vor.u32 %v4878_v48, %v9380_v3  ;;  %v4813_v48 = vsel %vm8309_vm10, %v4808_v12, %v4812_v59  ;;  %v9427_v12 = vrot.slane %v4911_v13, 4  ;;  %v9429_v59 = vrot.slane %v4914_v39, 5  ;;  %v5402_v39 = vld [vmem:[#allocation2 + $0x3c] sm:$0xe]  ;;  %v5411_v49 = vld [vmem:[#allocation2 + $0xa8] sm:$0xe] }
 0x237   : > { %v9441_v19 = vcombine.low %v4803_v25, %v4813_v48  ;;  %v9445_v8 = vcombine.low %v4851_v57, %v4861_v28  ;;  %v5482_v28 = vrot.slane %v9306_v43, 5  ;;  %v5486_v57 = vrot.slane %v9317_v35, 5  ;;  %v5405_v35 = vld [vmem:[#allocation2 + $0x60] sm:$0xe] }
 0x238   : > { %v9414_v61 = vrot.slane %v4879_v30, 4  ;;  %v9462_v30 = vld [vmem:[#allocation2 + $0x90] sm:$0xf]  ;;  %v6876_v43 = vrot.slane %v5402_v39, 9 }
 0x239   : > { %7486 = vmatmul.mubr.msk.bf16.gmra.mrb[0].mxu1 %vm1791_vm11, %v7969_v23  ;;  %v7972_v23 = vld [vmem:[#allocation2 + $0xa8] sm:$0xff]   ;;  %v5488_v47 = vrot.slane %v5486_v57, 4 }
 0x23a   : > { %7489 = vmatprep.mubr.msk.bf16.mxu1 %vm1791_vm11, %v7970_v9  ;;  %v4832_v9 = vrot.slane %v4831_v50, 4  ;;  %v9401_v50 = vld [vmem:[#allocation2 + $0x7c] sm:$0xf] }
 0x23b   : > { %v4920_v33 = vshll.u32 %v9401_v50, 16  ;;  %v9507_v39 = vsel %vm9012_vm1, %v5488_v47, %v5489_v46 }
 0x23c   : > { %v4837_v4 = vsel %vm8309_vm10, %v4832_v9, %v4836_v11  ;;  %v9432_v9 = vld [vmem:[#allocation2 + $0x84] sm:$0xf] }
 0x23d   : > { %v7974_v11 = vld [vmem:[#allocation2 + $0xc0] sm:$0xff]   ;;  %v9443_v1 = vcombine.low %v4827_v54, %v4837_v4  ;;  %v9467_v2 = vrot.slane %v4920_v33, 5  ;;  %v5481_v4 = vrot.slane %v5479_v22, 4  ;;  %v5535_v54 = vrot.slane %v9470_v5, 5 }
 0x23f   : > { %v5537_v13 = vrot.slane %v5535_v54, 4 }
 0x241   : > { %7490 = vmatmul.mubr.msk.bf16.gmra.mrb[4].mxu1 %vm1791_vm11, %v7971_v38  ;;  %v4893_v38 = vor.u32 %v4892_v62, %v4889_v24  ;;  %v5401_v24 = vld [vmem:[#allocation2 + $0x30] sm:$0xe]  ;;  %v9465_v62 = vrot.slane %v4903_v44, 4  ;;  %v9499_v44 = vsel %vm9012_vm1, %v6876_v43, %v5486_v57  ;;  %v5407_v57 = vld [vmem:[#allocation2 + $0x78] sm:$0xe] }
 0x242   : > { %7493 = vmatprep.mubr.msk.bf16.mxu1 %vm1791_vm11, %v7972_v23  ;;  %v4924_v23 = vshrl.u32 %v9401_v50, 16  ;;  %v6875_v48 = vrot.slane %v5401_v24, 9  ;;  %v5406_v24 = vld [vmem:[#allocation2 + $0x6c] sm:$0xe]  ;;  %v9524_v43 = vld [vmem:[#allocation2 + $0x80] sm:$0x1] }
 0x243   : > { %v9458_v7 = vrot.slane %v4893_v38, 4  ;;  %v5403_v38 = vld [vmem:[#allocation2 + $0x48] sm:$0xe] }
 0x244   : > { %v9475_v10 = vrot.slane %v4924_v23, 4  ;;  %v9488_v33 = vsel %vm9012_vm1, %v6875_v48, %v5479_v22  ;;  %v9492_v23 = vsel %vm9012_vm1, %v5481_v4, %v5482_v28  ;;  %v6877_v16 = vrot.slane %v5403_v38, 9 }
 0x245   : > { %v5493_v22 = vrot.slane %v9322_v14, 5  ;;  %v5496_v48 = vrot.slane %v9355_v31, 5  ;;  %v5500_v4 = vrot.slane %v9326_v36, 5  ;;  %v5507_v38 = vrot.slane %v9351_v40, 5  ;;  %v5409_v14 = vld [vmem:[#allocation2 + $0x90] sm:$0xe] }
 0x246   : > { %v5510_v40 = vrot.slane %v9385_v18, 5 }
 0x247   : > { %v9517_v36 = vsel %vm9012_vm1, %v6877_v16, %v5493_v22  ;;  %v5495_v31 = vrot.slane %v5493_v22, 4  ;;  %v5502_v45 = vrot.slane %v5500_v4, 4  ;;  %v5509_v47 = vrot.slane %v5507_v38, 4  ;;  %v9535_v22 = vld [vmem:[#allocation2 + $0x8c] sm:$0x1] }
 0x249   : > { %7494 = vmatmul.mubr.msk.bf16.gmra.mrb[8].mxu1 %vm1791_vm11, %v7973_v42  ;;  %v9541_v18 = vsel %vm9012_vm1, %v5502_v45, %v5503_v20  ;;  %v9554_v20 = vld [vmem:[#allocation2 + $0xa0] sm:$0xf]  ;;  %v5410_v42 = vld [vmem:[#allocation2 + $0x9c] sm:$0xe] }
 0x24a   : > { %7497 = vmatprep.mubr.msk.bf16.mxu1 %vm1791_vm11, %v7974_v11  ;;  %v5404_v11 = vld [vmem:[#allocation2 + $0x54] sm:$0xe]  ;;  %10237 = vst [vmem:[#allocation10_spill] sm:$0xff] %v9541_v18 }
 0x24b   : > { %v6878_v28 = vrot.slane %v5404_v11, 9  ;;  %v6880_v11 = vrot.slane %v5406_v24, 9 }
 0x24d   : > { %v9521_v46 = vsel %vm9012_vm1, %v6878_v28, %v5500_v4  ;;  %v5517_v28 = vrot.slane %v9392_v27, 5  ;;  %v6881_v4 = vrot.slane %v5407_v57, 9  ;;  %v5521_v27 = vrot.slane %v9401_v50, 5  ;;  %v9573_v50 = vld [vmem:[#allocation2 + $0xac] sm:$0xf] }
 0x24e   : > { %v5531_v57 = vrot.slane %v9535_v22, 5 }
 0x251   : > { %7498 = vmatmul.mubr.msk.bf16.gmra.mrb[12].mxu1 %vm1791_vm11, %v7975_v0  ;;  %v6879_v0 = vrot.slane %v5405_v35, 9  ;;  %v5514_v35 = vrot.slane %v9376_v6, 5  ;;  %v10265_v53 = vld [vmem:[#allocation10_spill] sm:$0xff] }
 0x252   : > { %7503 = vmatprep.mubr.msk.bf16.mxu1 %vm1791_vm11, %v9329_v32  ;;  %v9528_v32 = vsel %vm9012_vm1, %v5495_v31, %v5496_v48  ;;  %v9545_v48 = vsel %vm9012_vm1, %v5509_v47, %v5510_v40  ;;  %v9548_v31 = vld [vmem:[#allocation2 + $0x98] sm:$0x1]  ;;  %v5524_v47 = vrot.slane %v9524_v43, 5  ;;  %v5528_v40 = vrot.slane %v9447_v58, 5 }
 0x253   : > { %v9532_v16 = vsel %vm9012_vm1, %v6879_v0, %v5507_v38  ;;  %10238 = vst [vmem:[#allocation11_spill] sm:$0xff] %v9545_v48  ;;  %v5408_v38 = vld [vmem:[#allocation2 + $0x84] sm:$0xe]  ;;  %v5516_v0 = vrot.slane %v5514_v35, 4  ;;  %v9558_v45 = vsel %vm9012_vm1, %v6880_v11, %v5514_v35  ;;  %v9571_v11 = vld [vmem:[#allocation2 + $0xa4] sm:$0x1]  ;;  %v10264_v41 = vcombine.low %v9517_v36, %v9528_v32 }
 0x254   : > { %10236 = vst [vmem:[#allocation9_spill] sm:$0xff] %v9532_v16  ;;  %10239 = vst [vmem:[#allocation8_spill] sm:$0xff] %v9558_v45  ;;  %v6882_v24 = vrot.slane %v5408_v38, 9  ;;  %v9575_v35 = vld [vmem:[#allocation2 + $0xb0] sm:$0x1]  ;;  %v5523_v38 = vrot.slane %v5521_v27, 4 }
 0x255   : > { %v9565_v6 = vsel %vm9012_vm1, %v5516_v0, %v5517_v28  ;;  %v9581_v28 = vsel %vm9012_vm1, %v6881_v4, %v5521_v27  ;;  %v6883_v0 = vrot.slane %v5409_v14, 9  ;;  %v5530_v25 = vrot.slane %v5528_v40, 4  ;;  %v9593_v4 = vld [vmem:[#allocation2 + $0xc4] sm:$0xf]  ;;  %v9604_v27 = vld [vmem:[#allocation2 + $0xbc] sm:$0x1] }
 0x256   : > { %10240 = vst [vmem:[#allocation12_spill] sm:$0xff] %v9565_v6  ;;  %10241 = vst [vmem:[#allocation13_spill] sm:$0xff] %v9581_v28  ;;  %v5538_v17 = vrot.slane %v9548_v31, 5  ;;  %v9597_v14 = vsel %vm9012_vm1, %v5523_v38, %v5524_v47  ;;  %v5545_v38 = vrot.slane %v9571_v11, 5  ;;  %v6885_v48 = vrot.slane %v5411_v49, 9 }
 0x257   : > { %10243 = vst [vmem:[#allocation15_spill] sm:$0xff] %v9597_v14  ;;  %v9610_v6 = vsel %vm9012_vm1, %v5530_v25, %v5531_v57  ;;  %v9621_v14 = vld [vmem:[#allocation2 + $0xc8] sm:$0x1]  ;;  %v5556_v57 = vrot.slane %v9591_v60, 5  ;;  %v5559_v49 = vrot.slane %v9604_v27, 5 }
 0x258   : > { %10245 = vst [vmem:[#allocation7_spill] sm:$0xff] %v9610_v6  ;;  %v9614_v47 = vsel %vm9012_vm1, %v5537_v13, %v5538_v17  ;;  %v5549_v17 = vrot.slane %v9573_v50, 5  ;;  %v5552_v13 = vrot.slane %v9575_v35, 5  ;;  %v9636_v6 = vld [vmem:[#allocation2 + $0xd0] sm:$0xf]  ;;  %v5566_v18 = vrot.slane %v9621_v14, 5 }
 0x259   : > { %7504 = vmatmul.mubr.msk.bf16.vlgmr.msra.gmra.mrb[16].mxu1 %vm1791_vm11, %v9360_v34  ;;  %v9588_v34 = vsel %vm9012_vm1, %v6882_v24, %v5528_v40  ;;  %v5542_v24 = vrot.slane %v9554_v20, 5  ;;  %10246 = vst [vmem:[#allocation16_spill] sm:$0xff] %v9614_v47  ;;  %v5413_v40 = vld [vmem:[#allocation2 + $0xc0] sm:$0xe]  ;;  %v5563_v47 = vrot.slane %v9593_v4, 5 }
 0x25a   : > { %7536 = vmatpush3.bf16.msra.mxu1 %v9315_v29  ;;  %7507 = vmatprep.mubr.msk.bf16.mxu1 %vm1791_vm11, %v9439_v37  ;;  %10242 = vst [vmem:[#allocation14_spill] sm:$0xff] %v9588_v34  ;;  %v9601_v29 = vsel %vm9012_vm1, %v6883_v0, %v5535_v54  ;;  %v6884_v37 = vrot.slane %v5410_v42, 9  ;;  %v5412_v54 = vld [vmem:[#allocation2 + $0xb4] sm:$0xe]  ;;  %v5551_v34 = vrot.slane %v5549_v17, 4  ;;  %v6887_v28 = vrot.slane %v5413_v40, 9 }
 0x25b   : > { %10244 = vst [vmem:[#allocation6_spill] sm:$0xff] %v9601_v29  ;;  %v5544_v45 = vrot.slane %v5542_v24, 4  ;;  %v6886_v0 = vrot.slane %v5412_v54, 9  ;;  %v5414_v29 = vld [vmem:[#allocation2 + $0xcc] sm:$0xe]  ;;  %v5558_v54 = vrot.slane %v5556_v57, 4 }
 0x25c   : > { %v9625_v25 = vsel %vm9012_vm1, %v6884_v37, %v5542_v24  ;;  %v9642_v24 = vsel %vm9012_vm1, %v6885_v48, %v5549_v17  ;;  %v5565_v16 = vrot.slane %v5563_v47, 4  ;;  %v9657_v48 = vsel %vm9012_vm1, %v5551_v34, %v5552_v13 }
 0x25d   : > { %v9632_v42 = vsel %vm9012_vm1, %v5544_v45, %v5545_v38  ;;  %v9646_v45 = vld [vmem:[#allocation2 + $0xd4] sm:$0x1]  ;;  %v9650_v38 = vsel %vm9012_vm1, %v6886_v0, %v5556_v57  ;;  %v6888_v40 = vrot.slane %v5414_v29, 9  ;;  %v9665_v57 = vsel %vm9012_vm1, %v5558_v54, %v5559_v49 }
 0x25e   : > { %10247 = vst [vmem:[#allocation17_spill] sm:$0xff] %v9650_v38  ;;  %v5573_v17 = vrot.slane %v9646_v45, 5  ;;  %10248 = vst [vmem:[#allocation18_spill] sm:$0xff] %v9665_v57  ;;  %v9669_v37 = vsel %vm9012_vm1, %v6887_v28, %v5563_v47  ;;  %v4927_v54 = vor.u32 %v9475_v10, %v9467_v2  ;;  %v4930_v28 = vshll.u32 %v9524_v43, 16  ;;  %v4703_v38 = vld [vmem:[#allocation2 + $0x9c] sm:$0xf] }
 0x25f   : > { %10249 = vst [vmem:[#allocation19_spill] sm:$0xff] %v9669_v37  ;;  %v10251_v47 = vshrl.u32 %v9432_v9, 16  ;;  %v10253_v34 = vshll.u32 %v9447_v58, 16  ;;  %v10254_v29 = vshrl.u32 %v9447_v58, 16  ;;  %v10256_v43 = vshll.u32 %v9462_v30, 16 }
 0x261   : > { %7508 = vmatmul.mubr.msk.bf16.gmra.mrb[20].mxu1 %vm1791_vm11, %v9441_v19  ;;  %v5570_v19 = vrot.slane %v9636_v6, 5  ;;  %v9692_v57 = vrot.slane %v10253_v34, 5  ;;  %v10258_v34 = vshrl.u32 %v9470_v5, 16  ;;  %v10276_v32 = vld [vmem:[#allocation14_spill] sm:$0xff] }
 0x262   : > { %7511 = vmatprep.mubr.msk.bf16.mxu1 %vm1791_vm11, %v9443_v1  ;;  %v9673_v1 = vsel %vm9012_vm1, %v5565_v16, %v5566_v18  ;;  %v4937_v16 = vrot.slane %v10251_v47, 4  ;;  %v10252_v18 = vshll.u32 %v9432_v9, 16  ;;  %v4964_v47 = vrot.slane %v10256_v43, 5 }
 0x263   : > { %10250 = vst [vmem:[#allocation20_spill] sm:$0xff] %v9673_v1  ;;  %v9681_v13 = vsel %vm9012_vm1, %v6888_v40, %v5570_v19  ;;  %v5572_v49 = vrot.slane %v5570_v19, 4  ;;  %v4950_v40 = vrot.slane %v10254_v29, 4  ;;  %v10255_v19 = vshrl.u32 %v9462_v30, 16 }
 0x264   : > { %v4940_v0 = vrot.slane %v10252_v18, 5  ;;  %v10257_v9 = vshll.u32 %v9470_v5, 16  ;;  %v4974_v37 = vrot.slane %v10258_v34, 4  ;;  %v10260_v30 = vsel %vm8309_vm10, %v9412_v26, %v9380_v3 }
 0x265   : > { %v4961_v1 = vrot.slane %v10255_v19, 4  ;;  %v9700_v10 = vsel %vm9012_vm1, %v5572_v49, %v5573_v17  ;;  %v10259_v17 = vsel %vm8309_vm10, %v9414_v61, %v9425_v56  ;;  %v4909_v5 = vsel %vm8309_vm10, %v9465_v62, %v9460_v63 }
 0x266   : > { %v9706_v18 = vrot.slane %v10257_v9, 5  ;;  %v6904_v58 = vcombine.low %v9681_v13, %v9700_v10  ;;  %v6846_v29 = vcombine.low %v10260_v30, %v10259_v17  ;;  %v10261_v49 = vor.u32 %v9429_v59, %v9427_v12 }
 0x267   : > { %v4899_v61 = vsel %vm8309_vm10, %v9458_v7, %v9394_v21  ;;  %v4928_v56 = vrot.slane %v4927_v54, 4  ;;  %v4941_v3 = vor.u32 %v4940_v0, %v4937_v16  ;;  %v4951_v26 = vor.u32 %v4950_v40, %v9692_v57  ;;  %v4706_v0 = vld [vmem:[#allocation2 + $0xa8] sm:$0xf] }
 0x268   : > { %v4918_v19 = vrot.slane %v10261_v49, 4  ;;  %v4983_v43 = vshrl.u32 %v4703_v38, 16  ;;  %v4986_v63 = vshll.u32 %v4703_v38, 16  ;;  %v6847_v62 = vcombine.low %v4899_v61, %v4909_v5 }
 0x269   : > { %7512 = vmatmul.mubr.msk.bf16.gmra.mrb[24].mxu1 %vm1791_vm11, %v9445_v8  ;;  %v4932_v9 = vrot.slane %v4930_v28, 5  ;;  %v4965_v12 = vor.u32 %v4964_v47, %v4961_v1  ;;  %v4975_v59 = vor.u32 %v4974_v37, %v9706_v18  ;;  %v4954_v34 = vshll.u32 %v9535_v22, 16 }
 0x26a   : > { %7515 = vmatprep.mubr.msk.bf16.mxu1 %vm1791_vm11, %v6846_v29  ;;  %v4923_v8 = vsel %vm8309_vm10, %v4918_v19, %v9467_v2  ;;  %v4992_v21 = vshll.u32 %v9554_v20, 16  ;;  %v4996_v7 = vshrl.u32 %v9554_v20, 16  ;;  %v4978_v38 = vshll.u32 %v9548_v31, 16 }
 0x26b   : > { %v4933_v54 = vsel %vm8309_vm10, %v4928_v56, %v4932_v9  ;;  %v5016_v1 = vshll.u32 %v9573_v50, 16  ;;  %v5020_v37 = vshrl.u32 %v9573_v50, 16  ;;  %v4942_v28 = vrot.slane %v4941_v3, 4  ;;  %v4709_v50 = vld [vmem:[#allocation2 + $0xb4] sm:$0xf] }
 0x26c   : > { %v4952_v16 = vrot.slane %v4951_v26, 4  ;;  %v4985_v40 = vrot.slane %v4983_v43, 4  ;;  %v4988_v2 = vrot.slane %v4986_v63, 5  ;;  %v4966_v47 = vrot.slane %v4965_v12, 4 }
 0x26d   : > { %v4976_v22 = vrot.slane %v4975_v59, 4  ;;  %v5007_v17 = vshrl.u32 %v4706_v0, 16  ;;  %v5010_v30 = vshll.u32 %v4706_v0, 16  ;;  %v6848_v29 = vcombine.low %v4923_v8, %v4933_v54 }
 0x26e   : > { %v4956_v20 = vrot.slane %v4954_v34, 5  ;;  %v9749_v5 = vrot.slane %v4992_v21, 5  ;;  %v4998_v49 = vrot.slane %v4996_v7, 4  ;;  %v4980_v31 = vrot.slane %v4978_v38, 5  ;;  %v4712_v21 = vld [vmem:[#allocation2 + $0xc0] sm:$0xf] }
 0x26f   : > { %v9752_v19 = vrot.slane %v5016_v1, 5  ;;  %v5022_v61 = vrot.slane %v5020_v37, 4  ;;  %v4947_v56 = vsel %vm8309_vm10, %v4942_v28, %v9692_v57  ;;  %v4989_v26 = vor.u32 %v4988_v2, %v4985_v40 }
 0x270   : > { %v4957_v3 = vsel %vm8309_vm10, %v4952_v16, %v4956_v20  ;;  %v5002_v43 = vshll.u32 %v9571_v11, 16  ;;  %v4971_v63 = vsel %vm8309_vm10, %v4966_v47, %v9706_v18  ;;  %v5009_v9 = vrot.slane %v5007_v17, 4  ;;  %v4715_v47 = vld [vmem:[#allocation2 + $0xcc] sm:$0xf] }
 0x271   : > { %7516 = vmatmul.mubr.msk.bf16.gmra.mrb[28].mxu1 %vm1791_vm11, %v6847_v62  ;;  %v4981_v62 = vsel %vm8309_vm10, %v4976_v22, %v4980_v31  ;;  %v5012_v12 = vrot.slane %v5010_v30, 5  ;;  %v4999_v59 = vor.u32 %v4998_v49, %v9749_v5  ;;  %v5031_v8 = vshrl.u32 %v4709_v50, 16 }
 0x272   : > { %7519 = vmatprep.mubr.msk.bf16.mxu1 %vm1791_vm11, %v6848_v29  ;;  %v5040_v57 = vshll.u32 %v9591_v60, 16  ;;  %v5044_v34 = vshrl.u32 %v9591_v60, 16  ;;  %v5023_v7 = vor.u32 %v5022_v61, %v9752_v19  ;;  %v5034_v11 = vshll.u32 %v4709_v50, 16 }
 0x273   : > { %v5064_v0 = vshll.u32 %v9593_v4, 16  ;;  %v5068_v18 = vshrl.u32 %v9593_v4, 16  ;;  %v6849_v54 = vcombine.low %v4947_v56, %v4957_v3  ;;  %v6850_v38 = vcombine.low %v4971_v63, %v4981_v62 }
 0x274   : > { %v4990_v1 = vrot.slane %v4989_v26, 4  ;;  %v5004_v37 = vrot.slane %v5002_v43, 5  ;;  %v5013_v28 = vor.u32 %v5012_v12, %v5009_v9  ;;  %v5026_v16 = vshll.u32 %v9575_v35, 16 }
 0x275   : > { %v5055_v40 = vshrl.u32 %v4712_v21, 16  ;;  %v5058_v2 = vshll.u32 %v4712_v21, 16  ;;  %v5000_v22 = vrot.slane %v4999_v59, 4  ;;  %v5033_v60 = vrot.slane %v5031_v8, 4 }
 0x276   : > { %v5042_v17 = vrot.slane %v5040_v57, 5  ;;  %v5046_v30 = vrot.slane %v5044_v34, 4  ;;  %v5024_v29 = vrot.slane %v5023_v7, 4  ;;  %v5036_v20 = vrot.slane %v5034_v11, 5 }
 0x277   : > { %v5066_v49 = vrot.slane %v5064_v0, 5  ;;  %v5070_v4 = vrot.slane %v5068_v18, 4  ;;  %v5079_v31 = vshrl.u32 %v4715_v47, 16  ;;  %v5082_v61 = vshll.u32 %v4715_v47, 16 }
 0x278   : > { %v5088_v50 = vshll.u32 %v9636_v6, 16  ;;  %v5092_v35 = vshrl.u32 %v9636_v6, 16  ;;  %v5014_v56 = vrot.slane %v5013_v28, 4  ;;  %v5028_v3 = vrot.slane %v5026_v16, 5 }
 0x279   : > { %7520 = vmatmul.mubr.msk.bf16.gmra.mrb[0].mxu1 %vm1791_vm11, %v6849_v54  ;;  %v5057_v26 = vrot.slane %v5055_v40, 4  ;;  %v5060_v43 = vrot.slane %v5058_v2, 5  ;;  %v4995_v63 = vsel %vm8309_vm10, %v4990_v1, %v9749_v5  ;;  %v5005_v62 = vsel %vm8309_vm10, %v5000_v22, %v5004_v37 }
 0x27a   : > { %7523 = vmatprep.mubr.msk.bf16.mxu1 %vm1791_vm11, %v6850_v38  ;;  %v5047_v9 = vor.u32 %v5046_v30, %v5042_v17  ;;  %v5029_v12 = vsel %vm8309_vm10, %v5024_v29, %v5028_v3  ;;  %v5037_v59 = vor.u32 %v5036_v20, %v5033_v60  ;;  %v5050_v8 = vshll.u32 %v9604_v27, 16 }
 0x27b   : > { %v5071_v57 = vor.u32 %v5070_v4, %v5066_v49  ;;  %v5081_v6 = vrot.slane %v5079_v31, 4  ;;  %v5084_v34 = vrot.slane %v5082_v61, 5  ;;  %v5090_v21 = vrot.slane %v5088_v50, 5  ;;  %v5955_v31 = vld [vmem:[%s10174_s5] sm:$0x3] }
 0x27c   : > { %v5094_v7 = vrot.slane %v5092_v35, 4  ;;  %v6851_v11 = vcombine.low %v4995_v63, %v5005_v62  ;;  %v5019_v5 = vsel %vm8309_vm10, %v5014_v56, %v9752_v19  ;;  %v5061_v0 = vor.u32 %v5060_v43, %v5057_v26  ;;  %7871 = vmatprep.subr.msk.bf16.mxu0 %vm1840_vm7, %v5955_v31  ;;  %v5399_v35 = vld [vmem:[#allocation2 + $0x18] sm:$0xe] }
 0x27d   : > { %v5074_v18 = vshll.u32 %v9621_v14, 16  ;;  %v6852_v54 = vcombine.low %v5019_v5, %v5029_v12  ;;  %v5048_v38 = vrot.slane %v5047_v9, 4  ;;  %v5052_v1 = vrot.slane %v5050_v8, 5  ;;  %v10271_v5 = vld [vmem:[#allocation12_spill] sm:$0xff] }
 0x27e   : > { %v5072_v37 = vrot.slane %v5071_v57, 4  ;;  %v5038_v27 = vrot.slane %v5037_v59, 4  ;;  %v5085_v28 = vor.u32 %v5084_v34, %v5081_v6  ;;  %v5095_v16 = vor.u32 %v5094_v7, %v5090_v21  ;;  %v5400_v59 = vld [vmem:[#allocation2 + $0x24] sm:$0xe]  ;;  %v10267_v7 = vld [vmem:[#allocation9_spill] sm:$0xff] }
 0x27f   : > { %v5098_v40 = vshll.u32 %v9646_v45, 16  ;;  %v5062_v2 = vrot.slane %v5061_v0, 4  ;;  %v5076_v47 = vrot.slane %v5074_v18, 5  ;;  %v5053_v19 = vsel %vm8309_vm10, %v5048_v38, %v5052_v1  ;;  %v10274_v0 = vld [vmem:[#allocation15_spill] sm:$0xff]  ;;  %v10280_v38 = vld [vmem:[#allocation16_spill] sm:$0xff] }
 0x280   : > { %v5465_v22 = vrot.slane %v9278_v52, 5  ;;  %v5043_v60 = vsel %vm8309_vm10, %v5038_v27, %v5042_v17  ;;  %v5086_v30 = vrot.slane %v5085_v28, 4  ;;  %v5096_v29 = vrot.slane %v5095_v16, 4  ;;  %v10277_v18 = vld [vmem:[#allocation7_spill] sm:$0xff]  ;;  %v10284_v28 = vld [vmem:[#allocation17_spill] sm:$0xff]  ;;  %v10285_v16 = vld [vmem:[#allocation18_spill] sm:$0xff] }
 0x281   : > { %7524 = vmatmul.mubr.msk.bf16.gmra.mrb[4].mxu1 %vm1791_vm11, %v6851_v11  ;;  %v5077_v14 = vsel %vm8309_vm10, %v5072_v37, %v5076_v47  ;;  %v5100_v20 = vrot.slane %v5098_v40, 5  ;;  %v6853_v4 = vcombine.low %v5043_v60, %v5053_v19  ;;  %v5067_v45 = vsel %vm8309_vm10, %v5062_v2, %v5066_v49  ;;  %v10268_v11 = vld [vmem:[#allocation11_spill] sm:$0xff]  ;;  %v10288_v47 = vld [vmem:[#allocation20_spill] sm:$0xff] }
 0x282   : > { %7527 = vmatprep.mubr.msk.bf16.mxu1 %vm1791_vm11, %v6852_v54  ;;  %v6854_v61 = vcombine.low %v5067_v45, %v5077_v14  ;;  %v6012_v50 = vsel %vm1840_vm7, %v5955_v31, 0  ;;  %v5467_v52 = vrot.slane %v5465_v22, 4  ;;  %v5091_v17 = vsel %vm8309_vm10, %v5086_v30, %v5090_v21  ;;  %v10279_v54 = vld [vmem:[#allocation6_spill] sm:$0xff]  ;;  %v10287_v2 = vld [vmem:[#allocation19_spill] sm:$0xff] }
 0x283   : > { %7570 = vmatpush3.bf16.msra.mxu0 %v6012_v50  ;;  %v5101_v49 = vsel %vm8309_vm10, %v5096_v29, %v5100_v20  ;;  %v5468_v56 = vrot.slane %v9290_v55, 5  ;;  %v5472_v3 = vrot.slane %v9284_v51, 5  ;;  %v6873_v43 = vrot.slane %v5399_v35, 9 }
 0x284   : > { %v6855_v26 = vcombine.low %v5091_v17, %v5101_v49  ;;  %v6874_v55 = vrot.slane %v5400_v59, 9  ;;  %v10262_v6 = vcombine.low %v9488_v33, %v9492_v23  ;;  %v10263_v34 = vcombine.low %v9499_v44, %v9507_v39  ;;  %v10270_v23 = vld [vmem:[#allocation8_spill] sm:$0xff]  ;;  %v10273_v39 = vld [vmem:[#allocation13_spill] sm:$0xff] }
 0x285   : > { %v5469_v63 = vsel %vm9012_vm1, %v5467_v52, %v5468_v56  ;;  %v5466_v62 = vsel %vm9012_vm1, %v6873_v43, %v5465_v22  ;;  %v5474_v12 = vrot.slane %v5472_v3, 4  ;;  %v10266_v21 = vcombine.low %v9521_v46, %v10265_v53 }
 0x286   : > { %v6889_v9 = vcombine.low %v5466_v62, %v5469_v63  ;;  %v5473_v8 = vsel %vm9012_vm1, %v6874_v55, %v5472_v3  ;;  %v10269_v33 = vcombine.low %v10267_v7, %v10268_v11  ;;  %v10272_v44 = vcombine.low %v10270_v23, %v10271_v5 }
 0x287   : > { %v5476_v51 = vsel %vm9012_vm1, %v5474_v12, %v5475_v15  ;;  %v10275_v36 = vcombine.low %v10273_v39, %v10274_v0  ;;  %v10278_v46 = vcombine.low %v10276_v32, %v10277_v18  ;;  %v10281_v1 = vcombine.low %v10279_v54, %v10280_v38 }
 0x288   : > { %v6890_v57 = vcombine.low %v5473_v8, %v5476_v51  ;;  %v10282_v37 = vcombine.low %v9625_v25, %v9632_v42  ;;  %v10283_v27 = vcombine.low %v9642_v24, %v9657_v48  ;;  %v10286_v40 = vcombine.low %v10284_v28, %v10285_v16  ;;  %v9925_v51 = vld [vmem:[%s10173_s4] ss:$0 sm:$0xff] }
 0x289   : > { %7528 = vmatmul.mubr.msk.bf16.gmra.mrb[8].mxu1 %vm1791_vm11, %v6853_v4  ;;  %v10289_v19 = vcombine.low %v10287_v2, %v10288_v47 }
 0x28a   : > { %7531 = vmatprep.mubr.msk.bf16.mxu1 %vm1791_vm11, %v6854_v61 }
 0x291   : > { %7532 = vmatmul.mubr.msk.bf16.gmra.mrb[12].mxu1 %vm1791_vm11, %v6855_v26 }
 0x292   : > { %7537 = vmatprep.mubr.msk.bf16.mxu1 %vm1791_vm11, %v6889_v9 }
 0x299   : > { %7538 = vmatmul.mubr.msk.bf16.vlgmr.msra.gmra.mrb[16].mxu1 %vm1791_vm11, %v6890_v57 }
 0x29a   : > { %7541 = vmatprep.mubr.msk.bf16.mxu1 %vm1791_vm11, %v10262_v6 }
 0x2a1   : > { %7542 = vmatmul.mubr.msk.bf16.gmra.mrb[20].mxu1 %vm1791_vm11, %v10263_v34 }
 0x2a2   : > { %7545 = vmatprep.mubr.msk.bf16.mxu1 %vm1791_vm11, %v10264_v41 }
 0x2a9   : > { %7546 = vmatmul.mubr.msk.bf16.gmra.mrb[24].mxu1 %vm1791_vm11, %v10266_v21 }
 0x2aa   : > { %7549 = vmatprep.mubr.msk.bf16.mxu1 %vm1791_vm11, %v10269_v33 }
 0x2b1   : > { %7550 = vmatmul.mubr.msk.bf16.gmra.mrb[28].mxu1 %vm1791_vm11, %v10272_v44 }
 0x2b2   : > { %7553 = vmatprep.mubr.msk.bf16.mxu1 %vm1791_vm11, %v10275_v36 }
 0x2b9   : > { %7554 = vmatmul.mubr.msk.bf16.gmra.mrb[0].mxu1 %vm1791_vm11, %v10278_v46 }
 0x2ba   : > { %7557 = vmatprep.mubr.msk.bf16.mxu1 %vm1791_vm11, %v10281_v1 }
 0x2c1   : > { %7558 = vmatmul.mubr.msk.bf16.gmra.mrb[4].mxu1 %vm1791_vm11, %v10282_v37 }
 0x2c2   : > { %7561 = vmatprep.mubr.msk.bf16.mxu1 %vm1791_vm11, %v10283_v27 }
 0x2c9   : > { %7562 = vmatmul.mubr.msk.bf16.gmra.mrb[8].mxu1 %vm1791_vm11, %v10286_v40 }
 0x2ca   : > { %7565 = vmatprep.mubr.msk.bf16.mxu1 %vm1791_vm11, %v10289_v19 }
 0x2cb   : > { %v9878_v14 = vpop.f32.mrb[48].mxu0 }
 0x2cc   : > { %v9880_v42 = vpop.f32.mrb[49].mxu0 }
 0x2cd   : > { %v9882_v25 = vpop.f32.mrb[50].mxu0 }
 0x2ce   : > { %v9884_v22 = vpop.f32.mrb[51].mxu0 }
 0x2d1   : > { %7566 = vmatmul.mubr.msk.bf16.gmra.mrb[12].mxu1 %vm1791_vm11, %v6904_v58 }
 0x2d3   : > { %v9890_v24 = vpop.f32.mrb[52].mxu0 }
 0x2d4   : > { %v9892_v48 = vpop.f32.mrb[53].mxu0 }
 0x2d5   : > { %v9894_v60 = vpop.f32.mrb[54].mxu0 }
 0x2d6   : > { %v9896_v30 = vpop.f32.mrb[55].mxu0 }
 0x2db   : > { %v9898_v29 = vpop.f32.mrb[56].mxu0 }
 0x2dc   : > { %v9900_v20 = vpop.f32.mrb[57].mxu0 }
 0x2dd   : > { %v9902_v4 = vpop.f32.mrb[58].mxu0 }
 0x2de   : > { %v9904_v45 = vpop.f32.mrb[59].mxu0 }
 0x2e3   : > { %v9906_v31 = vpop.f32.mrb[60].mxu0 }
 0x2e4   : > { %v9908_v13 = vpop.f32.mrb[61].mxu0 }
 0x2e5   : > { %v9910_v10 = vpop.f32.mrb[62].mxu0 }
 0x2e6   : > { %v9912_v58 = vpop.f32.mrb[63].mxu0 }
 0x2eb   : > { %v7369_v61 = vpop.f32.mrb[32].mxu0 }
 0x2ec   : > { %v2955_v50 = vpop.f32.mrb[33].mxu0 }
 0x2ed   : > { %v7370_v52 = vpop.f32.mrb[34].mxu0 }
 0x2ee   : > { %v2958_v17 = vpop.f32.mrb[35].mxu0 }
 0x2f3   : > { %v7373_v49 = vpop.f32.mrb[36].mxu0 }
 0x2f4   : > { %v2971_v35 = vpop.f32.mrb[37].mxu0 }
 0x2f5   : > { %v7374_v56 = vpop.f32.mrb[38].mxu0 }
 0x2f6   : > { %v2974_v3 = vpop.f32.mrb[39].mxu0 }
 0x2fb   : > { %v7377_v26 = vpop.f32.mrb[40].mxu0 }
 0x2fc   : > { %v2987_v43 = vpop.f32.mrb[41].mxu0 }
 0x2fd   : > { %v7378_v63 = vpop.f32.mrb[42].mxu0 }
 0x2fe   : > { %v2990_v62 = vpop.f32.mrb[43].mxu0 }
 0x303   : > { %v9914_v9 = vpop.f32.mrb[44].mxu0 }
 0x304   : > { %v9916_v12 = vpop.f32.mrb[45].mxu0 }
 0x305   : > { %v9918_v59 = vpop.f32.mrb[46].mxu0 }
 0x306   : > { %v9920_v15 = vpop.f32.mrb[47].mxu0 }
 0x36c   : > { %v7539_v55 = vpop.f32.mrb[16].mxu1 }
 0x36d   : > { %v7605_v8 = vadd.f32 %v7539_v55, %v7369_v61  ;;  %v5709_v57 = vpop.f32.mrb[17].mxu1 }
 0x36e   : > { %v7606_v6 = vadd.f32 %v5709_v57, %v2955_v50  ;;  %v7540_v34 = vpop.f32.mrb[18].mxu1 }
 0x36f   : > { %v5877_v41 = vadd.f32 %v7605_v8, %v9925_v51  ;;  %v7607_v53 = vadd.f32 %v7540_v34, %v7370_v52  ;;  %v5712_v21 = vpop.f32.mrb[19].mxu1 }
 0x370   : > { %v5875_v7 = vadd.f32 %v7606_v6, %v9925_v51  ;;  %v7608_v11 = vadd.f32 %v5712_v21, %v2958_v17 }
 0x371   : > { %v5878_v33 = vadd.f32 %v7607_v53, %v9925_v51  ;;  %v5909_v5 = vmax.f32 %v5877_v41, 0.0 }
 0x372   : > { %v5876_v23 = vadd.f32 %v7608_v11, %v9925_v51  ;;  %v5907_v39 = vmax.f32 %v5875_v7, 0.0 }
 0x373   : > { %v5910_v44 = vmax.f32 %v5878_v33, 0.0 }
 0x374   : > { %v5908_v0 = vmax.f32 %v5876_v23, 0.0  ;;  %v7543_v36 = vpop.f32.mrb[20].mxu1 }
 0x375   : > { %v5940_v32 = vpack.c.bf16 %v5910_v44, %v5909_v5  ;;  %v7609_v18 = vadd.f32 %v7543_v36, %v7373_v49  ;;  %v5725_v46 = vpop.f32.mrb[21].mxu1 }
 0x376   : > { %v5939_v54 = vpack.c.bf16 %v5908_v0, %v5907_v39  ;;  %v7610_v38 = vadd.f32 %v5725_v46, %v2971_v35  ;;  %v7544_v1 = vpop.f32.mrb[22].mxu1 }
 0x377   : > { %v5881_v37 = vadd.f32 %v7609_v18, %v9925_v51  ;;  %v7611_v27 = vadd.f32 %v7544_v1, %v7374_v56  ;;  %v5728_v28 = vpop.f32.mrb[23].mxu1 }
 0x378   : > { %v5879_v16 = vadd.f32 %v7610_v38, %v9925_v51  ;;  %v7612_v40 = vadd.f32 %v5728_v28, %v2974_v3  ;;  %7571 = vmatprep.mubr.msk.bf16.mxu0 %vm1791_vm11, %v5939_v54 }
 0x379   : > { %v5882_v2 = vadd.f32 %v7611_v27, %v9925_v51  ;;  %7572 = vmatmul.mubr.msk.bf16.vlgmr.msra.gmra.mrb[64].mxu0 %vm1791_vm11, %v5940_v32  ;;  %v5913_v19 = vmax.f32 %v5881_v37, 0.0 }
 0x37a   : > { %v5880_v47 = vadd.f32 %v7612_v40, %v9925_v51  ;;  %v5911_v50 = vmax.f32 %v5879_v16, 0.0 }
 0x37b   : > { %v5914_v61 = vmax.f32 %v5882_v2, 0.0 }
 0x37c   : > { %v5912_v52 = vmax.f32 %v5880_v47, 0.0  ;;  %v7547_v17 = vpop.f32.mrb[24].mxu1 }
 0x37d   : > { %v5942_v49 = vpack.c.bf16 %v5914_v61, %v5913_v19  ;;  %v7613_v35 = vadd.f32 %v7547_v17, %v7377_v26  ;;  %v5741_v56 = vpop.f32.mrb[25].mxu1 }
 0x37e   : > { %v5941_v55 = vpack.c.bf16 %v5912_v52, %v5911_v50  ;;  %v7614_v8 = vadd.f32 %v5741_v56, %v2987_v43  ;;  %v7548_v57 = vpop.f32.mrb[26].mxu1 }
 0x37f   : > { %v5885_v3 = vadd.f32 %v7613_v35, %v9925_v51  ;;  %v7615_v6 = vadd.f32 %v7548_v57, %v7378_v63  ;;  %v5744_v34 = vpop.f32.mrb[27].mxu1 }
 0x380   : > { %v5883_v41 = vadd.f32 %v7614_v8, %v9925_v51  ;;  %v7616_v53 = vadd.f32 %v5744_v34, %v2990_v62  ;;  %7575 = vmatprep.mubr.msk.bf16.mxu0 %vm1791_vm11, %v5941_v55 }
 0x381   : > { %v5886_v21 = vadd.f32 %v7615_v6, %v9925_v51  ;;  %7576 = vmatmul.mubr.msk.bf16.gmra.mrb[68].mxu0 %vm1791_vm11, %v5942_v49  ;;  %v5917_v26 = vmax.f32 %v5885_v3, 0.0 }
 0x382   : > { %v5884_v7 = vadd.f32 %v7616_v53, %v9925_v51  ;;  %v5915_v33 = vmax.f32 %v5883_v41, 0.0 }
 0x383   : > { %v5918_v11 = vmax.f32 %v5886_v21, 0.0 }
 0x384   : > { %v5916_v43 = vmax.f32 %v5884_v7, 0.0  ;;  %v7551_v23 = vpop.f32.mrb[28].mxu1 }
 0x385   : > { %v5944_v5 = vpack.c.bf16 %v5918_v11, %v5917_v26  ;;  %v7617_v63 = vadd.f32 %v7551_v23, %v9914_v9  ;;  %v5757_v44 = vpop.f32.mrb[29].mxu1 }
 0x386   : > { %v5943_v39 = vpack.c.bf16 %v5916_v43, %v5915_v33  ;;  %v7618_v62 = vadd.f32 %v5757_v44, %v9916_v12  ;;  %v7552_v0 = vpop.f32.mrb[30].mxu1 }
 0x387   : > { %v5889_v36 = vadd.f32 %v7617_v63, %v9925_v51  ;;  %v7619_v32 = vadd.f32 %v7552_v0, %v9918_v59  ;;  %v5760_v18 = vpop.f32.mrb[31].mxu1 }
 0x388   : > { %v5887_v46 = vadd.f32 %v7618_v62, %v9925_v51  ;;  %v7620_v54 = vadd.f32 %v5760_v18, %v9920_v15  ;;  %7579 = vmatprep.mubr.msk.bf16.mxu0 %vm1791_vm11, %v5943_v39 }
 0x389   : > { %v5890_v38 = vadd.f32 %v7619_v32, %v9925_v51  ;;  %7580 = vmatmul.mubr.msk.bf16.gmra.mrb[72].mxu0 %vm1791_vm11, %v5944_v5  ;;  %v5921_v1 = vmax.f32 %v5889_v36, 0.0 }
 0x38a   : > { %v5888_v9 = vadd.f32 %v7620_v54, %v9925_v51  ;;  %v5919_v37 = vmax.f32 %v5887_v46, 0.0 }
 0x38b   : > { %v5922_v12 = vmax.f32 %v5890_v38, 0.0 }
 0x38c   : > { %v5920_v27 = vmax.f32 %v5888_v9, 0.0  ;;  %v7555_v28 = vpop.f32.mrb[0].mxu1 }
 0x38d   : > { %v5946_v16 = vpack.c.bf16 %v5922_v12, %v5921_v1  ;;  %v7621_v59 = vadd.f32 %v7555_v28, %v9878_v14  ;;  %v5773_v40 = vpop.f32.mrb[1].mxu1 }
 0x38e   : > { %v5945_v2 = vpack.c.bf16 %v5920_v27, %v5919_v37  ;;  %v7622_v15 = vadd.f32 %v5773_v40, %v9880_v42  ;;  %v7556_v47 = vpop.f32.mrb[2].mxu1 }
 0x38f   : > { %v5893_v19 = vadd.f32 %v7621_v59, %v9925_v51  ;;  %v7623_v61 = vadd.f32 %v7556_v47, %v9882_v25  ;;  %v5776_v50 = vpop.f32.mrb[3].mxu1 }
 0x390   : > { %v5891_v52 = vadd.f32 %v7622_v15, %v9925_v51  ;;  %v7624_v17 = vadd.f32 %v5776_v50, %v9884_v22  ;;  %7583 = vmatprep.mubr.msk.bf16.mxu0 %vm1791_vm11, %v5945_v2 }
 0x391   : > { %v5894_v49 = vadd.f32 %v7623_v61, %v9925_v51  ;;  %7584 = vmatmul.mubr.msk.bf16.gmra.mrb[76].mxu0 %vm1791_vm11, %v5946_v16  ;;  %v5925_v35 = vmax.f32 %v5893_v19, 0.0 }
 0x392   : > { %v5892_v14 = vadd.f32 %v7624_v17, %v9925_v51  ;;  %v5923_v56 = vmax.f32 %v5891_v52, 0.0 }
 0x393   : > { %v5926_v42 = vmax.f32 %v5894_v49, 0.0  ;;  %v8032_v49 = vld [vmem:[%s8212_s19 + $0x8] sm:$0xff]  }
 0x394   : > { %v5924_v55 = vmax.f32 %v5892_v14, 0.0  ;;  %v7559_v8 = vpop.f32.mrb[4].mxu1  ;;  %v6177_v14 = vunpack.c.l.bf16 %v8032_v49 }
 0x395   : > { %v5948_v57 = vpack.c.bf16 %v5926_v42, %v5925_v35  ;;  %v7625_v25 = vadd.f32 %v7559_v8, %v9890_v24  ;;  %v5789_v3 = vpop.f32.mrb[5].mxu1  ;;  %v8033_v35 = vld [vmem:[%s8212_s19] sm:$0xff]   ;;  %v6178_v8 = vunpack.c.h.bf16 %v8032_v49 }
 0x396   : > { %v5947_v6 = vpack.c.bf16 %v5924_v55, %v5923_v56  ;;  %v7626_v22 = vadd.f32 %v5789_v3, %v9892_v48  ;;  %v7560_v34 = vpop.f32.mrb[6].mxu1 }
 0x397   : > { %v5897_v41 = vadd.f32 %v7625_v25, %v9925_v51  ;;  %v7627_v53 = vadd.f32 %v7560_v34, %v9894_v60  ;;  %v5792_v21 = vpop.f32.mrb[7].mxu1 }
 0x398   : > { %v5895_v7 = vadd.f32 %v7626_v22, %v9925_v51  ;;  %v7628_v26 = vadd.f32 %v5792_v21, %v9896_v30  ;;  %7587 = vmatprep.mubr.msk.bf16.mxu0 %vm1791_vm11, %v5947_v6 }
 0x399   : > { %v5898_v11 = vadd.f32 %v7627_v53, %v9925_v51  ;;  %7588 = vmatmul.mubr.msk.bf16.gmra.mrb[80].mxu0 %vm1791_vm11, %v5948_v57  ;;  %v5929_v33 = vmax.f32 %v5897_v41, 0.0  ;;  %v6176_v57 = vunpack.c.h.bf16 %v8033_v35 }
 0x39a   : > { %v5896_v24 = vadd.f32 %v7628_v26, %v9925_v51  ;;  %v5927_v43 = vmax.f32 %v5895_v7, 0.0 }
 0x39b   : > { %v5930_v48 = vmax.f32 %v5898_v11, 0.0 }
 0x39c   : > { %v5928_v23 = vmax.f32 %v5896_v24, 0.0  ;;  %v7563_v5 = vpop.f32.mrb[8].mxu1 }
 0x39d   : > { %v5950_v63 = vpack.c.bf16 %v5930_v48, %v5929_v33  ;;  %v7629_v60 = vadd.f32 %v7563_v5, %v9898_v29  ;;  %v5805_v44 = vpop.f32.mrb[9].mxu1  ;;  %v8034_v48 = vld [vmem:[%s8212_s19 + $0x18] sm:$0xff]  }
 0x39e   : > { %v5949_v39 = vpack.c.bf16 %v5928_v23, %v5927_v43  ;;  %v7630_v30 = vadd.f32 %v5805_v44, %v9900_v20  ;;  %v7564_v62 = vpop.f32.mrb[10].mxu1  ;;  %v6181_v43 = vunpack.c.l.bf16 %v8034_v48 }
 0x39f   : > { %v5901_v0 = vadd.f32 %v7629_v60, %v9925_v51  ;;  %v7631_v36 = vadd.f32 %v7564_v62, %v9902_v4  ;;  %v5808_v32 = vpop.f32.mrb[11].mxu1  ;;  %v8035_v60 = vld [vmem:[%s8212_s19 + $0x10] sm:$0xff]  }
 0x3a0   : > { %v5899_v18 = vadd.f32 %v7630_v30, %v9925_v51  ;;  %v7632_v46 = vadd.f32 %v5808_v32, %v9904_v45  ;;  %7591 = vmatprep.mubr.msk.bf16.mxu0 %vm1791_vm11, %v5949_v39  ;;  %v6179_v44 = vunpack.c.l.bf16 %v8035_v60 }
 0x3a1   : > { %v5902_v54 = vadd.f32 %v7631_v36, %v9925_v51  ;;  %7592 = vmatmul.mubr.msk.bf16.gmra.mrb[84].mxu0 %vm1791_vm11, %v5950_v63  ;;  %v5933_v38 = vmax.f32 %v5901_v0, 0.0  ;;  %v6182_v0 = vunpack.c.h.bf16 %v8034_v48 }
 0x3a2   : > { %v5900_v29 = vadd.f32 %v7632_v46, %v9925_v51  ;;  %v5931_v9 = vmax.f32 %v5899_v18, 0.0  ;;  %v6180_v46 = vunpack.c.h.bf16 %v8035_v60 }
 0x3a3   : > { %v5934_v20 = vmax.f32 %v5902_v54, 0.0 }
 0x3a4   : > { %v5932_v1 = vmax.f32 %v5900_v29, 0.0  ;;  %v7567_v12 = vpop.f32.mrb[12].mxu1 }
 0x3a5   : > { %v5952_v37 = vpack.c.bf16 %v5934_v20, %v5933_v38  ;;  %v7633_v4 = vadd.f32 %v7567_v12, %v9906_v31  ;;  %v5821_v27 = vpop.f32.mrb[13].mxu1 }
 0x3a6   : > { %v5951_v28 = vpack.c.bf16 %v5932_v1, %v5931_v9  ;;  %v7634_v45 = vadd.f32 %v5821_v27, %v9908_v13  ;;  %v7568_v16 = vpop.f32.mrb[14].mxu1 }
 0x3a7   : > { %v5905_v59 = vadd.f32 %v7633_v4, %v9925_v51  ;;  %v7635_v40 = vadd.f32 %v7568_v16, %v9910_v10  ;;  %v5824_v2 = vpop.f32.mrb[15].mxu1 }
 0x3a8   : > { %v5903_v15 = vadd.f32 %v7634_v45, %v9925_v51  ;;  %v7636_v47 = vadd.f32 %v5824_v2, %v9912_v58  ;;  %7595 = vmatprep.mubr.msk.bf16.mxu0 %vm1791_vm11, %v5951_v28  ;;  %v9998_v58 = vld [vmem:[%s10175_s6] ss:$0 sm:$0xff]  ;;  %v8036_v45 = vld [vmem:[%s8212_s19 + $0x28] sm:$0xff]  }
 0x3a9   : > { %v5906_v31 = vadd.f32 %v7635_v40, %v9925_v51  ;;  %7596 = vmatmul.mubr.msk.bf16.gmra.mrb[88].mxu0 %vm1791_vm11, %v5952_v37  ;;  %v5937_v19 = vmax.f32 %v5905_v59, 0.0  ;;  %v6185_v16 = vunpack.c.l.bf16 %v8036_v45 }
 0x3aa   : > { %v5904_v13 = vadd.f32 %v7636_v47, %v9925_v51  ;;  %v5935_v50 = vmax.f32 %v5903_v15, 0.0  ;;  %v6175_v51 = vunpack.c.l.bf16 %v8033_v35  ;;  %v8037_v15 = vld [vmem:[%s8212_s19 + $0x20] sm:$0xff]  }
 0x3ab   : > { %v5938_v61 = vmax.f32 %v5906_v31, 0.0  ;;  %v6183_v47 = vunpack.c.l.bf16 %v8037_v15 }
 0x3ac   : > { %v5936_v10 = vmax.f32 %v5904_v13, 0.0 }
 0x3ad   : > { %v5954_v52 = vpack.c.bf16 %v5938_v61, %v5937_v19  ;;  %v6186_v61 = vunpack.c.h.bf16 %v8036_v45 }
 0x3ae   : > { %v5953_v17 = vpack.c.bf16 %v5936_v10, %v5935_v50 }
 0x3b0   : > { %7599 = vmatprep.mubr.msk.bf16.mxu0 %vm1791_vm11, %v5953_v17  ;;  %v6184_v17 = vunpack.c.h.bf16 %v8037_v15 }
 0x3b1   : > { %7600 = vmatmul.mubr.msk.bf16.gmra.mrb[92].mxu0 %vm1791_vm11, %v5954_v52 }
 0x44c   : > { %v7573_v42 = vpop.f32.mrb[64].mxu0 }
 0x44d   : > { %v6057_v56 = vadd.f32 %v7573_v42, %v9998_v58  ;;  %v6048_v55 = vpop.f32.mrb[65].mxu0 }
 0x44e   : > { %v6049_v25 = vadd.f32 %v9998_v58, %v6048_v55  ;;  %v7574_v3 = vpop.f32.mrb[66].mxu0 }
 0x44f   : > { %v6209_v6 = vadd.f32 %v6177_v14, %v6057_v56  ;;  %v6060_v22 = vadd.f32 %v7574_v3, %v9998_v58  ;;  %v6051_v34 = vpop.f32.mrb[67].mxu0 }
 0x450   : > { %v6207_v41 = vadd.f32 %v6175_v51, %v6049_v25  ;;  %v6052_v53 = vadd.f32 %v9998_v58, %v6051_v34 }
 0x451   : > { %v6241_v21 = vmax.f32 %v6209_v6, 0.0  ;;  %v6210_v7 = vadd.f32 %v6178_v8, %v6060_v22  ;;  %v8038_v6 = vld [vmem:[%s8212_s19 + $0x38] sm:$0xff]  }
 0x452   : > { %v6239_v26 = vmax.f32 %v6207_v41, 0.0  ;;  %v6208_v11 = vadd.f32 %v6176_v57, %v6052_v53  ;;  %v6189_v22 = vunpack.c.l.bf16 %v8038_v6 }
 0x453   : > { %v7011_v24 = vpack.c.bf16 %v6241_v21, %v6241_v21  ;;  %v6242_v33 = vmax.f32 %v6210_v7, 0.0  ;;  %v8039_v21 = vld [vmem:[%s8212_s19 + $0x30] sm:$0xff]  }
 0x454   : > { %v7009_v23 = vpack.c.bf16 %v6239_v26, %v6239_v26  ;;  %v6240_v5 = vmax.f32 %v6208_v11, 0.0  ;;  %v7577_v63 = vpop.f32.mrb[68].mxu0  ;;  %v6187_v7 = vunpack.c.l.bf16 %v8039_v21 }
 0x455   : > { %6402 = vst.msk [vmem:[%s10011_s9 + $0x8] sm:$0xf] %vm6399_vm2, %v7011_v24  ;;  %v7012_v39 = vpack.c.bf16 %v6242_v33, %v6242_v33  ;;  %v6073_v30 = vadd.f32 %v7577_v63, %v9998_v58  ;;  %v6064_v62 = vpop.f32.mrb[69].mxu0  ;;  %v6190_v33 = vunpack.c.h.bf16 %v8038_v6 }
 0x456   : > { %6400 = vst.msk [vmem:[%s10011_s9] sm:$0xf] %vm6399_vm2, %v7009_v23  ;;  %v7010_v36 = vpack.c.bf16 %v6240_v5, %v6240_v5  ;;  %v6065_v32 = vadd.f32 %v9998_v58, %v6064_v62  ;;  %v7578_v18 = vpop.f32.mrb[70].mxu0  ;;  %v6188_v5 = vunpack.c.h.bf16 %v8039_v21 }
 0x457   : > { %6403 = vst.msk [vmem:[%s10011_s9 + $0xc] sm:$0xf] %vm6399_vm2, %v7012_v39  ;;  %v6213_v54 = vadd.f32 %v6181_v43, %v6073_v30  ;;  %v6076_v29 = vadd.f32 %v7578_v18, %v9998_v58  ;;  %v6067_v38 = vpop.f32.mrb[71].mxu0 }
 0x458   : > { %6401 = vst.msk [vmem:[%s10011_s9 + $0x4] sm:$0xf] %vm6399_vm2, %v7010_v36  ;;  %v6211_v20 = vadd.f32 %v6179_v44, %v6065_v32  ;;  %v6068_v9 = vadd.f32 %v9998_v58, %v6067_v38 }
 0x459   : > { %v6245_v1 = vmax.f32 %v6213_v54, 0.0  ;;  %v6214_v12 = vadd.f32 %v6182_v0, %v6076_v29  ;;  %v8040_v54 = vld [vmem:[%s8212_s19 + $0x48] sm:$0xff]  }
 0x45a   : > { %v6243_v37 = vmax.f32 %v6211_v20, 0.0  ;;  %v6212_v4 = vadd.f32 %v6180_v46, %v6068_v9  ;;  %v6193_v29 = vunpack.c.l.bf16 %v8040_v54 }
 0x45b   : > { %v7015_v27 = vpack.c.bf16 %v6245_v1, %v6245_v1  ;;  %v6246_v28 = vmax.f32 %v6214_v12, 0.0  ;;  %v8041_v1 = vld [vmem:[%s8212_s19 + $0x40] sm:$0xff]  }
 0x45c   : > { %v7013_v59 = vpack.c.bf16 %v6243_v37, %v6243_v37  ;;  %v6244_v40 = vmax.f32 %v6212_v4, 0.0  ;;  %v7581_v2 = vpop.f32.mrb[72].mxu0  ;;  %v6191_v12 = vunpack.c.l.bf16 %v8041_v1 }
 0x45d   : > { %6406 = vst.msk [vmem:[%s10011_s9 + $0x18] sm:$0xf] %vm6399_vm2, %v7015_v27  ;;  %v7016_v31 = vpack.c.bf16 %v6246_v28, %v6246_v28  ;;  %v6089_v13 = vadd.f32 %v7581_v2, %v9998_v58  ;;  %v6080_v19 = vpop.f32.mrb[73].mxu0  ;;  %v6194_v28 = vunpack.c.h.bf16 %v8040_v54 }
 0x45e   : > { %6404 = vst.msk [vmem:[%s10011_s9 + $0x10] sm:$0xf] %vm6399_vm2, %v7013_v59  ;;  %v7014_v50 = vpack.c.bf16 %v6244_v40, %v6244_v40  ;;  %v6081_v10 = vadd.f32 %v9998_v58, %v6080_v19  ;;  %v7582_v52 = vpop.f32.mrb[74].mxu0  ;;  %v6192_v40 = vunpack.c.h.bf16 %v8041_v1 }
 0x45f   : > { %6407 = vst.msk [vmem:[%s10011_s9 + $0x1c] sm:$0xf] %vm6399_vm2, %v7016_v31  ;;  %v6217_v49 = vadd.f32 %v6185_v16, %v6089_v13  ;;  %v6092_v14 = vadd.f32 %v7582_v52, %v9998_v58  ;;  %v6083_v35 = vpop.f32.mrb[75].mxu0 }
 0x460   : > { %6405 = vst.msk [vmem:[%s10011_s9 + $0x14] sm:$0xf] %vm6399_vm2, %v7014_v50  ;;  %v6215_v51 = vadd.f32 %v6183_v47, %v6081_v10  ;;  %v6084_v42 = vadd.f32 %v9998_v58, %v6083_v35 }
 0x461   : > { %v6249_v56 = vmax.f32 %v6217_v49, 0.0  ;;  %v6218_v55 = vadd.f32 %v6186_v61, %v6092_v14  ;;  %v8042_v49 = vld [vmem:[%s8212_s19 + $0x58] sm:$0xff]  }
 0x462   : > { %v6247_v8 = vmax.f32 %v6215_v51, 0.0  ;;  %v6216_v57 = vadd.f32 %v6184_v17, %v6084_v42  ;;  %v6197_v14 = vunpack.c.l.bf16 %v8042_v49 }
 0x463   : > { %v7019_v25 = vpack.c.bf16 %v6249_v56, %v6249_v56  ;;  %v6250_v3 = vmax.f32 %v6218_v55, 0.0  ;;  %v8043_v56 = vld [vmem:[%s8212_s19 + $0x50] sm:$0xff]  }
 0x464   : > { %v7017_v34 = vpack.c.bf16 %v6247_v8, %v6247_v8  ;;  %v6248_v41 = vmax.f32 %v6216_v57, 0.0  ;;  %v7585_v53 = vpop.f32.mrb[76].mxu0  ;;  %v6195_v55 = vunpack.c.l.bf16 %v8043_v56 }
 0x465   : > { %6410 = vst.msk [vmem:[%s10011_s9 + $0x28] sm:$0xf] %vm6399_vm2, %v7019_v25  ;;  %v7020_v26 = vpack.c.bf16 %v6250_v3, %v6250_v3  ;;  %v6105_v11 = vadd.f32 %v7585_v53, %v9998_v58  ;;  %v6096_v24 = vpop.f32.mrb[77].mxu0  ;;  %v6198_v3 = vunpack.c.h.bf16 %v8042_v49 }
 0x466   : > { %6408 = vst.msk [vmem:[%s10011_s9 + $0x20] sm:$0xf] %vm6399_vm2, %v7017_v34  ;;  %v7018_v48 = vpack.c.bf16 %v6248_v41, %v6248_v41  ;;  %v6097_v43 = vadd.f32 %v9998_v58, %v6096_v24  ;;  %v7586_v23 = vpop.f32.mrb[78].mxu0  ;;  %v6196_v41 = vunpack.c.h.bf16 %v8043_v56 }
 0x467   : > { %6411 = vst.msk [vmem:[%s10011_s9 + $0x2c] sm:$0xf] %vm6399_vm2, %v7020_v26  ;;  %v6221_v63 = vadd.f32 %v6189_v22, %v6105_v11  ;;  %v6108_v60 = vadd.f32 %v7586_v23, %v9998_v58  ;;  %v6099_v44 = vpop.f32.mrb[79].mxu0 }
 0x468   : > { %6409 = vst.msk [vmem:[%s10011_s9 + $0x24] sm:$0xf] %vm6399_vm2, %v7018_v48  ;;  %v6219_v39 = vadd.f32 %v6187_v7, %v6097_v43  ;;  %v6100_v30 = vadd.f32 %v9998_v58, %v6099_v44 }
 0x469   : > { %v6253_v62 = vmax.f32 %v6221_v63, 0.0  ;;  %v6222_v0 = vadd.f32 %v6190_v33, %v6108_v60  ;;  %v8044_v63 = vld [vmem:[%s8212_s19 + $0x68] sm:$0xff]  }
 0x46a   : > { %v6251_v36 = vmax.f32 %v6219_v39, 0.0  ;;  %v6220_v32 = vadd.f32 %v6188_v5, %v6100_v30  ;;  %v6201_v60 = vunpack.c.l.bf16 %v8044_v63 }
 0x46b   : > { %v7023_v18 = vpack.c.bf16 %v6253_v62, %v6253_v62  ;;  %v6254_v46 = vmax.f32 %v6222_v0, 0.0  ;;  %v8045_v62 = vld [vmem:[%s8212_s19 + $0x60] sm:$0xff]  }
 0x46c   : > { %v7021_v38 = vpack.c.bf16 %v6251_v36, %v6251_v36  ;;  %v6252_v20 = vmax.f32 %v6220_v32, 0.0  ;;  %v7589_v9 = vpop.f32.mrb[80].mxu0  ;;  %v6199_v0 = vunpack.c.l.bf16 %v8045_v62 }
 0x46d   : > { %6414 = vst.msk [vmem:[%s10011_s9 + $0x38] sm:$0xf] %vm6399_vm2, %v7023_v18  ;;  %v7024_v37 = vpack.c.bf16 %v6254_v46, %v6254_v46  ;;  %v6121_v4 = vadd.f32 %v7589_v9, %v9998_v58  ;;  %v6112_v27 = vpop.f32.mrb[81].mxu0  ;;  %v6202_v46 = vunpack.c.h.bf16 %v8044_v63 }
 0x46e   : > { %6412 = vst.msk [vmem:[%s10011_s9 + $0x30] sm:$0xf] %vm6399_vm2, %v7021_v38  ;;  %v7022_v45 = vpack.c.bf16 %v6252_v20, %v6252_v20  ;;  %v6113_v16 = vadd.f32 %v9998_v58, %v6112_v27  ;;  %v7590_v59 = vpop.f32.mrb[82].mxu0  ;;  %v6200_v20 = vunpack.c.h.bf16 %v8045_v62 }
 0x46f   : > { %6415 = vst.msk [vmem:[%s10011_s9 + $0x3c] sm:$0xf] %vm6399_vm2, %v7024_v37  ;;  %v6225_v2 = vadd.f32 %v6193_v29, %v6121_v4  ;;  %v6124_v15 = vadd.f32 %v7590_v59, %v9998_v58  ;;  %v6115_v47 = vpop.f32.mrb[83].mxu0 }
 0x470   : > { %6413 = vst.msk [vmem:[%s10011_s9 + $0x34] sm:$0xf] %vm6399_vm2, %v7022_v45  ;;  %v6223_v31 = vadd.f32 %v6191_v12, %v6113_v16  ;;  %v6116_v13 = vadd.f32 %v9998_v58, %v6115_v47 }
 0x471   : > { %v6257_v19 = vmax.f32 %v6225_v2, 0.0  ;;  %v6226_v61 = vadd.f32 %v6194_v28, %v6124_v15  ;;  %v8046_v2 = vld [vmem:[%s8212_s19 + $0x78] sm:$0xff]  }
 0x472   : > { %v6255_v50 = vmax.f32 %v6223_v31, 0.0  ;;  %v6224_v10 = vadd.f32 %v6192_v40, %v6116_v13  ;;  %v6205_v15 = vunpack.c.l.bf16 %v8046_v2 }
 0x473   : > { %v7027_v52 = vpack.c.bf16 %v6257_v19, %v6257_v19  ;;  %v6258_v17 = vmax.f32 %v6226_v61, 0.0  ;;  %v8047_v19 = vld [vmem:[%s8212_s19 + $0x70] sm:$0xff]   ;;  %s7041_s19 = sshll.u32 %s8177_s28, 11  ;;  %s10128_s28 = scalar_lea.sflag [#allocation4], %s269_s29 }
 0x474   : > { %v7025_v35 = vpack.c.bf16 %v6255_v50, %v6255_v50  ;;  %v6256_v51 = vmax.f32 %v6224_v10, 0.0  ;;  %v7593_v42 = vpop.f32.mrb[84].mxu0  ;;  %v6203_v61 = vunpack.c.l.bf16 %v8047_v19  ;;  %s10116_s16 = scalar_lea.hbm %s10176_s7, %s7041_s19 }
 0x475   : > { %6418 = vst.msk [vmem:[%s10011_s9 + $0x48] sm:$0xf] %vm6399_vm2, %v7027_v52  ;;  %v7028_v8 = vpack.c.bf16 %v6258_v17, %v6258_v17  ;;  %v6137_v57 = vadd.f32 %v7593_v42, %v9998_v58  ;;  %v6128_v25 = vpop.f32.mrb[85].mxu0  ;;  %v6206_v17 = vunpack.c.h.bf16 %v8046_v2 }
 0x476   : > { %6416 = vst.msk [vmem:[%s10011_s9 + $0x40] sm:$0xf] %vm6399_vm2, %v7025_v35  ;;  %v7026_v6 = vpack.c.bf16 %v6256_v51, %v6256_v51  ;;  %v6129_v22 = vadd.f32 %v9998_v58, %v6128_v25  ;;  %v7594_v34 = vpop.f32.mrb[86].mxu0  ;;  %v6204_v51 = vunpack.c.h.bf16 %v8047_v19 }
 0x477   : > { %6419 = vst.msk [vmem:[%s10011_s9 + $0x4c] sm:$0xf] %vm6399_vm2, %v7028_v8  ;;  %v6229_v53 = vadd.f32 %v6197_v14, %v6137_v57  ;;  %v6140_v21 = vadd.f32 %v7594_v34, %v9998_v58  ;;  %v6131_v7 = vpop.f32.mrb[87].mxu0 }
 0x478   : > { %6417 = vst.msk [vmem:[%s10011_s9 + $0x44] sm:$0xf] %vm6399_vm2, %v7026_v6  ;;  %v6227_v26 = vadd.f32 %v6195_v55, %v6129_v22  ;;  %v6132_v11 = vadd.f32 %v9998_v58, %v6131_v7 }
 0x479   : > { %v6261_v24 = vmax.f32 %v6229_v53, 0.0  ;;  %v6230_v33 = vadd.f32 %v6198_v3, %v6140_v21 }
 0x47a   : > { %v6259_v48 = vmax.f32 %v6227_v26, 0.0  ;;  %v6228_v43 = vadd.f32 %v6196_v41, %v6132_v11 }
 0x47b   : > { %v7031_v23 = vpack.c.bf16 %v6261_v24, %v6261_v24  ;;  %v6262_v5 = vmax.f32 %v6230_v33, 0.0 }
 0x47c   : > { %v7029_v44 = vpack.c.bf16 %v6259_v48, %v6259_v48  ;;  %v6260_v39 = vmax.f32 %v6228_v43, 0.0  ;;  %v7597_v30 = vpop.f32.mrb[88].mxu0 }
 0x47d   : > { %6422 = vst.msk [vmem:[%s10011_s9 + $0x58] sm:$0xf] %vm6399_vm2, %v7031_v23  ;;  %v7032_v36 = vpack.c.bf16 %v6262_v5, %v6262_v5  ;;  %v6153_v32 = vadd.f32 %v7597_v30, %v9998_v58  ;;  %v6144_v18 = vpop.f32.mrb[89].mxu0 }
 0x47e   : > { %6420 = vst.msk [vmem:[%s10011_s9 + $0x50] sm:$0xf] %vm6399_vm2, %v7029_v44  ;;  %v7030_v54 = vpack.c.bf16 %v6260_v39, %v6260_v39  ;;  %v6145_v29 = vadd.f32 %v9998_v58, %v6144_v18  ;;  %v7598_v38 = vpop.f32.mrb[90].mxu0 }
 0x47f   : > { %6423 = vst.msk [vmem:[%s10011_s9 + $0x5c] sm:$0xf] %vm6399_vm2, %v7032_v36  ;;  %v6233_v9 = vadd.f32 %v6201_v60, %v6153_v32  ;;  %v6156_v1 = vadd.f32 %v7598_v38, %v9998_v58  ;;  %v6147_v12 = vpop.f32.mrb[91].mxu0 }
 0x480   : > { %6421 = vst.msk [vmem:[%s10011_s9 + $0x54] sm:$0xf] %vm6399_vm2, %v7030_v54  ;;  %v6231_v37 = vadd.f32 %v6199_v0, %v6145_v29  ;;  %v6148_v4 = vadd.f32 %v9998_v58, %v6147_v12 }
 0x481   : > { %v6265_v27 = vmax.f32 %v6233_v9, 0.0  ;;  %v6234_v28 = vadd.f32 %v6202_v46, %v6156_v1 }
 0x482   : > { %v6263_v45 = vmax.f32 %v6231_v37, 0.0  ;;  %v6232_v16 = vadd.f32 %v6200_v20, %v6148_v4 }
 0x483   : > { %v7035_v59 = vpack.c.bf16 %v6265_v27, %v6265_v27  ;;  %v6266_v40 = vmax.f32 %v6234_v28, 0.0 }
 0x484   : > { %v7033_v47 = vpack.c.bf16 %v6263_v45, %v6263_v45  ;;  %v6264_v31 = vmax.f32 %v6232_v16, 0.0  ;;  %v7601_v13 = vpop.f32.mrb[92].mxu0 }
 0x485   : > { %6426 = vst.msk [vmem:[%s10011_s9 + $0x68] sm:$0xf] %vm6399_vm2, %v7035_v59  ;;  %v7036_v50 = vpack.c.bf16 %v6266_v40, %v6266_v40  ;;  %v6169_v10 = vadd.f32 %v7601_v13, %v9998_v58  ;;  %v6160_v52 = vpop.f32.mrb[93].mxu0 }
 0x486   : > { %6424 = vst.msk [vmem:[%s10011_s9 + $0x60] sm:$0xf] %vm6399_vm2, %v7033_v47  ;;  %v7034_v49 = vpack.c.bf16 %v6264_v31, %v6264_v31  ;;  %v6161_v14 = vadd.f32 %v9998_v58, %v6160_v52  ;;  %v7602_v35 = vpop.f32.mrb[94].mxu0 }
 0x487   : > { %6427 = vst.msk [vmem:[%s10011_s9 + $0x6c] sm:$0xf] %vm6399_vm2, %v7036_v50  ;;  %v6237_v42 = vadd.f32 %v6205_v15, %v6169_v10  ;;  %v6172_v56 = vadd.f32 %v7602_v35, %v9998_v58  ;;  %v6163_v55 = vpop.f32.mrb[95].mxu0 }
 0x488   : > { %6425 = vst.msk [vmem:[%s10011_s9 + $0x64] sm:$0xf] %vm6399_vm2, %v7034_v49  ;;  %v6235_v8 = vadd.f32 %v6203_v61, %v6161_v14  ;;  %v6164_v57 = vadd.f32 %v9998_v58, %v6163_v55 }
 0x489   : > { %v6269_v25 = vmax.f32 %v6237_v42, 0.0  ;;  %v6238_v3 = vadd.f32 %v6206_v17, %v6172_v56 }
 0x48a   : > { %v6267_v6 = vmax.f32 %v6235_v8, 0.0  ;;  %v6236_v22 = vadd.f32 %v6204_v51, %v6164_v57 }
 0x48b   : > { %v7039_v34 = vpack.c.bf16 %v6269_v25, %v6269_v25  ;;  %v6270_v41 = vmax.f32 %v6238_v3, 0.0 }
 0x48c   : > { %v7037_v53 = vpack.c.bf16 %v6267_v6, %v6267_v6  ;;  %v6268_v21 = vmax.f32 %v6236_v22, 0.0 }
 0x48d   : > { %6430 = vst.msk [vmem:[%s10011_s9 + $0x78] sm:$0xf] %vm6399_vm2, %v7039_v34  ;;  %v7040_v7 = vpack.c.bf16 %v6270_v41, %v6270_v41 }
 0x48e   : > { %6428 = vst.msk [vmem:[%s10011_s9 + $0x70] sm:$0xf] %vm6399_vm2, %v7037_v53  ;;  %v7038_v58 = vpack.c.bf16 %v6268_v21, %v6268_v21 }
 0x48f   : > { %6431 = vst.msk [vmem:[%s10011_s9 + $0x7c] sm:$0xf] %vm6399_vm2, %v7040_v7 }
 0x490   : > { %6429 = vst.msk [vmem:[%s10011_s9 + $0x74] sm:$0xf] %vm6399_vm2, %v7038_v58 }
 0x491   : > { %8061 = shalt.err (!%p8058_p3)
}
 0x492   : > { %s8062_s22 = scalar_lea.hbm %s10116_s16, 2048  ;;  %s8066_s8 = scalar_lea.hbm %s10176_s7, 4096 }
 0x493   : > { %p8063_p4 = scmp.ne.s32.totalorder %s10116_s16, %s8062_s22  ;;  %p8067_p9 = scmp.lt.u32.totalorder %s10116_s16, %s10176_s7 }
 0x494   : > { %p8068_p10 = scmp.lt.u32.totalorder %s8066_s8, %s8062_s22  ;;  %p8070_p12 = scmp.lt.u32.totalorder %s8062_s22, %s10116_s16 }
 0x495   : > { %p8064_p7 = pnand %p8063_p4, %p8194_p5 }
 0x496   : > { %p8069_p11 = por %p8068_p10, %p8067_p9 }
 0x497   : > { %p8065_p8 = pneg %p8064_p7 }
 0x498   : > { %p8071_p13 = por %p8070_p12, %p8069_p11 }
 0x49a   : > { %p8072_p0 = pnand %p8071_p13, %p8065_p8 }
 0x49c   : > { %8075 = shalt.err (!%p8072_p0)
}
 0x49d   : > { %s8114_s14 = smov 64   ;;  %s8115_s15 = smov 4  }
 0x49e   : > { %7872 = dma.vmem_to_hbm [thread:$0]  (%p8194_p5), %s10118_s13, 2048, %s10116_s16, %s10128_s28, %s8114_s14, %s8114_s14, %s8115_s15  }
 0x49f PF: > { %p7878_p1 = scmp.ge.s32.totalorder %s8110_s27, 2  ;;  %s6461_s17 = sand.u32 1, %s8098_s24  }
 0x4a0   : > { %s6462_s18 = scalar_lea.sflag [#allocation4], %s6461_s17 }
 0x4a1   : > { %p7875_p2 = pnand %p7878_p1, %p8198_p6 }
 0x4a3   : > { %8093 = dma.done.wait (!%p7875_p2), %s6462_s18, 2048  }
 0x4a4   : > { %8095 = vsyncadd (!%p7875_p2), %s6462_s18, 4294965248  ;;  %p17_p3 = scmp.ge.s32.totalorder %s8181_s30, 4   ;;  %s10290_s24 = smov %s8102_s25 }
 0x4a5   : > { %s10291_s25 = smov %s8106_s26  ;;  %s10292_s26 = smov %s8192_s10 }
 0x4a6   : > { %s10293_s27 = smov %s8181_s30  ;;  %19 = sbr.rel (!%p17_p3) target bundleno = 3 (0x3), region = 86 }
 0x4ad   :  { %6467 = vsyncpa [#allocation4], 1 }
 0x4ae   :  { %6469 = vsyncpa [#allocation4 + $0x1], 1 }

</bundles_post_ra>
